<compile_context>
chip_gen: v6e
topology: v6e:2x2x1
jax: 0.10.0
libtpu: 0.0.40
codegen_flags: <defaults>
</compile_context>

<pallas_src>
import math
from functools import partial

import numpy as np
import jax
import jax.numpy as jnp
from jax.experimental import pallas as pl
from jax.experimental.pallas import tpu as pltpu


def _vmem_limit_bytes():
    """Generation-aware scoped-VMEM cap: ~96 MiB on 128-MiB parts, ~48 MiB on v7x."""
    phys = 64 * 1024 * 1024                      # conservative default (v7x per-core)
    try:
        info = pltpu.get_tpu_info()
        phys = int(getattr(info, "vmem_capacity_bytes", phys))
    except Exception:
        pass
    return min((phys * 3) // 4, 100 * 1024 * 1024)


def _layer_norm(x, g, b, eps=1e-5):
    mu = jnp.mean(x, axis=-1, keepdims=True)
    xc = x - mu
    var = jnp.mean(xc * xc, axis=-1, keepdims=True)
    return xc * jax.lax.rsqrt(var + eps) * g + b


def dual_encoder_kernel(h1_ref, h2_ref, vecs_ref, c1_ref,
                        wq_ref, wkv_ref, wo_ref, w1_ref, w2_ref,
                        out_ref, ctx_ref, *, n_heads, ffn_chunk):
    B, TS, D = h1_ref.shape
    H = n_heads
    hd = D // H
    R = B * TS
    scale = 1.0 / math.sqrt(hd)
    mdt = wq_ref.dtype                           # matmul operand dtype (bf16 or f32)

    h1 = h1_ref[...].astype(jnp.float32).reshape(R, D)
    h2 = h2_ref[...].astype(jnp.float32).reshape(R, D)

    vecs = vecs_ref[...]                         # packed (9, D) f32 param vectors
    g1, b1 = vecs[0:1, :], vecs[1:2, :]
    g2, b2 = vecs[2:3, :], vecs[3:4, :]
    bq, bk, bv = vecs[4:5, :], vecs[5:6, :], vecs[6:7, :]
    bo, c2 = vecs[7:8, :], vecs[8:9, :]

    # ---- pre-norm (f32) + folded projections: Q matmul + fused (D,2D) K|V ----
    ln1_h1 = _layer_norm(h1, g1, b1).astype(mdt)
    ln1_h2 = _layer_norm(h2, g1, b1).astype(mdt)
    q = jnp.dot(ln1_h1, wq_ref[...], preferred_element_type=jnp.float32) + bq
    kv = jnp.dot(ln1_h2, wkv_ref[...], preferred_element_type=jnp.float32)
    k = kv[:, :D] + bk
    v = kv[:, D:] + bv

    q3 = q.reshape(B, TS, D)
    k3 = k.reshape(B, TS, D)

    # Constant block-diagonal 0/1 segment matrices (per-head reduce / broadcast
    # on the MXU instead of reshape+sum lane relayouts on the VPU/XLU).
    d_i = jax.lax.broadcasted_iota(jnp.int32, (D, H), 0)
    h_i = jax.lax.broadcasted_iota(jnp.int32, (D, H), 1)
    seg = ((d_i >= h_i * hd) & (d_i < (h_i + 1) * hd)).astype(jnp.float32)   # (D,H)
    dT_i = jax.lax.broadcasted_iota(jnp.int32, (H, D), 1)
    hT_i = jax.lax.broadcasted_iota(jnp.int32, (H, D), 0)
    segT = ((dT_i >= hT_i * hd) & (dT_i < (hT_i + 1) * hd)).astype(jnp.float32)  # (H,D)

    # ---- multi-head attention over the leading (B) axis ----
    for l in range(B):                           # B is small & static; unrolled
        qk = (q3[l][None, :, :] * k3).reshape(R, D)                    # (R, D)
        s = jnp.dot(qk, seg, preferred_element_type=jnp.float32) * scale   # (R, H)
        s = s.reshape(B, TS, H)
        s_max = jnp.max(s, axis=0)                                     # (TS, H)
        e = jnp.exp(s - s_max[None, :, :])                             # (B, TS, H)
        inv = pl.reciprocal(jnp.sum(e, axis=0), approx=True)           # EUP
        p = (e * inv[None, :, :]).reshape(R, H)                        # attn probs
        pfull = jnp.dot(p, segT, preferred_element_type=jnp.float32)   # (R, D)
        ctx_ref[pl.ds(l * TS, TS), :] = jnp.sum((pfull * v).reshape(B, TS, D), axis=0)

    ctx = ctx_ref[...]                           # (R, D)

    # ---- batched epilogue: wo matmul + feature softmax + residual + FFN ----
    attn = jnp.dot(ctx.astype(mdt), wo_ref[...],
                   preferred_element_type=jnp.float32) + bo            # (R, D)

    a_max = jnp.max(attn, axis=-1, keepdims=True)
    a_exp = jnp.exp(attn - a_max)
    a_inv = pl.reciprocal(jnp.sum(a_exp, axis=-1, keepdims=True), approx=True)
    x = h1 + a_exp * a_inv                       # residual + softmax(dim=-1)

    ln2 = _layer_norm(x, g2, b2).astype(mdt)
    hidden = w1_ref.shape[1]
    ff = jnp.zeros((R, D), jnp.float32)
    # Hidden-dim blocking: never materialize the full (R, hidden) f32 activation.
    for c0 in range(0, hidden, ffn_chunk):
        w1c = w1_ref[:, c0:c0 + ffn_chunk]
        c1c = c1_ref[:, c0:c0 + ffn_chunk]
        hid = jnp.maximum(
            jnp.dot(ln2, w1c, preferred_element_type=jnp.float32) + c1c, 0.0
        ).astype(mdt)
        ff = ff + jnp.dot(hid, w2_ref[c0:c0 + ffn_chunk, :],
                          preferred_element_type=jnp.float32)
    ff = ff + c2

    out_ref[...] = (x + ff).reshape(B, TS, D).astype(out_ref.dtype)


def prepare_kernel_params(params, matmul_dtype):
    """Fold the chained projections, fuse K|V, pack (1, D) vectors (once per weight set)."""
    wq = (params["wq"] @ params["wiq"]).astype(matmul_dtype)
    wk = params["wk"] @ params["wik"]
    wv = params["wv"] @ params["wiv"]
    wkv = jnp.concatenate([wk, wv], axis=1).astype(matmul_dtype)   # (D, 2D)
    bq = params["bq"] @ params["wiq"] + params["biq"]
    bk = params["bk"] @ params["wik"] + params["bik"]
    bv = params["bv"] @ params["wiv"] + params["biv"]
    vecs = jnp.concatenate(
        [params["g1"], params["b1"], params["g2"], params["b2"],
         bq, bk, bv, params["bo"], params["c2"]], axis=0).astype(jnp.float32)
    return dict(
        vecs=vecs,
        c1=params["c1"].astype(jnp.float32),
        wq=wq, wkv=wkv,
        wo=params["wo"].astype(matmul_dtype),
        w1=params["w1"].astype(matmul_dtype),
        w2=params["w2"].astype(matmul_dtype),
    )


def _choose_s_tile(S, B, D, hidden, weight_bytes, vmem_limit, *,
                   io_bytes=4, ffn_chunk=512):
    """Pick an S tile: fits (weights + double-buffered acts + temps), prefers
    >=2 grid steps (v7x dual-TC), then M=B*tS aligned to 256 (v6e/v7x) / 128 (v5e),
    then the largest tile."""
    def tile_bytes(ts):
        R = B * ts
        io = 3 * 2 * B * ts * D * io_bytes               # double-buffered h1/h2/out
        tmp = (12 * R * D + 2 * R * ffn_chunk) * 4       # f32 temps + FFN hidden chunk
        return io + tmp

    budget = vmem_limit - weight_bytes - (4 << 20)       # headroom for compiler scratch
    cands = [ts for ts in range(1, S + 1)
             if S % ts == 0 and (ts % 8 == 0 or ts == S)]
    fits = [ts for ts in cands if tile_bytes(ts) <= budget]
    pool = fits if fits else cands[:1]                   # shrink path: smallest legal tile

    def score(ts):
        M = B * ts
        return (S // ts >= 2, M % 256 == 0, M % 128 == 0, ts)

    return max(pool, key=score)


def dual_input_transformer_encoder(h1, h2, attn_mask, params,
                                   matmul_dtype=jnp.bfloat16, s_tile=None,
                                   io_dtype=None, ffn_chunk=512):
    del attn_mask                      # accepted but unused by the live forward path
    B, S, D = h1.shape
    H = int(params["n_heads"])
    assert D % H == 0

    # Optional bf16 activation-I/O path (helps mem-bound configs on v5e).
    if io_dtype is None:
        io_dtype = h1.dtype
    h1 = h1.astype(io_dtype)
    h2 = h2.astype(io_dtype)
    io_bytes = np.dtype(io_dtype).itemsize

    kp = prepare_kernel_params(params, matmul_dtype)
    hidden = kp["w1"].shape[1]
    ffn_chunk = min(ffn_chunk, hidden)
    if hidden % ffn_chunk != 0:
        ffn_chunk = hidden   # TODO(synk): support ragged hidden chunking

    vmem_limit = _vmem_limit_bytes()
    weight_names = ("vecs", "c1", "wq", "wkv", "wo", "w1", "w2")
    weight_bytes = sum(int(np.prod(kp[n].shape)) * np.dtype(kp[n].dtype).itemsize
                       for n in weight_names)

    if s_tile is None:
        s_tile = _choose_s_tile(S, B, D, hidden, weight_bytes, vmem_limit,
                                io_bytes=io_bytes, ffn_chunk=ffn_chunk)
    assert S % s_tile == 0, "s_tile must divide S"
    grid = (S // s_tile,)
    n_tiles = S // s_tile
    R_tile = B * s_tile

    # Advisory cost hint for XLA's scheduler around the custom call.
    flops = n_tiles * (8 * R_tile * D * D + 4 * R_tile * D * hidden
                       + 4 * B * R_tile * D * H)
    transcendentals = n_tiles * (B * R_tile * H + R_tile * D)
    bytes_accessed = 3 * B * S * D * io_bytes + weight_bytes
    cost = pl.CostEstimate(flops=flops, transcendentals=transcendentals,
                           bytes_accessed=bytes_accessed)

    # NOTE: with D < 128 the (., D) slabs are not lane-dense (masked vst); for
    # production-sized D (multiples of 128) all block last dims are lane-dense.
    act_spec = pl.BlockSpec((B, s_tile, D), lambda i: (0, i, 0))

    def run(single_buffer_weights):
        def resident(shape):
            if single_buffer_weights:
                # Constant index_map across the grid -> single-buffer the block.
                return pl.BlockSpec(shape, lambda i: (0,) * len(shape),
                                    pipeline_mode=pl.Buffered(1))
            return pl.BlockSpec(shape, lambda i: (0,) * len(shape))

        in_specs = [act_spec, act_spec] + [resident(kp[n].shape) for n in weight_names]

        out = pl.pallas_call(
            partial(dual_encoder_kernel, n_heads=H, ffn_chunk=ffn_chunk),
            out_shape=jax.ShapeDtypeStruct((B, S, D), io_dtype),
            grid=grid,
            in_specs=in_specs,
            out_specs=act_spec,
            scratch_shapes=[pltpu.VMEM((R_tile, D), jnp.float32)],
            compiler_params=pltpu.CompilerParams(
                dimension_semantics=("parallel",),
                vmem_limit_bytes=vmem_limit,
            ),
            cost_estimate=cost,
        )(h1, h2, *(kp[n] for n in weight_names))
        return jax.block_until_ready(out)

    try:
        return run(True)
    except Exception:
        # TODO(synk): fall back to default double-buffered weight blocks if this
        # jax/Mosaic version rejects pipeline_mode=pl.Buffered(1).
        return run(False)


def init_params(key, d_model, n_heads, hidden=2048):
    D = d_model
    ks = jax.random.split(key, 16)

    def w(k, shape, scale=0.05):
        return (scale * jax.random.normal(k, shape)).astype(jnp.float32)

    return dict(
        n_heads=n_heads,
        g1=jnp.ones((1, D), jnp.float32), b1=jnp.zeros((1, D), jnp.float32),
        g2=jnp.ones((1, D), jnp.float32), b2=jnp.zeros((1, D), jnp.float32),
        # All linear weights stored pre-transposed as (in, out): y = x @ W + b
        wq=w(ks[0], (D, D)), bq=w(ks[1], (1, D)),
        wk=w(ks[2], (D, D)), bk=w(ks[3], (1, D)),
        wv=w(ks[4], (D, D)), bv=w(ks[5], (1, D)),
        wiq=w(ks[6], (D, D)), biq=w(ks[7], (1, D)),
        wik=w(ks[8], (D, D)), bik=w(ks[9], (1, D)),
        wiv=w(ks[10], (D, D)), biv=w(ks[11], (1, D)),
        wo=w(ks[12], (D, D)), bo=w(ks[13], (1, D)),
        w1=w(ks[14], (D, hidden)), c1=jnp.zeros((1, hidden), jnp.float32),
        w2=w(ks[15], (hidden, D)), c2=jnp.zeros((1, D), jnp.float32),
    )


def reference_forward(h1, h2, params):
    """Plain-JAX mirror of the PyTorch forward (eval mode) for verification."""
    D = h1.shape[-1]
    H = params["n_heads"]
    hd = D // H

    def ln(x, g, b, eps=1e-5):
        mu = jnp.mean(x, axis=-1, keepdims=True)
        var = jnp.mean((x - mu) ** 2, axis=-1, keepdims=True)
        return (x - mu) / jnp.sqrt(var + eps) * g[0] + b[0]

    lh1 = ln(h1, params["g1"], params["b1"])
    lh2 = ln(h2, params["g1"], params["b1"])
    Q = lh1 @ params["wq"] + params["bq"][0]
    K = lh2 @ params["wk"] + params["bk"][0]
    V = lh2 @ params["wv"] + params["bv"][0]
    q = Q @ params["wiq"] + params["biq"][0]
    k = K @ params["wik"] + params["bik"][0]
    v = V @ params["wiv"] + params["biv"][0]
    L, N, _ = q.shape                      # L = B (torch seq axis), N = S
    qh = q.reshape(L, N, H, hd)
    kh = k.reshape(L, N, H, hd)
    vh = v.reshape(L, N, H, hd)
    scores = jnp.einsum('lnhd,mnhd->nhlm', qh, kh) / math.sqrt(hd)
    p = jax.nn.softmax(scores, axis=-1)
    ctx = jnp.einsum('nhlm,mnhd->lnhd', p, vh).reshape(L, N, D)
    attn_out = ctx @ params["wo"] + params["bo"][0]
    x = h1 + jax.nn.softmax(attn_out, axis=-1)
    lx = ln(x, params["g2"], params["b2"])
    ff = jnp.maximum(lx @ params["w1"] + params["c1"][0], 0.0) @ params["w2"] \
        + params["c2"][0]
    return x + ff


if __name__ == "__main__":
    B, S, D, H = 2, 16, 32, 4
    HIDDEN = 2048
    key = jax.random.PRNGKey(0)
    k1, k2, kp = jax.random.split(key, 3)
    h1 = jax.random.normal(k1, (B, S, D), jnp.float32)
    h2 = jax.random.normal(k2, (B, S, D), jnp.float32)
    attn_mask = jnp.zeros((B, S, S), jnp.float32)  # accepted, unused (see notes)
    params = init_params(kp, D, H, hidden=HIDDEN)

    ref = reference_forward(h1, h2, params)

    # f32 matmul path with an explicit 2-step S grid (exercises the pipeline).
    out_f32 = dual_input_transformer_encoder(h1, h2, attn_mask, params,
                                             matmul_dtype=jnp.float32, s_tile=8)
    out_f32 = jax.block_until_ready(out_f32)
    err32 = float(jnp.max(jnp.abs(out_f32 - ref)))
    assert jnp.allclose(out_f32, ref, atol=3e-3, rtol=3e-3), f"f32 max abs err {err32}"

    # bf16 matmul path (default), auto-chosen tile (chooser picks s_tile=8 -> grid 2).
    out_bf16 = dual_input_transformer_encoder(h1, h2, attn_mask, params,
                                              matmul_dtype=jnp.bfloat16)
    out_bf16 = jax.block_until_ready(out_bf16)
    err16 = float(jnp.max(jnp.abs(out_bf16 - ref)))
    assert jnp.allclose(out_bf16, ref, atol=5e-2, rtol=5e-2), f"bf16 max abs err {err16}"

    print("KERNEL_OK")
</pallas_src>

<mosaic_0001>
module attributes {stable_mosaic.version = 11 : i64} {
  func.func @dual_encoder_kernel(%arg0: i32, %arg1: memref<2x8x32xf32, #tpu.memory_space<vmem>>, %arg2: memref<2x8x32xf32, #tpu.memory_space<vmem>>, %arg3: memref<9x32xf32, #tpu.memory_space<vmem>>, %arg4: memref<1x2048xf32, #tpu.memory_space<vmem>>, %arg5: memref<32x32xf32, #tpu.memory_space<vmem>>, %arg6: memref<32x64xf32, #tpu.memory_space<vmem>>, %arg7: memref<32x32xf32, #tpu.memory_space<vmem>>, %arg8: memref<32x2048xf32, #tpu.memory_space<vmem>>, %arg9: memref<2048x32xf32, #tpu.memory_space<vmem>>, %arg10: memref<2x8x32xf32, #tpu.memory_space<vmem>>, %arg11: memref<16x32xf32, #tpu.memory_space<vmem>>) attributes {dimension_semantics = [#tpu.dimension_semantics<parallel>], iteration_bounds = array<i64: 2>, scalar_prefetch = 0 : i64, scratch_operands = 1 : i64, tpu.core_type = #tpu.core_type<tc>, window_params = [{transform_indices = @transform_0, window_bounds = array<i64: 2, 8, 32>}, {transform_indices = @transform_1, window_bounds = array<i64: 2, 8, 32>}, {pipeline_mode = #tpu.pipeline_mode<synchronous>, transform_indices = @transform_2, window_bounds = array<i64: 9, 32>}, {pipeline_mode = #tpu.pipeline_mode<synchronous>, transform_indices = @transform_3, window_bounds = array<i64: 1, 2048>}, {pipeline_mode = #tpu.pipeline_mode<synchronous>, transform_indices = @transform_4, window_bounds = array<i64: 32, 32>}, {pipeline_mode = #tpu.pipeline_mode<synchronous>, transform_indices = @transform_5, window_bounds = array<i64: 32, 64>}, {pipeline_mode = #tpu.pipeline_mode<synchronous>, transform_indices = @transform_6, window_bounds = array<i64: 32, 32>}, {pipeline_mode = #tpu.pipeline_mode<synchronous>, transform_indices = @transform_7, window_bounds = array<i64: 32, 2048>}, {pipeline_mode = #tpu.pipeline_mode<synchronous>, transform_indices = @transform_8, window_bounds = array<i64: 2048, 32>}, {transform_indices = @transform_9, window_bounds = array<i64: 2, 8, 32>}]} {
    %c0 = arith.constant 0 : index
    %c0_0 = arith.constant 0 : index
    %c0_1 = arith.constant 0 : index
    %0 = vector.load %arg1[%c0, %c0_0, %c0_1] : memref<2x8x32xf32, #tpu.memory_space<vmem>>, vector<2x8x32xf32>
    %1 = vector.shape_cast %0 : vector<2x8x32xf32> to vector<16x32xf32>
    %c0_2 = arith.constant 0 : index
    %c0_3 = arith.constant 0 : index
    %c0_4 = arith.constant 0 : index
    %2 = vector.load %arg2[%c0_2, %c0_3, %c0_4] : memref<2x8x32xf32, #tpu.memory_space<vmem>>, vector<2x8x32xf32>
    %3 = vector.shape_cast %2 : vector<2x8x32xf32> to vector<16x32xf32>
    %c0_5 = arith.constant 0 : index
    %c0_6 = arith.constant 0 : index
    %4 = vector.load %arg3[%c0_5, %c0_6] : memref<9x32xf32, #tpu.memory_space<vmem>>, vector<9x32xf32>
    %5 = vector.extract_strided_slice %4 {offsets = [0, 0], sizes = [1, 32], strides = [1, 1]} : vector<9x32xf32> to vector<1x32xf32>
    %6 = vector.extract_strided_slice %4 {offsets = [1, 0], sizes = [1, 32], strides = [1, 1]} : vector<9x32xf32> to vector<1x32xf32>
    %7 = vector.extract_strided_slice %4 {offsets = [2, 0], sizes = [1, 32], strides = [1, 1]} : vector<9x32xf32> to vector<1x32xf32>
    %8 = vector.extract_strided_slice %4 {offsets = [3, 0], sizes = [1, 32], strides = [1, 1]} : vector<9x32xf32> to vector<1x32xf32>
    %9 = vector.extract_strided_slice %4 {offsets = [4, 0], sizes = [1, 32], strides = [1, 1]} : vector<9x32xf32> to vector<1x32xf32>
    %10 = vector.extract_strided_slice %4 {offsets = [5, 0], sizes = [1, 32], strides = [1, 1]} : vector<9x32xf32> to vector<1x32xf32>
    %11 = vector.extract_strided_slice %4 {offsets = [6, 0], sizes = [1, 32], strides = [1, 1]} : vector<9x32xf32> to vector<1x32xf32>
    %12 = vector.extract_strided_slice %4 {offsets = [7, 0], sizes = [1, 32], strides = [1, 1]} : vector<9x32xf32> to vector<1x32xf32>
    %13 = vector.extract_strided_slice %4 {offsets = [8, 0], sizes = [1, 32], strides = [1, 1]} : vector<9x32xf32> to vector<1x32xf32>
    %cst = arith.constant dense<0.000000e+00> : vector<16xf32>
    %14 = vector.multi_reduction <add>, %1, %cst [1] : vector<16x32xf32> to vector<16xf32>
    %15 = vector.shape_cast %14 : vector<16xf32> to vector<16x1xf32>
    %cst_7 = arith.constant 3.200000e+01 : f32
    %16 = vector.broadcast %cst_7 : f32 to vector<16x1xf32>
    %17 = arith.divf %15, %16 : vector<16x1xf32>
    %18 = vector.broadcast %17 : vector<16x1xf32> to vector<16x32xf32>
    %19 = arith.subf %1, %18 : vector<16x32xf32>
    %20 = arith.mulf %19, %19 : vector<16x32xf32>
    %cst_8 = arith.constant dense<0.000000e+00> : vector<16xf32>
    %21 = vector.multi_reduction <add>, %20, %cst_8 [1] : vector<16x32xf32> to vector<16xf32>
    %22 = vector.shape_cast %21 : vector<16xf32> to vector<16x1xf32>
    %cst_9 = arith.constant 3.200000e+01 : f32
    %23 = vector.broadcast %cst_9 : f32 to vector<16x1xf32>
    %24 = arith.divf %22, %23 : vector<16x1xf32>
    %cst_10 = arith.constant 9.99999974E-6 : f32
    %25 = vector.broadcast %cst_10 : f32 to vector<16x1xf32>
    %26 = arith.addf %24, %25 : vector<16x1xf32>
    %27 = math.rsqrt %26 : vector<16x1xf32>
    %28 = vector.broadcast %27 : vector<16x1xf32> to vector<16x32xf32>
    %29 = arith.mulf %19, %28 : vector<16x32xf32>
    %30 = vector.broadcast %5 : vector<1x32xf32> to vector<16x32xf32>
    %31 = arith.mulf %29, %30 : vector<16x32xf32>
    %32 = vector.broadcast %6 : vector<1x32xf32> to vector<16x32xf32>
    %33 = arith.addf %31, %32 : vector<16x32xf32>
    %cst_11 = arith.constant dense<0.000000e+00> : vector<16xf32>
    %34 = vector.multi_reduction <add>, %3, %cst_11 [1] : vector<16x32xf32> to vector<16xf32>
    %35 = vector.shape_cast %34 : vector<16xf32> to vector<16x1xf32>
    %cst_12 = arith.constant 3.200000e+01 : f32
    %36 = vector.broadcast %cst_12 : f32 to vector<16x1xf32>
    %37 = arith.divf %35, %36 : vector<16x1xf32>
    %38 = vector.broadcast %37 : vector<16x1xf32> to vector<16x32xf32>
    %39 = arith.subf %3, %38 : vector<16x32xf32>
    %40 = arith.mulf %39, %39 : vector<16x32xf32>
    %cst_13 = arith.constant dense<0.000000e+00> : vector<16xf32>
    %41 = vector.multi_reduction <add>, %40, %cst_13 [1] : vector<16x32xf32> to vector<16xf32>
    %42 = vector.shape_cast %41 : vector<16xf32> to vector<16x1xf32>
    %cst_14 = arith.constant 3.200000e+01 : f32
    %43 = vector.broadcast %cst_14 : f32 to vector<16x1xf32>
    %44 = arith.divf %42, %43 : vector<16x1xf32>
    %cst_15 = arith.constant 9.99999974E-6 : f32
    %45 = vector.broadcast %cst_15 : f32 to vector<16x1xf32>
    %46 = arith.addf %44, %45 : vector<16x1xf32>
    %47 = math.rsqrt %46 : vector<16x1xf32>
    %48 = vector.broadcast %47 : vector<16x1xf32> to vector<16x32xf32>
    %49 = arith.mulf %39, %48 : vector<16x32xf32>
    %50 = vector.broadcast %5 : vector<1x32xf32> to vector<16x32xf32>
    %51 = arith.mulf %49, %50 : vector<16x32xf32>
    %52 = vector.broadcast %6 : vector<1x32xf32> to vector<16x32xf32>
    %53 = arith.addf %51, %52 : vector<16x32xf32>
    %c0_16 = arith.constant 0 : index
    %c0_17 = arith.constant 0 : index
    %54 = vector.load %arg5[%c0_16, %c0_17] : memref<32x32xf32, #tpu.memory_space<vmem>>, vector<32x32xf32>
    %cst_18 = arith.constant dense<0.000000e+00> : vector<16x32xf32>
    %55 = tpu.matmul %33, %54, %cst_18 {dimension_numbers = #tpu.dot_dimension_numbers<[1], [0], [0], [1], [0, 0, 1, 1], [], []>} : vector<16x32xf32>, vector<32x32xf32>, vector<16x32xf32> -> vector<16x32xf32>
    %56 = vector.broadcast %9 : vector<1x32xf32> to vector<16x32xf32>
    %57 = arith.addf %55, %56 : vector<16x32xf32>
    %c0_19 = arith.constant 0 : index
    %c0_20 = arith.constant 0 : index
    %58 = vector.load %arg6[%c0_19, %c0_20] : memref<32x64xf32, #tpu.memory_space<vmem>>, vector<32x64xf32>
    %cst_21 = arith.constant dense<0.000000e+00> : vector<16x64xf32>
    %59 = tpu.matmul %53, %58, %cst_21 {dimension_numbers = #tpu.dot_dimension_numbers<[1], [0], [0], [1], [0, 0, 1, 1], [], []>} : vector<16x32xf32>, vector<32x64xf32>, vector<16x64xf32> -> vector<16x64xf32>
    %60 = vector.extract_strided_slice %59 {offsets = [0, 0], sizes = [16, 32], strides = [1, 1]} : vector<16x64xf32> to vector<16x32xf32>
    %61 = vector.broadcast %10 : vector<1x32xf32> to vector<16x32xf32>
    %62 = arith.addf %60, %61 : vector<16x32xf32>
    %63 = vector.extract_strided_slice %59 {offsets = [0, 32], sizes = [16, 32], strides = [1, 1]} : vector<16x64xf32> to vector<16x32xf32>
    %64 = vector.broadcast %11 : vector<1x32xf32> to vector<16x32xf32>
    %65 = arith.addf %63, %64 : vector<16x32xf32>
    %66 = vector.shape_cast %57 : vector<16x32xf32> to vector<2x8x32xf32>
    %67 = vector.shape_cast %62 : vector<16x32xf32> to vector<2x8x32xf32>
    %68 = tpu.iota {dimensions = array<i32: 0>} : vector<32x4xi32>
    %69 = tpu.iota {dimensions = array<i32: 1>} : vector<32x4xi32>
    %c8_i32 = arith.constant 8 : i32
    %70 = vector.broadcast %c8_i32 : i32 to vector<32x4xi32>
    %71 = arith.muli %69, %70 : vector<32x4xi32>
    %72 = arith.cmpi sge, %68, %71 : vector<32x4xi32>
    %c1_i32 = arith.constant 1 : i32
    %73 = vector.broadcast %c1_i32 : i32 to vector<32x4xi32>
    %74 = arith.addi %69, %73 : vector<32x4xi32>
    %c8_i32_22 = arith.constant 8 : i32
    %75 = vector.broadcast %c8_i32_22 : i32 to vector<32x4xi32>
    %76 = arith.muli %74, %75 : vector<32x4xi32>
    %77 = arith.cmpi slt, %68, %76 : vector<32x4xi32>
    %78 = arith.andi %72, %77 : vector<32x4xi1>
    %79 = arith.extui %78 : vector<32x4xi1> to vector<32x4xi32>
    %80 = arith.sitofp %79 : vector<32x4xi32> to vector<32x4xf32>
    %81 = tpu.iota {dimensions = array<i32: 1>} : vector<4x32xi32>
    %82 = tpu.iota {dimensions = array<i32: 0>} : vector<4x32xi32>
    %c8_i32_23 = arith.constant 8 : i32
    %83 = vector.broadcast %c8_i32_23 : i32 to vector<4x32xi32>
    %84 = arith.muli %82, %83 : vector<4x32xi32>
    %85 = arith.cmpi sge, %81, %84 : vector<4x32xi32>
    %c1_i32_24 = arith.constant 1 : i32
    %86 = vector.broadcast %c1_i32_24 : i32 to vector<4x32xi32>
    %87 = arith.addi %82, %86 : vector<4x32xi32>
    %c8_i32_25 = arith.constant 8 : i32
    %88 = vector.broadcast %c8_i32_25 : i32 to vector<4x32xi32>
    %89 = arith.muli %87, %88 : vector<4x32xi32>
    %90 = arith.cmpi slt, %81, %89 : vector<4x32xi32>
    %91 = arith.andi %85, %90 : vector<4x32xi1>
    %92 = arith.extui %91 : vector<4x32xi1> to vector<4x32xi32>
    %93 = arith.sitofp %92 : vector<4x32xi32> to vector<4x32xf32>
    %94 = vector.extract_strided_slice %66 {offsets = [0, 0, 0], sizes = [1, 8, 32], strides = [1, 1, 1]} : vector<2x8x32xf32> to vector<1x8x32xf32>
    %95 = vector.shape_cast %94 : vector<1x8x32xf32> to vector<8x32xf32>
    %96 = vector.shape_cast %95 : vector<8x32xf32> to vector<1x8x32xf32>
    %97 = vector.broadcast %96 : vector<1x8x32xf32> to vector<2x8x32xf32>
    %98 = arith.mulf %97, %67 : vector<2x8x32xf32>
    %99 = vector.shape_cast %98 : vector<2x8x32xf32> to vector<16x32xf32>
    %cst_26 = arith.constant dense<0.000000e+00> : vector<16x4xf32>
    %100 = tpu.matmul %99, %80, %cst_26 {dimension_numbers = #tpu.dot_dimension_numbers<[1], [0], [0], [1], [0, 0, 1, 1], [], []>} : vector<16x32xf32>, vector<32x4xf32>, vector<16x4xf32> -> vector<16x4xf32>
    %cst_27 = arith.constant 0.353553385 : f32
    %101 = vector.broadcast %cst_27 : f32 to vector<16x4xf32>
    %102 = arith.mulf %100, %101 : vector<16x4xf32>
    %103 = vector.shape_cast %102 : vector<16x4xf32> to vector<2x8x4xf32>
    %cst_28 = arith.constant dense<0xFF800000> : vector<8x4xf32>
    %104 = vector.multi_reduction <maximumf>, %103, %cst_28 [0] : vector<2x8x4xf32> to vector<8x4xf32>
    %105 = vector.shape_cast %104 : vector<8x4xf32> to vector<1x8x4xf32>
    %106 = vector.broadcast %105 : vector<1x8x4xf32> to vector<2x8x4xf32>
    %107 = arith.subf %103, %106 : vector<2x8x4xf32>
    %108 = math.exp %107 : vector<2x8x4xf32>
    %cst_29 = arith.constant dense<0.000000e+00> : vector<8x4xf32>
    %109 = vector.multi_reduction <add>, %108, %cst_29 [0] : vector<2x8x4xf32> to vector<8x4xf32>
    %110 = tpu.reciprocal %109 {approx = true} : vector<8x4xf32> -> vector<8x4xf32>
    %111 = vector.shape_cast %110 : vector<8x4xf32> to vector<1x8x4xf32>
    %112 = vector.broadcast %111 : vector<1x8x4xf32> to vector<2x8x4xf32>
    %113 = arith.mulf %108, %112 : vector<2x8x4xf32>
    %114 = vector.shape_cast %113 : vector<2x8x4xf32> to vector<16x4xf32>
    %cst_30 = arith.constant dense<0.000000e+00> : vector<16x32xf32>
    %115 = tpu.matmul %114, %93, %cst_30 {dimension_numbers = #tpu.dot_dimension_numbers<[1], [0], [0], [1], [0, 0, 1, 1], [], []>} : vector<16x4xf32>, vector<4x32xf32>, vector<16x32xf32> -> vector<16x32xf32>
    %116 = arith.mulf %115, %65 : vector<16x32xf32>
    %117 = vector.shape_cast %116 : vector<16x32xf32> to vector<2x8x32xf32>
    %cst_31 = arith.constant dense<0.000000e+00> : vector<8x32xf32>
    %118 = vector.multi_reduction <add>, %117, %cst_31 [0] : vector<2x8x32xf32> to vector<8x32xf32>
    %c0_32 = arith.constant 0 : index
    %c0_33 = arith.constant 0 : index
    %119 = vector.load %arg11[%c0_32, %c0_33] : memref<16x32xf32, #tpu.memory_space<vmem>>, vector<8x32xf32>
    tpu.vector_store %arg11[%c0_32, %c0_33], %118 {strides = array<i32>} : memref<16x32xf32, #tpu.memory_space<vmem>>, vector<8x32xf32>,
    %120 = vector.extract_strided_slice %66 {offsets = [1, 0, 0], sizes = [1, 8, 32], strides = [1, 1, 1]} : vector<2x8x32xf32> to vector<1x8x32xf32>
    %121 = vector.shape_cast %120 : vector<1x8x32xf32> to vector<8x32xf32>
    %122 = vector.shape_cast %121 : vector<8x32xf32> to vector<1x8x32xf32>
    %123 = vector.broadcast %122 : vector<1x8x32xf32> to vector<2x8x32xf32>
    %124 = arith.mulf %123, %67 : vector<2x8x32xf32>
    %125 = vector.shape_cast %124 : vector<2x8x32xf32> to vector<16x32xf32>
    %cst_34 = arith.constant dense<0.000000e+00> : vector<16x4xf32>
    %126 = tpu.matmul %125, %80, %cst_34 {dimension_numbers = #tpu.dot_dimension_numbers<[1], [0], [0], [1], [0, 0, 1, 1], [], []>} : vector<16x32xf32>, vector<32x4xf32>, vector<16x4xf32> -> vector<16x4xf32>
    %cst_35 = arith.constant 0.353553385 : f32
    %127 = vector.broadcast %cst_35 : f32 to vector<16x4xf32>
    %128 = arith.mulf %126, %127 : vector<16x4xf32>
    %129 = vector.shape_cast %128 : vector<16x4xf32> to vector<2x8x4xf32>
    %cst_36 = arith.constant dense<0xFF800000> : vector<8x4xf32>
    %130 = vector.multi_reduction <maximumf>, %129, %cst_36 [0] : vector<2x8x4xf32> to vector<8x4xf32>
    %131 = vector.shape_cast %130 : vector<8x4xf32> to vector<1x8x4xf32>
    %132 = vector.broadcast %131 : vector<1x8x4xf32> to vector<2x8x4xf32>
    %133 = arith.subf %129, %132 : vector<2x8x4xf32>
    %134 = math.exp %133 : vector<2x8x4xf32>
    %cst_37 = arith.constant dense<0.000000e+00> : vector<8x4xf32>
    %135 = vector.multi_reduction <add>, %134, %cst_37 [0] : vector<2x8x4xf32> to vector<8x4xf32>
    %136 = tpu.reciprocal %135 {approx = true} : vector<8x4xf32> -> vector<8x4xf32>
    %137 = vector.shape_cast %136 : vector<8x4xf32> to vector<1x8x4xf32>
    %138 = vector.broadcast %137 : vector<1x8x4xf32> to vector<2x8x4xf32>
    %139 = arith.mulf %134, %138 : vector<2x8x4xf32>
    %140 = vector.shape_cast %139 : vector<2x8x4xf32> to vector<16x4xf32>
    %cst_38 = arith.constant dense<0.000000e+00> : vector<16x32xf32>
    %141 = tpu.matmul %140, %93, %cst_38 {dimension_numbers = #tpu.dot_dimension_numbers<[1], [0], [0], [1], [0, 0, 1, 1], [], []>} : vector<16x4xf32>, vector<4x32xf32>, vector<16x32xf32> -> vector<16x32xf32>
    %142 = arith.mulf %141, %65 : vector<16x32xf32>
    %143 = vector.shape_cast %142 : vector<16x32xf32> to vector<2x8x32xf32>
    %cst_39 = arith.constant dense<0.000000e+00> : vector<8x32xf32>
    %144 = vector.multi_reduction <add>, %143, %cst_39 [0] : vector<2x8x32xf32> to vector<8x32xf32>
    %c8 = arith.constant 8 : index
    %c0_40 = arith.constant 0 : index
    %145 = vector.load %arg11[%c8, %c0_40] : memref<16x32xf32, #tpu.memory_space<vmem>>, vector<8x32xf32>
    tpu.vector_store %arg11[%c8, %c0_40], %144 {strides = array<i32>} : memref<16x32xf32, #tpu.memory_space<vmem>>, vector<8x32xf32>,
    %c0_41 = arith.constant 0 : index
    %c0_42 = arith.constant 0 : index
    %146 = vector.load %arg11[%c0_41, %c0_42] : memref<16x32xf32, #tpu.memory_space<vmem>>, vector<16x32xf32>
    %c0_43 = arith.constant 0 : index
    %c0_44 = arith.constant 0 : index
    %147 = vector.load %arg7[%c0_43, %c0_44] : memref<32x32xf32, #tpu.memory_space<vmem>>, vector<32x32xf32>
    %cst_45 = arith.constant dense<0.000000e+00> : vector<16x32xf32>
    %148 = tpu.matmul %146, %147, %cst_45 {dimension_numbers = #tpu.dot_dimension_numbers<[1], [0], [0], [1], [0, 0, 1, 1], [], []>} : vector<16x32xf32>, vector<32x32xf32>, vector<16x32xf32> -> vector<16x32xf32>
    %149 = vector.broadcast %12 : vector<1x32xf32> to vector<16x32xf32>
    %150 = arith.addf %148, %149 : vector<16x32xf32>
    %cst_46 = arith.constant dense<0xFF800000> : vector<16xf32>
    %151 = vector.multi_reduction <maximumf>, %150, %cst_46 [1] : vector<16x32xf32> to vector<16xf32>
    %152 = vector.shape_cast %151 : vector<16xf32> to vector<16x1xf32>
    %153 = vector.broadcast %152 : vector<16x1xf32> to vector<16x32xf32>
    %154 = arith.subf %150, %153 : vector<16x32xf32>
    %155 = math.exp %154 : vector<16x32xf32>
    %cst_47 = arith.constant dense<0.000000e+00> : vector<16xf32>
    %156 = vector.multi_reduction <add>, %155, %cst_47 [1] : vector<16x32xf32> to vector<16xf32>
    %157 = vector.shape_cast %156 : vector<16xf32> to vector<16x1xf32>
    %158 = tpu.reciprocal %157 {approx = true} : vector<16x1xf32> -> vector<16x1xf32>
    %159 = vector.broadcast %158 : vector<16x1xf32> to vector<16x32xf32>
    %160 = arith.mulf %155, %159 : vector<16x32xf32>
    %161 = arith.addf %1, %160 : vector<16x32xf32>
    %cst_48 = arith.constant dense<0.000000e+00> : vector<16xf32>
    %162 = vector.multi_reduction <add>, %161, %cst_48 [1] : vector<16x32xf32> to vector<16xf32>
    %163 = vector.shape_cast %162 : vector<16xf32> to vector<16x1xf32>
    %cst_49 = arith.constant 3.200000e+01 : f32
    %164 = vector.broadcast %cst_49 : f32 to vector<16x1xf32>
    %165 = arith.divf %163, %164 : vector<16x1xf32>
    %166 = vector.broadcast %165 : vector<16x1xf32> to vector<16x32xf32>
    %167 = arith.subf %161, %166 : vector<16x32xf32>
    %168 = arith.mulf %167, %167 : vector<16x32xf32>
    %cst_50 = arith.constant dense<0.000000e+00> : vector<16xf32>
    %169 = vector.multi_reduction <add>, %168, %cst_50 [1] : vector<16x32xf32> to vector<16xf32>
    %170 = vector.shape_cast %169 : vector<16xf32> to vector<16x1xf32>
    %cst_51 = arith.constant 3.200000e+01 : f32
    %171 = vector.broadcast %cst_51 : f32 to vector<16x1xf32>
    %172 = arith.divf %170, %171 : vector<16x1xf32>
    %cst_52 = arith.constant 9.99999974E-6 : f32
    %173 = vector.broadcast %cst_52 : f32 to vector<16x1xf32>
    %174 = arith.addf %172, %173 : vector<16x1xf32>
    %175 = math.rsqrt %174 : vector<16x1xf32>
    %176 = vector.broadcast %175 : vector<16x1xf32> to vector<16x32xf32>
    %177 = arith.mulf %167, %176 : vector<16x32xf32>
    %178 = vector.broadcast %7 : vector<1x32xf32> to vector<16x32xf32>
    %179 = arith.mulf %177, %178 : vector<16x32xf32>
    %180 = vector.broadcast %8 : vector<1x32xf32> to vector<16x32xf32>
    %181 = arith.addf %179, %180 : vector<16x32xf32>
    %cst_53 = arith.constant 0.000000e+00 : f32
    %182 = vector.broadcast %cst_53 : f32 to vector<16x32xf32>
    %c0_54 = arith.constant 0 : index
    %c0_55 = arith.constant 0 : index
    %183 = vector.load %arg8[%c0_54, %c0_55] : memref<32x2048xf32, #tpu.memory_space<vmem>>, vector<32x512xf32>
    %c0_56 = arith.constant 0 : index
    %c0_57 = arith.constant 0 : index
    %184 = vector.load %arg4[%c0_56, %c0_57] : memref<1x2048xf32, #tpu.memory_space<vmem>>, vector<1x512xf32>
    %cst_58 = arith.constant dense<0.000000e+00> : vector<16x512xf32>
    %185 = tpu.matmul %181, %183, %cst_58 {dimension_numbers = #tpu.dot_dimension_numbers<[1], [0], [0], [1], [0, 0, 1, 1], [], []>} : vector<16x32xf32>, vector<32x512xf32>, vector<16x512xf32> -> vector<16x512xf32>
    %186 = vector.broadcast %184 : vector<1x512xf32> to vector<16x512xf32>
    %187 = arith.addf %185, %186 : vector<16x512xf32>
    %cst_59 = arith.constant 0.000000e+00 : f32
    %188 = vector.broadcast %cst_59 : f32 to vector<16x512xf32>
    %189 = arith.maximumf %187, %188 : vector<16x512xf32>
    %c0_60 = arith.constant 0 : index
    %c0_61 = arith.constant 0 : index
    %190 = vector.load %arg9[%c0_60, %c0_61] : memref<2048x32xf32, #tpu.memory_space<vmem>>, vector<512x32xf32>
    %cst_62 = arith.constant dense<0.000000e+00> : vector<16x32xf32>
    %191 = tpu.matmul %189, %190, %cst_62 {dimension_numbers = #tpu.dot_dimension_numbers<[1], [0], [0], [1], [0, 0, 1, 1], [], []>} : vector<16x512xf32>, vector<512x32xf32>, vector<16x32xf32> -> vector<16x32xf32>
    %192 = arith.addf %182, %191 : vector<16x32xf32>
    %c0_63 = arith.constant 0 : index
    %c512 = arith.constant 512 : index
    %193 = vector.load %arg8[%c0_63, %c512] : memref<32x2048xf32, #tpu.memory_space<vmem>>, vector<32x512xf32>
    %c0_64 = arith.constant 0 : index
    %c512_65 = arith.constant 512 : index
    %194 = vector.load %arg4[%c0_64, %c512_65] : memref<1x2048xf32, #tpu.memory_space<vmem>>, vector<1x512xf32>
    %cst_66 = arith.constant dense<0.000000e+00> : vector<16x512xf32>
    %195 = tpu.matmul %181, %193, %cst_66 {dimension_numbers = #tpu.dot_dimension_numbers<[1], [0], [0], [1], [0, 0, 1, 1], [], []>} : vector<16x32xf32>, vector<32x512xf32>, vector<16x512xf32> -> vector<16x512xf32>
    %196 = vector.broadcast %194 : vector<1x512xf32> to vector<16x512xf32>
    %197 = arith.addf %195, %196 : vector<16x512xf32>
    %cst_67 = arith.constant 0.000000e+00 : f32
    %198 = vector.broadcast %cst_67 : f32 to vector<16x512xf32>
    %199 = arith.maximumf %197, %198 : vector<16x512xf32>
    %c512_68 = arith.constant 512 : index
    %c0_69 = arith.constant 0 : index
    %200 = vector.load %arg9[%c512_68, %c0_69] : memref<2048x32xf32, #tpu.memory_space<vmem>>, vector<512x32xf32>
    %cst_70 = arith.constant dense<0.000000e+00> : vector<16x32xf32>
    %201 = tpu.matmul %199, %200, %cst_70 {dimension_numbers = #tpu.dot_dimension_numbers<[1], [0], [0], [1], [0, 0, 1, 1], [], []>} : vector<16x512xf32>, vector<512x32xf32>, vector<16x32xf32> -> vector<16x32xf32>
    %202 = arith.addf %192, %201 : vector<16x32xf32>
    %c0_71 = arith.constant 0 : index
    %c1024 = arith.constant 1024 : index
    %203 = vector.load %arg8[%c0_71, %c1024] : memref<32x2048xf32, #tpu.memory_space<vmem>>, vector<32x512xf32>
    %c0_72 = arith.constant 0 : index
    %c1024_73 = arith.constant 1024 : index
    %204 = vector.load %arg4[%c0_72, %c1024_73] : memref<1x2048xf32, #tpu.memory_space<vmem>>, vector<1x512xf32>
    %cst_74 = arith.constant dense<0.000000e+00> : vector<16x512xf32>
    %205 = tpu.matmul %181, %203, %cst_74 {dimension_numbers = #tpu.dot_dimension_numbers<[1], [0], [0], [1], [0, 0, 1, 1], [], []>} : vector<16x32xf32>, vector<32x512xf32>, vector<16x512xf32> -> vector<16x512xf32>
    %206 = vector.broadcast %204 : vector<1x512xf32> to vector<16x512xf32>
    %207 = arith.addf %205, %206 : vector<16x512xf32>
    %cst_75 = arith.constant 0.000000e+00 : f32
    %208 = vector.broadcast %cst_75 : f32 to vector<16x512xf32>
    %209 = arith.maximumf %207, %208 : vector<16x512xf32>
    %c1024_76 = arith.constant 1024 : index
    %c0_77 = arith.constant 0 : index
    %210 = vector.load %arg9[%c1024_76, %c0_77] : memref<2048x32xf32, #tpu.memory_space<vmem>>, vector<512x32xf32>
    %cst_78 = arith.constant dense<0.000000e+00> : vector<16x32xf32>
    %211 = tpu.matmul %209, %210, %cst_78 {dimension_numbers = #tpu.dot_dimension_numbers<[1], [0], [0], [1], [0, 0, 1, 1], [], []>} : vector<16x512xf32>, vector<512x32xf32>, vector<16x32xf32> -> vector<16x32xf32>
    %212 = arith.addf %202, %211 : vector<16x32xf32>
    %c0_79 = arith.constant 0 : index
    %c1536 = arith.constant 1536 : index
    %213 = vector.load %arg8[%c0_79, %c1536] : memref<32x2048xf32, #tpu.memory_space<vmem>>, vector<32x512xf32>
    %c0_80 = arith.constant 0 : index
    %c1536_81 = arith.constant 1536 : index
    %214 = vector.load %arg4[%c0_80, %c1536_81] : memref<1x2048xf32, #tpu.memory_space<vmem>>, vector<1x512xf32>
    %cst_82 = arith.constant dense<0.000000e+00> : vector<16x512xf32>
    %215 = tpu.matmul %181, %213, %cst_82 {dimension_numbers = #tpu.dot_dimension_numbers<[1], [0], [0], [1], [0, 0, 1, 1], [], []>} : vector<16x32xf32>, vector<32x512xf32>, vector<16x512xf32> -> vector<16x512xf32>
    %216 = vector.broadcast %214 : vector<1x512xf32> to vector<16x512xf32>
    %217 = arith.addf %215, %216 : vector<16x512xf32>
    %cst_83 = arith.constant 0.000000e+00 : f32
    %218 = vector.broadcast %cst_83 : f32 to vector<16x512xf32>
    %219 = arith.maximumf %217, %218 : vector<16x512xf32>
    %c1536_84 = arith.constant 1536 : index
    %c0_85 = arith.constant 0 : index
    %220 = vector.load %arg9[%c1536_84, %c0_85] : memref<2048x32xf32, #tpu.memory_space<vmem>>, vector<512x32xf32>
    %cst_86 = arith.constant dense<0.000000e+00> : vector<16x32xf32>
    %221 = tpu.matmul %219, %220, %cst_86 {dimension_numbers = #tpu.dot_dimension_numbers<[1], [0], [0], [1], [0, 0, 1, 1], [], []>} : vector<16x512xf32>, vector<512x32xf32>, vector<16x32xf32> -> vector<16x32xf32>
    %222 = arith.addf %212, %221 : vector<16x32xf32>
    %223 = vector.broadcast %13 : vector<1x32xf32> to vector<16x32xf32>
    %224 = arith.addf %222, %223 : vector<16x32xf32>
    %225 = arith.addf %161, %224 : vector<16x32xf32>
    %226 = vector.shape_cast %225 : vector<16x32xf32> to vector<2x8x32xf32>
    %c0_87 = arith.constant 0 : index
    %c0_88 = arith.constant 0 : index
    %c0_89 = arith.constant 0 : index
    %227 = vector.load %arg10[%c0_87, %c0_88, %c0_89] : memref<2x8x32xf32, #tpu.memory_space<vmem>>, vector<2x8x32xf32>
    tpu.vector_store %arg10[%c0_87, %c0_88, %c0_89], %226 {strides = array<i32>} : memref<2x8x32xf32, #tpu.memory_space<vmem>>, vector<2x8x32xf32>,
    return
  }
  func.func @transform_0(%arg0: i32) -> (i32, i32, i32) {
    %c0_i32 = arith.constant 0 : i32
    %c0_i32_0 = arith.constant 0 : i32
    %c0_i32_1 = arith.constant 0 : i32
    return %c0_i32, %arg0, %c0_i32_0 : i32, i32, i32
  }
  func.func @transform_1(%arg0: i32) -> (i32, i32, i32) {
    %c0_i32 = arith.constant 0 : i32
    %c0_i32_0 = arith.constant 0 : i32
    %c0_i32_1 = arith.constant 0 : i32
    return %c0_i32, %arg0, %c0_i32_0 : i32, i32, i32
  }
  func.func @transform_2(%arg0: i32) -> (i32, i32) {
    %c0_i32 = arith.constant 0 : i32
    %c0_i32_0 = arith.constant 0 : i32
    %c0_i32_1 = arith.constant 0 : i32
    return %c0_i32, %c0_i32_0 : i32, i32
  }
  func.func @transform_3(%arg0: i32) -> (i32, i32) {
    %c0_i32 = arith.constant 0 : i32
    %c0_i32_0 = arith.constant 0 : i32
    %c0_i32_1 = arith.constant 0 : i32
    return %c0_i32, %c0_i32_0 : i32, i32
  }
  func.func @transform_4(%arg0: i32) -> (i32, i32) {
    %c0_i32 = arith.constant 0 : i32
    %c0_i32_0 = arith.constant 0 : i32
    %c0_i32_1 = arith.constant 0 : i32
    return %c0_i32, %c0_i32_0 : i32, i32
  }
  func.func @transform_5(%arg0: i32) -> (i32, i32) {
    %c0_i32 = arith.constant 0 : i32
    %c0_i32_0 = arith.constant 0 : i32
    %c0_i32_1 = arith.constant 0 : i32
    return %c0_i32, %c0_i32_0 : i32, i32
  }
  func.func @transform_6(%arg0: i32) -> (i32, i32) {
    %c0_i32 = arith.constant 0 : i32
    %c0_i32_0 = arith.constant 0 : i32
    %c0_i32_1 = arith.constant 0 : i32
    return %c0_i32, %c0_i32_0 : i32, i32
  }
  func.func @transform_7(%arg0: i32) -> (i32, i32) {
    %c0_i32 = arith.constant 0 : i32
    %c0_i32_0 = arith.constant 0 : i32
    %c0_i32_1 = arith.constant 0 : i32
    return %c0_i32, %c0_i32_0 : i32, i32
  }
  func.func @transform_8(%arg0: i32) -> (i32, i32) {
    %c0_i32 = arith.constant 0 : i32
    %c0_i32_0 = arith.constant 0 : i32
    %c0_i32_1 = arith.constant 0 : i32
    return %c0_i32, %c0_i32_0 : i32, i32
  }
  func.func @transform_9(%arg0: i32) -> (i32, i32, i32) {
    %c0_i32 = arith.constant 0 : i32
    %c0_i32_0 = arith.constant 0 : i32
    %c0_i32_1 = arith.constant 0 : i32
    return %c0_i32, %arg0, %c0_i32_0 : i32, i32, i32
  }
}

module attributes {stable_mosaic.version = 11 : i64} {
  func.func @dual_encoder_kernel(%arg0: i32, %arg1: memref<2x8x32xf32, #tpu.memory_space<vmem>>, %arg2: memref<2x8x32xf32, #tpu.memory_space<vmem>>, %arg3: memref<9x32xf32, #tpu.memory_space<vmem>>, %arg4: memref<1x2048xf32, #tpu.memory_space<vmem>>, %arg5: memref<32x32xf32, #tpu.memory_space<vmem>>, %arg6: memref<32x64xf32, #tpu.memory_space<vmem>>, %arg7: memref<32x32xf32, #tpu.memory_space<vmem>>, %arg8: memref<32x2048xf32, #tpu.memory_space<vmem>>, %arg9: memref<2048x32xf32, #tpu.memory_space<vmem>>, %arg10: memref<2x8x32xf32, #tpu.memory_space<vmem>>, %arg11: memref<16x32xf32, #tpu.memory_space<vmem>>) attributes {dimension_semantics = [#tpu.dimension_semantics<parallel>], iteration_bounds = array<i64: 2>, scalar_prefetch = 0 : i64, scratch_operands = 1 : i64, tpu.core_type = #tpu.core_type<tc>, window_params = [{transform_indices = @transform_0, window_bounds = array<i64: 2, 8, 32>}, {transform_indices = @transform_1, window_bounds = array<i64: 2, 8, 32>}, {pipeline_mode = #tpu.pipeline_mode<synchronous>, transform_indices = @transform_2, window_bounds = array<i64: 9, 32>}, {pipeline_mode = #tpu.pipeline_mode<synchronous>, transform_indices = @transform_3, window_bounds = array<i64: 1, 2048>}, {pipeline_mode = #tpu.pipeline_mode<synchronous>, transform_indices = @transform_4, window_bounds = array<i64: 32, 32>}, {pipeline_mode = #tpu.pipeline_mode<synchronous>, transform_indices = @transform_5, window_bounds = array<i64: 32, 64>}, {pipeline_mode = #tpu.pipeline_mode<synchronous>, transform_indices = @transform_6, window_bounds = array<i64: 32, 32>}, {pipeline_mode = #tpu.pipeline_mode<synchronous>, transform_indices = @transform_7, window_bounds = array<i64: 32, 2048>}, {pipeline_mode = #tpu.pipeline_mode<synchronous>, transform_indices = @transform_8, window_bounds = array<i64: 2048, 32>}, {transform_indices = @transform_9, window_bounds = array<i64: 2, 8, 32>}]} {
    %c0 = arith.constant 0 : index
    %c0_0 = arith.constant 0 : index
    %c0_1 = arith.constant 0 : index
    %0 = vector.load %arg1[%c0, %c0_0, %c0_1] : memref<2x8x32xf32, #tpu.memory_space<vmem>>, vector<2x8x32xf32>
    %1 = vector.shape_cast %0 : vector<2x8x32xf32> to vector<16x32xf32>
    %c0_2 = arith.constant 0 : index
    %c0_3 = arith.constant 0 : index
    %c0_4 = arith.constant 0 : index
    %2 = vector.load %arg2[%c0_2, %c0_3, %c0_4] : memref<2x8x32xf32, #tpu.memory_space<vmem>>, vector<2x8x32xf32>
    %3 = vector.shape_cast %2 : vector<2x8x32xf32> to vector<16x32xf32>
    %c0_5 = arith.constant 0 : index
    %c0_6 = arith.constant 0 : index
    %4 = vector.load %arg3[%c0_5, %c0_6] : memref<9x32xf32, #tpu.memory_space<vmem>>, vector<9x32xf32>
    %5 = vector.extract_strided_slice %4 {offsets = [0, 0], sizes = [1, 32], strides = [1, 1]} : vector<9x32xf32> to vector<1x32xf32>
    %6 = vector.extract_strided_slice %4 {offsets = [1, 0], sizes = [1, 32], strides = [1, 1]} : vector<9x32xf32> to vector<1x32xf32>
    %7 = vector.extract_strided_slice %4 {offsets = [2, 0], sizes = [1, 32], strides = [1, 1]} : vector<9x32xf32> to vector<1x32xf32>
    %8 = vector.extract_strided_slice %4 {offsets = [3, 0], sizes = [1, 32], strides = [1, 1]} : vector<9x32xf32> to vector<1x32xf32>
    %9 = vector.extract_strided_slice %4 {offsets = [4, 0], sizes = [1, 32], strides = [1, 1]} : vector<9x32xf32> to vector<1x32xf32>
    %10 = vector.extract_strided_slice %4 {offsets = [5, 0], sizes = [1, 32], strides = [1, 1]} : vector<9x32xf32> to vector<1x32xf32>
    %11 = vector.extract_strided_slice %4 {offsets = [6, 0], sizes = [1, 32], strides = [1, 1]} : vector<9x32xf32> to vector<1x32xf32>
    %12 = vector.extract_strided_slice %4 {offsets = [7, 0], sizes = [1, 32], strides = [1, 1]} : vector<9x32xf32> to vector<1x32xf32>
    %13 = vector.extract_strided_slice %4 {offsets = [8, 0], sizes = [1, 32], strides = [1, 1]} : vector<9x32xf32> to vector<1x32xf32>
    %cst = arith.constant dense<0.000000e+00> : vector<16xf32>
    %14 = vector.multi_reduction <add>, %1, %cst [1] : vector<16x32xf32> to vector<16xf32>
    %15 = vector.shape_cast %14 : vector<16xf32> to vector<16x1xf32>
    %cst_7 = arith.constant 3.200000e+01 : f32
    %16 = vector.broadcast %cst_7 : f32 to vector<16x1xf32>
    %17 = arith.divf %15, %16 : vector<16x1xf32>
    %18 = vector.broadcast %17 : vector<16x1xf32> to vector<16x32xf32>
    %19 = arith.subf %1, %18 : vector<16x32xf32>
    %20 = arith.mulf %19, %19 : vector<16x32xf32>
    %cst_8 = arith.constant dense<0.000000e+00> : vector<16xf32>
    %21 = vector.multi_reduction <add>, %20, %cst_8 [1] : vector<16x32xf32> to vector<16xf32>
    %22 = vector.shape_cast %21 : vector<16xf32> to vector<16x1xf32>
    %cst_9 = arith.constant 3.200000e+01 : f32
    %23 = vector.broadcast %cst_9 : f32 to vector<16x1xf32>
    %24 = arith.divf %22, %23 : vector<16x1xf32>
    %cst_10 = arith.constant 9.99999974E-6 : f32
    %25 = vector.broadcast %cst_10 : f32 to vector<16x1xf32>
    %26 = arith.addf %24, %25 : vector<16x1xf32>
    %27 = math.rsqrt %26 : vector<16x1xf32>
    %28 = vector.broadcast %27 : vector<16x1xf32> to vector<16x32xf32>
    %29 = arith.mulf %19, %28 : vector<16x32xf32>
    %30 = vector.broadcast %5 : vector<1x32xf32> to vector<16x32xf32>
    %31 = arith.mulf %29, %30 : vector<16x32xf32>
    %32 = vector.broadcast %6 : vector<1x32xf32> to vector<16x32xf32>
    %33 = arith.addf %31, %32 : vector<16x32xf32>
    %cst_11 = arith.constant dense<0.000000e+00> : vector<16xf32>
    %34 = vector.multi_reduction <add>, %3, %cst_11 [1] : vector<16x32xf32> to vector<16xf32>
    %35 = vector.shape_cast %34 : vector<16xf32> to vector<16x1xf32>
    %cst_12 = arith.constant 3.200000e+01 : f32
    %36 = vector.broadcast %cst_12 : f32 to vector<16x1xf32>
    %37 = arith.divf %35, %36 : vector<16x1xf32>
    %38 = vector.broadcast %37 : vector<16x1xf32> to vector<16x32xf32>
    %39 = arith.subf %3, %38 : vector<16x32xf32>
    %40 = arith.mulf %39, %39 : vector<16x32xf32>
    %cst_13 = arith.constant dense<0.000000e+00> : vector<16xf32>
    %41 = vector.multi_reduction <add>, %40, %cst_13 [1] : vector<16x32xf32> to vector<16xf32>
    %42 = vector.shape_cast %41 : vector<16xf32> to vector<16x1xf32>
    %cst_14 = arith.constant 3.200000e+01 : f32
    %43 = vector.broadcast %cst_14 : f32 to vector<16x1xf32>
    %44 = arith.divf %42, %43 : vector<16x1xf32>
    %cst_15 = arith.constant 9.99999974E-6 : f32
    %45 = vector.broadcast %cst_15 : f32 to vector<16x1xf32>
    %46 = arith.addf %44, %45 : vector<16x1xf32>
    %47 = math.rsqrt %46 : vector<16x1xf32>
    %48 = vector.broadcast %47 : vector<16x1xf32> to vector<16x32xf32>
    %49 = arith.mulf %39, %48 : vector<16x32xf32>
    %50 = vector.broadcast %5 : vector<1x32xf32> to vector<16x32xf32>
    %51 = arith.mulf %49, %50 : vector<16x32xf32>
    %52 = vector.broadcast %6 : vector<1x32xf32> to vector<16x32xf32>
    %53 = arith.addf %51, %52 : vector<16x32xf32>
    %c0_16 = arith.constant 0 : index
    %c0_17 = arith.constant 0 : index
    %54 = vector.load %arg5[%c0_16, %c0_17] : memref<32x32xf32, #tpu.memory_space<vmem>>, vector<32x32xf32>
    %cst_18 = arith.constant dense<0.000000e+00> : vector<16x32xf32>
    %55 = tpu.matmul %33, %54, %cst_18 {dimension_numbers = #tpu.dot_dimension_numbers<[1], [0], [0], [1], [0, 0, 1, 1], [], []>} : vector<16x32xf32>, vector<32x32xf32>, vector<16x32xf32> -> vector<16x32xf32>
    %56 = vector.broadcast %9 : vector<1x32xf32> to vector<16x32xf32>
    %57 = arith.addf %55, %56 : vector<16x32xf32>
    %c0_19 = arith.constant 0 : index
    %c0_20 = arith.constant 0 : index
    %58 = vector.load %arg6[%c0_19, %c0_20] : memref<32x64xf32, #tpu.memory_space<vmem>>, vector<32x64xf32>
    %cst_21 = arith.constant dense<0.000000e+00> : vector<16x64xf32>
    %59 = tpu.matmul %53, %58, %cst_21 {dimension_numbers = #tpu.dot_dimension_numbers<[1], [0], [0], [1], [0, 0, 1, 1], [], []>} : vector<16x32xf32>, vector<32x64xf32>, vector<16x64xf32> -> vector<16x64xf32>
    %60 = vector.extract_strided_slice %59 {offsets = [0, 0], sizes = [16, 32], strides = [1, 1]} : vector<16x64xf32> to vector<16x32xf32>
    %61 = vector.broadcast %10 : vector<1x32xf32> to vector<16x32xf32>
    %62 = arith.addf %60, %61 : vector<16x32xf32>
    %63 = vector.extract_strided_slice %59 {offsets = [0, 32], sizes = [16, 32], strides = [1, 1]} : vector<16x64xf32> to vector<16x32xf32>
    %64 = vector.broadcast %11 : vector<1x32xf32> to vector<16x32xf32>
    %65 = arith.addf %63, %64 : vector<16x32xf32>
    %66 = vector.shape_cast %57 : vector<16x32xf32> to vector<2x8x32xf32>
    %67 = vector.shape_cast %62 : vector<16x32xf32> to vector<2x8x32xf32>
    %68 = tpu.iota {dimensions = array<i32: 0>} : vector<32x4xi32>
    %69 = tpu.iota {dimensions = array<i32: 1>} : vector<32x4xi32>
    %c8_i32 = arith.constant 8 : i32
    %70 = vector.broadcast %c8_i32 : i32 to vector<32x4xi32>
    %71 = arith.muli %69, %70 : vector<32x4xi32>
    %72 = arith.cmpi sge, %68, %71 : vector<32x4xi32>
    %c1_i32 = arith.constant 1 : i32
    %73 = vector.broadcast %c1_i32 : i32 to vector<32x4xi32>
    %74 = arith.addi %69, %73 : vector<32x4xi32>
    %c8_i32_22 = arith.constant 8 : i32
    %75 = vector.broadcast %c8_i32_22 : i32 to vector<32x4xi32>
    %76 = arith.muli %74, %75 : vector<32x4xi32>
    %77 = arith.cmpi slt, %68, %76 : vector<32x4xi32>
    %78 = arith.andi %72, %77 : vector<32x4xi1>
    %79 = arith.extui %78 : vector<32x4xi1> to vector<32x4xi32>
    %80 = arith.sitofp %79 : vector<32x4xi32> to vector<32x4xf32>
    %81 = tpu.iota {dimensions = array<i32: 1>} : vector<4x32xi32>
    %82 = tpu.iota {dimensions = array<i32: 0>} : vector<4x32xi32>
    %c8_i32_23 = arith.constant 8 : i32
    %83 = vector.broadcast %c8_i32_23 : i32 to vector<4x32xi32>
    %84 = arith.muli %82, %83 : vector<4x32xi32>
    %85 = arith.cmpi sge, %81, %84 : vector<4x32xi32>
    %c1_i32_24 = arith.constant 1 : i32
    %86 = vector.broadcast %c1_i32_24 : i32 to vector<4x32xi32>
    %87 = arith.addi %82, %86 : vector<4x32xi32>
    %c8_i32_25 = arith.constant 8 : i32
    %88 = vector.broadcast %c8_i32_25 : i32 to vector<4x32xi32>
    %89 = arith.muli %87, %88 : vector<4x32xi32>
    %90 = arith.cmpi slt, %81, %89 : vector<4x32xi32>
    %91 = arith.andi %85, %90 : vector<4x32xi1>
    %92 = arith.extui %91 : vector<4x32xi1> to vector<4x32xi32>
    %93 = arith.sitofp %92 : vector<4x32xi32> to vector<4x32xf32>
    %94 = vector.extract_strided_slice %66 {offsets = [0, 0, 0], sizes = [1, 8, 32], strides = [1, 1, 1]} : vector<2x8x32xf32> to vector<1x8x32xf32>
    %95 = vector.shape_cast %94 : vector<1x8x32xf32> to vector<8x32xf32>
    %96 = vector.shape_cast %95 : vector<8x32xf32> to vector<1x8x32xf32>
    %97 = vector.broadcast %96 : vector<1x8x32xf32> to vector<2x8x32xf32>
    %98 = arith.mulf %97, %67 : vector<2x8x32xf32>
    %99 = vector.shape_cast %98 : vector<2x8x32xf32> to vector<16x32xf32>
    %cst_26 = arith.constant dense<0.000000e+00> : vector<16x4xf32>
    %100 = tpu.matmul %99, %80, %cst_26 {dimension_numbers = #tpu.dot_dimension_numbers<[1], [0], [0], [1], [0, 0, 1, 1], [], []>} : vector<16x32xf32>, vector<32x4xf32>, vector<16x4xf32> -> vector<16x4xf32>
    %cst_27 = arith.constant 0.353553385 : f32
    %101 = vector.broadcast %cst_27 : f32 to vector<16x4xf32>
    %102 = arith.mulf %100, %101 : vector<16x4xf32>
    %103 = vector.shape_cast %102 : vector<16x4xf32> to vector<2x8x4xf32>
    %cst_28 = arith.constant dense<0xFF800000> : vector<8x4xf32>
    %104 = vector.multi_reduction <maximumf>, %103, %cst_28 [0] : vector<2x8x4xf32> to vector<8x4xf32>
    %105 = vector.shape_cast %104 : vector<8x4xf32> to vector<1x8x4xf32>
    %106 = vector.broadcast %105 : vector<1x8x4xf32> to vector<2x8x4xf32>
    %107 = arith.subf %103, %106 : vector<2x8x4xf32>
    %108 = math.exp %107 : vector<2x8x4xf32>
    %cst_29 = arith.constant dense<0.000000e+00> : vector<8x4xf32>
    %109 = vector.multi_reduction <add>, %108, %cst_29 [0] : vector<2x8x4xf32> to vector<8x4xf32>
    %110 = tpu.reciprocal %109 {approx = true} : vector<8x4xf32> -> vector<8x4xf32>
    %111 = vector.shape_cast %110 : vector<8x4xf32> to vector<1x8x4xf32>
    %112 = vector.broadcast %111 : vector<1x8x4xf32> to vector<2x8x4xf32>
    %113 = arith.mulf %108, %112 : vector<2x8x4xf32>
    %114 = vector.shape_cast %113 : vector<2x8x4xf32> to vector<16x4xf32>
    %cst_30 = arith.constant dense<0.000000e+00> : vector<16x32xf32>
    %115 = tpu.matmul %114, %93, %cst_30 {dimension_numbers = #tpu.dot_dimension_numbers<[1], [0], [0], [1], [0, 0, 1, 1], [], []>} : vector<16x4xf32>, vector<4x32xf32>, vector<16x32xf32> -> vector<16x32xf32>
    %116 = arith.mulf %115, %65 : vector<16x32xf32>
    %117 = vector.shape_cast %116 : vector<16x32xf32> to vector<2x8x32xf32>
    %cst_31 = arith.constant dense<0.000000e+00> : vector<8x32xf32>
    %118 = vector.multi_reduction <add>, %117, %cst_31 [0] : vector<2x8x32xf32> to vector<8x32xf32>
    %c0_32 = arith.constant 0 : index
    %c0_33 = arith.constant 0 : index
    %119 = vector.load %arg11[%c0_32, %c0_33] : memref<16x32xf32, #tpu.memory_space<vmem>>, vector<8x32xf32>
    tpu.vector_store %arg11[%c0_32, %c0_33], %118 {strides = array<i32>} : memref<16x32xf32, #tpu.memory_space<vmem>>, vector<8x32xf32>,
    %120 = vector.extract_strided_slice %66 {offsets = [1, 0, 0], sizes = [1, 8, 32], strides = [1, 1, 1]} : vector<2x8x32xf32> to vector<1x8x32xf32>
    %121 = vector.shape_cast %120 : vector<1x8x32xf32> to vector<8x32xf32>
    %122 = vector.shape_cast %121 : vector<8x32xf32> to vector<1x8x32xf32>
    %123 = vector.broadcast %122 : vector<1x8x32xf32> to vector<2x8x32xf32>
    %124 = arith.mulf %123, %67 : vector<2x8x32xf32>
    %125 = vector.shape_cast %124 : vector<2x8x32xf32> to vector<16x32xf32>
    %cst_34 = arith.constant dense<0.000000e+00> : vector<16x4xf32>
    %126 = tpu.matmul %125, %80, %cst_34 {dimension_numbers = #tpu.dot_dimension_numbers<[1], [0], [0], [1], [0, 0, 1, 1], [], []>} : vector<16x32xf32>, vector<32x4xf32>, vector<16x4xf32> -> vector<16x4xf32>
    %cst_35 = arith.constant 0.353553385 : f32
    %127 = vector.broadcast %cst_35 : f32 to vector<16x4xf32>
    %128 = arith.mulf %126, %127 : vector<16x4xf32>
    %129 = vector.shape_cast %128 : vector<16x4xf32> to vector<2x8x4xf32>
    %cst_36 = arith.constant dense<0xFF800000> : vector<8x4xf32>
    %130 = vector.multi_reduction <maximumf>, %129, %cst_36 [0] : vector<2x8x4xf32> to vector<8x4xf32>
    %131 = vector.shape_cast %130 : vector<8x4xf32> to vector<1x8x4xf32>
    %132 = vector.broadcast %131 : vector<1x8x4xf32> to vector<2x8x4xf32>
    %133 = arith.subf %129, %132 : vector<2x8x4xf32>
    %134 = math.exp %133 : vector<2x8x4xf32>
    %cst_37 = arith.constant dense<0.000000e+00> : vector<8x4xf32>
    %135 = vector.multi_reduction <add>, %134, %cst_37 [0] : vector<2x8x4xf32> to vector<8x4xf32>
    %136 = tpu.reciprocal %135 {approx = true} : vector<8x4xf32> -> vector<8x4xf32>
    %137 = vector.shape_cast %136 : vector<8x4xf32> to vector<1x8x4xf32>
    %138 = vector.broadcast %137 : vector<1x8x4xf32> to vector<2x8x4xf32>
    %139 = arith.mulf %134, %138 : vector<2x8x4xf32>
    %140 = vector.shape_cast %139 : vector<2x8x4xf32> to vector<16x4xf32>
    %cst_38 = arith.constant dense<0.000000e+00> : vector<16x32xf32>
    %141 = tpu.matmul %140, %93, %cst_38 {dimension_numbers = #tpu.dot_dimension_numbers<[1], [0], [0], [1], [0, 0, 1, 1], [], []>} : vector<16x4xf32>, vector<4x32xf32>, vector<16x32xf32> -> vector<16x32xf32>
    %142 = arith.mulf %141, %65 : vector<16x32xf32>
    %143 = vector.shape_cast %142 : vector<16x32xf32> to vector<2x8x32xf32>
    %cst_39 = arith.constant dense<0.000000e+00> : vector<8x32xf32>
    %144 = vector.multi_reduction <add>, %143, %cst_39 [0] : vector<2x8x32xf32> to vector<8x32xf32>
    %c8 = arith.constant 8 : index
    %c0_40 = arith.constant 0 : index
    %145 = vector.load %arg11[%c8, %c0_40] : memref<16x32xf32, #tpu.memory_space<vmem>>, vector<8x32xf32>
    tpu.vector_store %arg11[%c8, %c0_40], %144 {strides = array<i32>} : memref<16x32xf32, #tpu.memory_space<vmem>>, vector<8x32xf32>,
    %c0_41 = arith.constant 0 : index
    %c0_42 = arith.constant 0 : index
    %146 = vector.load %arg11[%c0_41, %c0_42] : memref<16x32xf32, #tpu.memory_space<vmem>>, vector<16x32xf32>
    %c0_43 = arith.constant 0 : index
    %c0_44 = arith.constant 0 : index
    %147 = vector.load %arg7[%c0_43, %c0_44] : memref<32x32xf32, #tpu.memory_space<vmem>>, vector<32x32xf32>
    %cst_45 = arith.constant dense<0.000000e+00> : vector<16x32xf32>
    %148 = tpu.matmul %146, %147, %cst_45 {dimension_numbers = #tpu.dot_dimension_numbers<[1], [0], [0], [1], [0, 0, 1, 1], [], []>} : vector<16x32xf32>, vector<32x32xf32>, vector<16x32xf32> -> vector<16x32xf32>
    %149 = vector.broadcast %12 : vector<1x32xf32> to vector<16x32xf32>
    %150 = arith.addf %148, %149 : vector<16x32xf32>
    %cst_46 = arith.constant dense<0xFF800000> : vector<16xf32>
    %151 = vector.multi_reduction <maximumf>, %150, %cst_46 [1] : vector<16x32xf32> to vector<16xf32>
    %152 = vector.shape_cast %151 : vector<16xf32> to vector<16x1xf32>
    %153 = vector.broadcast %152 : vector<16x1xf32> to vector<16x32xf32>
    %154 = arith.subf %150, %153 : vector<16x32xf32>
    %155 = math.exp %154 : vector<16x32xf32>
    %cst_47 = arith.constant dense<0.000000e+00> : vector<16xf32>
    %156 = vector.multi_reduction <add>, %155, %cst_47 [1] : vector<16x32xf32> to vector<16xf32>
    %157 = vector.shape_cast %156 : vector<16xf32> to vector<16x1xf32>
    %158 = tpu.reciprocal %157 {approx = true} : vector<16x1xf32> -> vector<16x1xf32>
    %159 = vector.broadcast %158 : vector<16x1xf32> to vector<16x32xf32>
    %160 = arith.mulf %155, %159 : vector<16x32xf32>
    %161 = arith.addf %1, %160 : vector<16x32xf32>
    %cst_48 = arith.constant dense<0.000000e+00> : vector<16xf32>
    %162 = vector.multi_reduction <add>, %161, %cst_48 [1] : vector<16x32xf32> to vector<16xf32>
    %163 = vector.shape_cast %162 : vector<16xf32> to vector<16x1xf32>
    %cst_49 = arith.constant 3.200000e+01 : f32
    %164 = vector.broadcast %cst_49 : f32 to vector<16x1xf32>
    %165 = arith.divf %163, %164 : vector<16x1xf32>
    %166 = vector.broadcast %165 : vector<16x1xf32> to vector<16x32xf32>
    %167 = arith.subf %161, %166 : vector<16x32xf32>
    %168 = arith.mulf %167, %167 : vector<16x32xf32>
    %cst_50 = arith.constant dense<0.000000e+00> : vector<16xf32>
    %169 = vector.multi_reduction <add>, %168, %cst_50 [1] : vector<16x32xf32> to vector<16xf32>
    %170 = vector.shape_cast %169 : vector<16xf32> to vector<16x1xf32>
    %cst_51 = arith.constant 3.200000e+01 : f32
    %171 = vector.broadcast %cst_51 : f32 to vector<16x1xf32>
    %172 = arith.divf %170, %171 : vector<16x1xf32>
    %cst_52 = arith.constant 9.99999974E-6 : f32
    %173 = vector.broadcast %cst_52 : f32 to vector<16x1xf32>
    %174 = arith.addf %172, %173 : vector<16x1xf32>
    %175 = math.rsqrt %174 : vector<16x1xf32>
    %176 = vector.broadcast %175 : vector<16x1xf32> to vector<16x32xf32>
    %177 = arith.mulf %167, %176 : vector<16x32xf32>
    %178 = vector.broadcast %7 : vector<1x32xf32> to vector<16x32xf32>
    %179 = arith.mulf %177, %178 : vector<16x32xf32>
    %180 = vector.broadcast %8 : vector<1x32xf32> to vector<16x32xf32>
    %181 = arith.addf %179, %180 : vector<16x32xf32>
    %cst_53 = arith.constant 0.000000e+00 : f32
    %182 = vector.broadcast %cst_53 : f32 to vector<16x32xf32>
    %c0_54 = arith.constant 0 : index
    %c0_55 = arith.constant 0 : index
    %183 = vector.load %arg8[%c0_54, %c0_55] : memref<32x2048xf32, #tpu.memory_space<vmem>>, vector<32x512xf32>
    %c0_56 = arith.constant 0 : index
    %c0_57 = arith.constant 0 : index
    %184 = vector.load %arg4[%c0_56, %c0_57] : memref<1x2048xf32, #tpu.memory_space<vmem>>, vector<1x512xf32>
    %cst_58 = arith.constant dense<0.000000e+00> : vector<16x512xf32>
    %185 = tpu.matmul %181, %183, %cst_58 {dimension_numbers = #tpu.dot_dimension_numbers<[1], [0], [0], [1], [0, 0, 1, 1], [], []>} : vector<16x32xf32>, vector<32x512xf32>, vector<16x512xf32> -> vector<16x512xf32>
    %186 = vector.broadcast %184 : vector<1x512xf32> to vector<16x512xf32>
    %187 = arith.addf %185, %186 : vector<16x512xf32>
    %cst_59 = arith.constant 0.000000e+00 : f32
    %188 = vector.broadcast %cst_59 : f32 to vector<16x512xf32>
    %189 = arith.maximumf %187, %188 : vector<16x512xf32>
    %c0_60 = arith.constant 0 : index
    %c0_61 = arith.constant 0 : index
    %190 = vector.load %arg9[%c0_60, %c0_61] : memref<2048x32xf32, #tpu.memory_space<vmem>>, vector<512x32xf32>
    %cst_62 = arith.constant dense<0.000000e+00> : vector<16x32xf32>
    %191 = tpu.matmul %189, %190, %cst_62 {dimension_numbers = #tpu.dot_dimension_numbers<[1], [0], [0], [1], [0, 0, 1, 1], [], []>} : vector<16x512xf32>, vector<512x32xf32>, vector<16x32xf32> -> vector<16x32xf32>
    %192 = arith.addf %182, %191 : vector<16x32xf32>
    %c0_63 = arith.constant 0 : index
    %c512 = arith.constant 512 : index
    %193 = vector.load %arg8[%c0_63, %c512] : memref<32x2048xf32, #tpu.memory_space<vmem>>, vector<32x512xf32>
    %c0_64 = arith.constant 0 : index
    %c512_65 = arith.constant 512 : index
    %194 = vector.load %arg4[%c0_64, %c512_65] : memref<1x2048xf32, #tpu.memory_space<vmem>>, vector<1x512xf32>
    %cst_66 = arith.constant dense<0.000000e+00> : vector<16x512xf32>
    %195 = tpu.matmul %181, %193, %cst_66 {dimension_numbers = #tpu.dot_dimension_numbers<[1], [0], [0], [1], [0, 0, 1, 1], [], []>} : vector<16x32xf32>, vector<32x512xf32>, vector<16x512xf32> -> vector<16x512xf32>
    %196 = vector.broadcast %194 : vector<1x512xf32> to vector<16x512xf32>
    %197 = arith.addf %195, %196 : vector<16x512xf32>
    %cst_67 = arith.constant 0.000000e+00 : f32
    %198 = vector.broadcast %cst_67 : f32 to vector<16x512xf32>
    %199 = arith.maximumf %197, %198 : vector<16x512xf32>
    %c512_68 = arith.constant 512 : index
    %c0_69 = arith.constant 0 : index
    %200 = vector.load %arg9[%c512_68, %c0_69] : memref<2048x32xf32, #tpu.memory_space<vmem>>, vector<512x32xf32>
    %cst_70 = arith.constant dense<0.000000e+00> : vector<16x32xf32>
    %201 = tpu.matmul %199, %200, %cst_70 {dimension_numbers = #tpu.dot_dimension_numbers<[1], [0], [0], [1], [0, 0, 1, 1], [], []>} : vector<16x512xf32>, vector<512x32xf32>, vector<16x32xf32> -> vector<16x32xf32>
    %202 = arith.addf %192, %201 : vector<16x32xf32>
    %c0_71 = arith.constant 0 : index
    %c1024 = arith.constant 1024 : index
    %203 = vector.load %arg8[%c0_71, %c1024] : memref<32x2048xf32, #tpu.memory_space<vmem>>, vector<32x512xf32>
    %c0_72 = arith.constant 0 : index
    %c1024_73 = arith.constant 1024 : index
    %204 = vector.load %arg4[%c0_72, %c1024_73] : memref<1x2048xf32, #tpu.memory_space<vmem>>, vector<1x512xf32>
    %cst_74 = arith.constant dense<0.000000e+00> : vector<16x512xf32>
    %205 = tpu.matmul %181, %203, %cst_74 {dimension_numbers = #tpu.dot_dimension_numbers<[1], [0], [0], [1], [0, 0, 1, 1], [], []>} : vector<16x32xf32>, vector<32x512xf32>, vector<16x512xf32> -> vector<16x512xf32>
    %206 = vector.broadcast %204 : vector<1x512xf32> to vector<16x512xf32>
    %207 = arith.addf %205, %206 : vector<16x512xf32>
    %cst_75 = arith.constant 0.000000e+00 : f32
    %208 = vector.broadcast %cst_75 : f32 to vector<16x512xf32>
    %209 = arith.maximumf %207, %208 : vector<16x512xf32>
    %c1024_76 = arith.constant 1024 : index
    %c0_77 = arith.constant 0 : index
    %210 = vector.load %arg9[%c1024_76, %c0_77] : memref<2048x32xf32, #tpu.memory_space<vmem>>, vector<512x32xf32>
    %cst_78 = arith.constant dense<0.000000e+00> : vector<16x32xf32>
    %211 = tpu.matmul %209, %210, %cst_78 {dimension_numbers = #tpu.dot_dimension_numbers<[1], [0], [0], [1], [0, 0, 1, 1], [], []>} : vector<16x512xf32>, vector<512x32xf32>, vector<16x32xf32> -> vector<16x32xf32>
    %212 = arith.addf %202, %211 : vector<16x32xf32>
    %c0_79 = arith.constant 0 : index
    %c1536 = arith.constant 1536 : index
    %213 = vector.load %arg8[%c0_79, %c1536] : memref<32x2048xf32, #tpu.memory_space<vmem>>, vector<32x512xf32>
    %c0_80 = arith.constant 0 : index
    %c1536_81 = arith.constant 1536 : index
    %214 = vector.load %arg4[%c0_80, %c1536_81] : memref<1x2048xf32, #tpu.memory_space<vmem>>, vector<1x512xf32>
    %cst_82 = arith.constant dense<0.000000e+00> : vector<16x512xf32>
    %215 = tpu.matmul %181, %213, %cst_82 {dimension_numbers = #tpu.dot_dimension_numbers<[1], [0], [0], [1], [0, 0, 1, 1], [], []>} : vector<16x32xf32>, vector<32x512xf32>, vector<16x512xf32> -> vector<16x512xf32>
    %216 = vector.broadcast %214 : vector<1x512xf32> to vector<16x512xf32>
    %217 = arith.addf %215, %216 : vector<16x512xf32>
    %cst_83 = arith.constant 0.000000e+00 : f32
    %218 = vector.broadcast %cst_83 : f32 to vector<16x512xf32>
    %219 = arith.maximumf %217, %218 : vector<16x512xf32>
    %c1536_84 = arith.constant 1536 : index
    %c0_85 = arith.constant 0 : index
    %220 = vector.load %arg9[%c1536_84, %c0_85] : memref<2048x32xf32, #tpu.memory_space<vmem>>, vector<512x32xf32>
    %cst_86 = arith.constant dense<0.000000e+00> : vector<16x32xf32>
    %221 = tpu.matmul %219, %220, %cst_86 {dimension_numbers = #tpu.dot_dimension_numbers<[1], [0], [0], [1], [0, 0, 1, 1], [], []>} : vector<16x512xf32>, vector<512x32xf32>, vector<16x32xf32> -> vector<16x32xf32>
    %222 = arith.addf %212, %221 : vector<16x32xf32>
    %223 = vector.broadcast %13 : vector<1x32xf32> to vector<16x32xf32>
    %224 = arith.addf %222, %223 : vector<16x32xf32>
    %225 = arith.addf %161, %224 : vector<16x32xf32>
    %226 = vector.shape_cast %225 : vector<16x32xf32> to vector<2x8x32xf32>
    %c0_87 = arith.constant 0 : index
    %c0_88 = arith.constant 0 : index
    %c0_89 = arith.constant 0 : index
    %227 = vector.load %arg10[%c0_87, %c0_88, %c0_89] : memref<2x8x32xf32, #tpu.memory_space<vmem>>, vector<2x8x32xf32>
    tpu.vector_store %arg10[%c0_87, %c0_88, %c0_89], %226 {strides = array<i32>} : memref<2x8x32xf32, #tpu.memory_space<vmem>>, vector<2x8x32xf32>,
    return
  }
  func.func @transform_0(%arg0: i32) -> (i32, i32, i32) {
    %c0_i32 = arith.constant 0 : i32
    %c0_i32_0 = arith.constant 0 : i32
    %c0_i32_1 = arith.constant 0 : i32
    return %c0_i32, %arg0, %c0_i32_0 : i32, i32, i32
  }
  func.func @transform_1(%arg0: i32) -> (i32, i32, i32) {
    %c0_i32 = arith.constant 0 : i32
    %c0_i32_0 = arith.constant 0 : i32
    %c0_i32_1 = arith.constant 0 : i32
    return %c0_i32, %arg0, %c0_i32_0 : i32, i32, i32
  }
  func.func @transform_2(%arg0: i32) -> (i32, i32) {
    %c0_i32 = arith.constant 0 : i32
    %c0_i32_0 = arith.constant 0 : i32
    %c0_i32_1 = arith.constant 0 : i32
    return %c0_i32, %c0_i32_0 : i32, i32
  }
  func.func @transform_3(%arg0: i32) -> (i32, i32) {
    %c0_i32 = arith.constant 0 : i32
    %c0_i32_0 = arith.constant 0 : i32
    %c0_i32_1 = arith.constant 0 : i32
    return %c0_i32, %c0_i32_0 : i32, i32
  }
  func.func @transform_4(%arg0: i32) -> (i32, i32) {
    %c0_i32 = arith.constant 0 : i32
    %c0_i32_0 = arith.constant 0 : i32
    %c0_i32_1 = arith.constant 0 : i32
    return %c0_i32, %c0_i32_0 : i32, i32
  }
  func.func @transform_5(%arg0: i32) -> (i32, i32) {
    %c0_i32 = arith.constant 0 : i32
    %c0_i32_0 = arith.constant 0 : i32
    %c0_i32_1 = arith.constant 0 : i32
    return %c0_i32, %c0_i32_0 : i32, i32
  }
  func.func @transform_6(%arg0: i32) -> (i32, i32) {
    %c0_i32 = arith.constant 0 : i32
    %c0_i32_0 = arith.constant 0 : i32
    %c0_i32_1 = arith.constant 0 : i32
    return %c0_i32, %c0_i32_0 : i32, i32
  }
  func.func @transform_7(%arg0: i32) -> (i32, i32) {
    %c0_i32 = arith.constant 0 : i32
    %c0_i32_0 = arith.constant 0 : i32
    %c0_i32_1 = arith.constant 0 : i32
    return %c0_i32, %c0_i32_0 : i32, i32
  }
  func.func @transform_8(%arg0: i32) -> (i32, i32) {
    %c0_i32 = arith.constant 0 : i32
    %c0_i32_0 = arith.constant 0 : i32
    %c0_i32_1 = arith.constant 0 : i32
    return %c0_i32, %c0_i32_0 : i32, i32
  }
  func.func @transform_9(%arg0: i32) -> (i32, i32, i32) {
    %c0_i32 = arith.constant 0 : i32
    %c0_i32_0 = arith.constant 0 : i32
    %c0_i32_1 = arith.constant 0 : i32
    return %c0_i32, %arg0, %c0_i32_0 : i32, i32, i32
  }
}

</mosaic_0001>

<bundles_post_ra>
// kernel: tpu_custom_call.1
= control target key start
LH: loop header
LB: loop body
LE: loop exit
PB: predicated region body
PF: predicated region fallthrough
CT: control target
= control target key end

     0   :  { %14 = vsyncpa [#allocation6], 0  ;;  %s5155_s0 = inlined_call_operand.vmem [shape: f32[2,16,32], index: 0, kind: input, shape index: {}]   ;;  %s5156_s1 = inlined_call_operand.vmem [shape: f32[2,16,32], index: 1, kind: input, shape index: {}]   ;;  %s5157_s2 = inlined_call_operand.vmem [shape: f32[9,32], index: 2, kind: input, shape index: {}]   ;;  %s5158_s3 = inlined_call_operand.vmem [shape: f32[1,2048], index: 3, kind: input, shape index: {}]   ;;  %s5159_s4 = inlined_call_operand.vmem [shape: f32[32,32], index: 4, kind: input, shape index: {}]   ;;  %s5160_s5 = inlined_call_operand.vmem [shape: f32[32,64], index: 5, kind: input, shape index: {}]   ;;  %s5161_s6 = inlined_call_operand.vmem [shape: f32[32,32], index: 6, kind: input, shape index: {}]   ;;  %s5162_s7 = inlined_call_operand.vmem [shape: f32[32,2048], index: 7, kind: input, shape index: {}]   ;;  %s5163_s8 = inlined_call_operand.vmem [shape: f32[2048,32], index: 8, kind: input, shape index: {}]   ;;  %s5164_s9 = inlined_call_operand.hbm [shape: f32[2,16,32], index: 9, kind: output, shape index: {}]  }
   0x1   :  { %16 = vsyncpa [#allocation6 + $0x1], 0  ;;  %s3712_s30 = smov 0   ;;  %s3714_s10 = smov 0  }
   0x2   :  { %s3716_s11 = smov 0   ;;  %s3718_s12 = smov 0  }
   0x3 LB: > { %s5165_s13 = sadd.s32 4294967295, %s3652_s12   ;;  %s3048_s14 = sadd.s32 4294967294, %s3652_s12   ;;  %s3652_s12 = sphi %s3718_s12, %s5181_s12   ;;  %s3648_s11 = sphi %s3716_s11, %s5180_s11   ;;  %s3644_s10 = sphi %s3714_s10, %s5179_s10   ;;  %s3640_s30 = sphi %s3712_s30, %s5178_s30  }
   0x4   : > { %s3735_s15 = sadd.s32 1, %s3652_s12   ;;  %s29_s16 = sadd.s32 1, %s3648_s11 }
   0x5   : > { %s26_s17 = ssub.s32 %s3652_s12, %s3735_s15  ;;  %p36_p0 = scmp.ne.s32.totalorder %s3648_s11, %s3644_s10 }
   0x6   : > { %p27_p1 = scmp.eq.s32.totalorder %s26_s17, 0  ;;  %p37_p2 = scmp.eq.s32.totalorder %s3652_s12, 0 }
   0x7   : > { %p239_p3 = scmp.eq.s32.totalorder %s5165_s13, 1  ;;  %p244_p4 = scmp.ne.s32.totalorder %s3644_s10, %s3640_s30 }
   0x8   : > { %s3748_s18 = scalar_select %p27_p1, %s3648_s11, %s29_s16  }
   0x9   : > { %p3750_p5 = por %p37_p2, %p36_p0  ;;  %p3754_p6 = por %p239_p3, %p36_p0 }
   0xa   : > { %p245_p7 = scmp.eq.s32.totalorder %s3048_s14, 1  ;;  %p3050_p9 = scmp.ge.s32.totalorder %s3652_s12, 2 }
   0xc   : > { %p3758_p8 = por %p245_p7, %p244_p4  ;;  %282 = sbr.rel (%p3050_p9) target bundleno = 27 (0x1b), region = 44 }
  0x11   : > { %285 = sbr.rel (!%p3750_p5) target bundleno = 22 (0x16), region = 48  ;;  %s287_s22 = sand.u32 (%p3750_p5), 1, %s3648_s11  }
  0x12   : > { %s3052_s23 = sshll.u32 (%p3750_p5), %s3652_s12, 3  ;;  %s3051_s24 = sshll.u32 (%p3750_p5), %s287_s22, 4 }
  0x13   : > { %s291_s27 = scalar_lea.vmem (%p3750_p5), %s5155_s0, %s3052_s23  ;;  %s289_s28 = scalar_lea.vmem (%p3750_p5), [#allocation3], %s3051_s24 }
  0x14   : > { %v322_v0 = vld [vmem:[%s291_s27] sm:$0xff] (%p3750_p5)  ;;  %v324_v1 = vld [vmem:[%s291_s27 + $0x10] sm:$0xff] (%p3750_p5) }
  0x15   : > { %323 = vst [vmem:[%s289_s28] sm:$0xff] (%p3750_p5), %v322_v0  ;;  %325 = vst [vmem:[%s289_s28 + $0x8] sm:$0xff] (%p3750_p5), %v324_v1 }
  0x16 PF: > { %331 = sbr.rel (!%p3750_p5) target bundleno = 27 (0x1b), region = 86  ;;  %s333_s29 = sand.u32 (%p3750_p5), 1, %s3648_s11  }
  0x17   : > { %s3054_s14 = sshll.u32 (%p3750_p5), %s3652_s12, 3  ;;  %s3053_s16 = sshll.u32 (%p3750_p5), %s333_s29, 4 }
  0x18   : > { %s337_s13 = scalar_lea.vmem (%p3750_p5), %s5156_s1, %s3054_s14  ;;  %s335_s23 = scalar_lea.vmem (%p3750_p5), [#allocation4], %s3053_s16 }
  0x19   : > { %v368_v2 = vld [vmem:[%s337_s13] sm:$0xff] (%p3750_p5)  ;;  %v370_v3 = vld [vmem:[%s337_s13 + $0x10] sm:$0xff] (%p3750_p5) }
  0x1a   : > { %369 = vst [vmem:[%s335_s23] sm:$0xff] (%p3750_p5), %v368_v2  ;;  %371 = vst [vmem:[%s335_s23 + $0x8] sm:$0xff] (%p3750_p5), %v370_v3 }
  0x1b PF: > { %p3055_p10 = scmp.ge.s32.totalorder %s3652_s12, 1  ;;  %p376_p11 = scmp.lt.s32.totalorder %s3652_s12, 3 }
  0x1d   : > { %p377_p12 = pnand %p3055_p10, %p376_p11 }
  0x1e   : > { %s383_s19 = sand.u32 (!%p377_p12), 1, %s3644_s10   ;;  %s3654_s22 = smov (!%p377_p12), 32  }
  0x1f   : > { %380 = sbr.rel (%p377_p12) target bundleno = 2959 (0xb8f), region = 124  ;;  %s3784_s24 = sshll.u32 (!%p377_p12), %s383_s19, 4 }
  0x20   : > { %s385_s13 = scalar_lea.vmem (!%p377_p12), [#allocation3], %s3784_s24  ;;  %s392_s25 = scalar_lea.vmem (!%p377_p12), [#allocation4], %s3784_s24 }
  0x21   : > { %s3656_s23 = smov (!%p377_p12), 96   ;;  %s3658_s14 = smov (!%p377_p12), [#allocation5]  }
  0x22   : > { %s3596_s16 = sshll.u32 (!%p377_p12), %s3658_s14, 4  ;;  %s3597_s16 = int_to_ptr.vmem [resolvable:$false] %s3596_s16 }
  0x23   : > { %s3598_s17 = scalar_lea.vmem (!%p377_p12), %s3597_s16, 512 }
  0x24   : > { %vm435_vm0 = vcmask 261120   ;;  %v3787_v4 = vld [vmem:[%s385_s13] sm:$0xff]  ;;  %v3789_v5 = vld [vmem:[%s385_s13 + $0x8] sm:$0xff]  ;;  %v463_v38 = vlaneseq  ;;  %vm840_vm15 = vcmask 1043456   ;;  %s5177_s13 = sadd.s32 4294967295, %s3652_s12  }
  0x25   : > { %v436_v6 = vsel %vm435_vm0, %v3787_v4, 0.0  ;;  %v439_v7 = vsel %vm435_vm0, %v3789_v5, 0.0  ;;  %v431_v8 = vld [vmem:[%s392_s25] sm:$0xff]  ;;  %v432_v9 = vld [vmem:[%s392_s25 + $0x8] sm:$0xff]  ;;  %s3106_s25 = sshll.u32 %s5177_s13, 7 }
  0x26   : > { %437 = vadd.xlane.f32.xlu0 %v436_v6  ;;  %440 = vadd.xlane.f32.xlu1 %v439_v7  ;;  %v475_v10 = vsel %vm435_vm0, %v431_v8, 0.0  ;;  %v478_v11 = vsel %vm435_vm0, %v432_v9, 0.0  ;;  %v508_v32 = vld [vmem:[%s5159_s4 + $0x18] sm:$0xff]  ;;  %v507_v33 = vld [vmem:[%s5159_s4 + $0x10] sm:$0xff]  ;;  %v506_v34 = vld [vmem:[%s5159_s4 + $0x8] sm:$0xff]  ;;  %v3844_v41 = vshrl.u32 %v463_v38, 7  ;;  %s5108_s28 = scalar_lea.hbm %s5164_s9, %s3106_s25 }
  0x27   : > { %3449 = vmatprep.subr.mxu0 %v508_v32  ;;  %v597_v35 = vld [vmem:[%s5160_s5 + $0x18] sm:$0xff]  ;;  %v505_v36 = vld [vmem:[%s5159_s4] sm:$0xff]  ;;  %v596_v37 = vld [vmem:[%s5160_s5 + $0x10] sm:$0xff] }
  0x28   : > { %3450 = vmatpush3.msra.mxu0 %v508_v32  ;;  %3460 = vmatprep.subr.mxu1 %v597_v35  ;;  %v595_v39 = vld [vmem:[%s5160_s5 + $0x8] sm:$0xff]  ;;  %v594_v40 = vld [vmem:[%s5160_s5] sm:$0xff]  ;;  %v687_v42 = vsub.s32 6, %v3844_v41  ;;  %v3854_v57 = vsub.s32 0, %v3844_v41  ;;  %v3857_v58 = vsub.s32 1, %v3844_v41 }
  0x29   : > { %3451 = vmatprep.subr.mxu0 %v507_v33  ;;  %3461 = vmatpush3.msra.mxu1 %v597_v35  ;;  %v3850_v43 = vld [vmem:[%s5157_s2] sm:$0xff] }
  0x2a   : > { %476 = vadd.xlane.f32.xlu0 %v475_v10  ;;  %479 = vadd.xlane.f32.xlu1 %v478_v11  ;;  %v688_v44 = vrot.slane %v3850_v43, %v687_v42  ;;  %v466_v59 = vrot.slane %v3850_v43, %v3854_v57  ;;  %v472_v62 = vrot.slane %v3850_v43, %v3857_v58 }
  0x2b   : > { %3452 = vmatpush3.msra.mxu0 %v507_v33  ;;  %3462 = vmatprep.subr.mxu1 %v596_v37 }
  0x2c   : > { %3453 = vmatprep.subr.mxu0 %v506_v34  ;;  %3463 = vmatpush3.msra.mxu1 %v596_v37 }
  0x2d   : > { %3454 = vmatpush3.msra.mxu0 %v506_v34  ;;  %3464 = vmatprep.subr.mxu1 %v595_v39 }
  0x2e   : > { %3455 = vmatprep.subr.mxu0 %v505_v36  ;;  %3465 = vmatpush3.msra.mxu1 %v595_v39 }
  0x2f   : > { %3456 = vmatpush3.msra.mxu0 %v505_v36  ;;  %3466 = vmatprep.subr.mxu1 %v594_v40 }
  0x30   : > { %3467 = vmatpush3.msra.mxu1 %v594_v40 }
  0xaf   : > { %v438_v12 = vpop.xlane.xlu0 %437  ;;  %v441_v13 = vpop.xlane.xlu1 %440 }
  0xb0   : > { %v443_v14 = vmul.f32 0.03125, %v438_v12  ;;  %v444_v15 = vmul.f32 0.03125, %v441_v13 }
  0xb2   : > { %v3799_v16 = vsub.f32 %v3787_v4, %v443_v14  ;;  %v3802_v17 = vsub.f32 %v3789_v5, %v444_v15  ;;  %v701_v15 = vand.u32 127, %v463_v38 }
  0xb3   : > { %v477_v18 = vpop.xlane.xlu0 %476  ;;  %v480_v19 = vpop.xlane.xlu1 %479 }
  0xb4   : > { %v481_v20 = vmul.f32 0.03125, %v477_v18  ;;  %v482_v21 = vmul.f32 0.03125, %v480_v19  ;;  %v447_v22 = vmul.f32 %v3799_v16, %v3799_v16  ;;  %v448_v23 = vmul.f32 %v3802_v17, %v3802_v17 }
  0xb5   : > { %v702_v18 = vmul.u32 8, %v701_v15 }
  0xb6   : > { %v3808_v24 = vsub.f32 %v431_v8, %v481_v20  ;;  %v3810_v25 = vsub.f32 %v432_v9, %v482_v21  ;;  %v449_v26 = vsel %vm435_vm0, %v447_v22, 0.0  ;;  %v452_v27 = vsel %vm435_vm0, %v448_v23, 0.0 }
  0xb7   : > { %450 = vadd.xlane.f32.xlu0 %v449_v26  ;;  %v698_v20 = vadd.s32 16, %v3844_v41  ;;  %v3655_v22 = vmov 1.0   ;;  %v697_v23 = vadd.s32 8, %v3844_v41  ;;  %vm703_vm10 = vcmp.ge.s32.totalorder %v3844_v41, %v702_v18 }
  0xb8   : > { %v485_v28 = vmul.f32 %v3808_v24, %v3808_v24  ;;  %v486_v29 = vmul.f32 %v3810_v25, %v3810_v25 }
  0xb9   : > { %vm705_vm4 = vcmp.ge.s32.totalorder %v698_v20, %v702_v18  ;;  %vm704_vm7 = vcmp.ge.s32.totalorder %v697_v23, %v702_v18 }
  0xba   : > { %v487_v30 = vsel %vm435_vm0, %v485_v28, 0.0  ;;  %v490_v31 = vsel %vm435_vm0, %v486_v29, 0.0  ;;  %v681_v28 = vsub.s32 5, %v3844_v41 }
  0xbb   : > { %453 = vadd.xlane.f32.xlu0 %v452_v27  ;;  %488 = vadd.xlane.f32.xlu1 %v487_v30  ;;  %v511_v27 = vsub.s32 4, %v3844_v41 }
  0xbd   : > { %v512_v29 = vrot.slane %v3850_v43, %v511_v27 }
  0xbf   : > { %491 = vadd.xlane.f32.xlu1 %v490_v31  ;;  %v682_v31 = vrot.slane %v3850_v43, %v681_v28 }
  0xd1   : > { %690 = vrot.lane.b32.xlu0 %v688_v44, %s3654_s22  ;;  %s428_s22 = scalar_lea.vmem [#allocation5], %s3784_s24  ;;  %s5114_s24 = scalar_lea.sflag [#allocation6], %s383_s19 }
 0x140   : > { %v451_v45 = vpop.xlane.xlu0 %450 }
 0x141   : > { %v455_v46 = vmul.f32 0.03125, %v451_v45 }
 0x143   : > { %v457_v47 = vadd.f32 1e-05, %v455_v46 }
 0x144   : > { %v489_v48 = vpop.xlane.xlu1 %488  ;;  %v454_v49 = vpop.xlane.xlu0 %453 }
 0x145   : > { %3560 = vrsqrt.f32 %v457_v47  ;;  %v493_v50 = vmul.f32 0.03125, %v489_v48  ;;  %v456_v51 = vmul.f32 0.03125, %v454_v49  ;;  %v725_v48 = vmul.u32 8, %v3844_v41 }
 0x146   : > { %v727_v49 = vadd.s32 1, %v3844_v41 }
 0x147   : > { %v495_v52 = vadd.f32 1e-05, %v493_v50  ;;  %v458_v53 = vadd.f32 1e-05, %v456_v51  ;;  %vm726_vm13 = vcmp.ge.s32.totalorder %v701_v15, %v725_v48  ;;  %v3657_v51 = vmov 0.0  }
 0x148   : > { %v492_v54 = vpop.xlane.xlu1 %491  ;;  %v691_v36 = vpop.permute.xlu0 %690  ;;  %v728_v50 = vmul.u32 8, %v727_v49 }
 0x149   : > { %3562 = vrsqrt.f32 %v495_v52  ;;  %v494_v55 = vmul.f32 0.03125, %v492_v54 }
 0x14a   : > { %3564 = vrsqrt.f32 %v458_v53  ;;  %vm729_vm14 = vcmp.lt.s32.totalorder %v701_v15, %v728_v50 }
 0x14b   : > { %v496_v56 = vadd.f32 1e-05, %v494_v55 }
 0x14d   : > { %3566 = vrsqrt.f32 %v496_v56 }
 0x152   : > { %v3561_v60 = vpop.eup %3560 }
 0x153   : > { %v461_v61 = vmul.f32 %v3561_v60, %v3799_v16  ;;  %v707_v16 = vadd.s32 1, %v701_v15 }
 0x155   : > { %v467_v63 = vmul.f32 %v466_v59, %v461_v61  ;;  %v708_v19 = vmul.u32 8, %v707_v16 }
 0x156   : > { %v3563_v0 = vpop.eup %3562 }
 0x157   : > { %v3565_v1 = vpop.eup %3564  ;;  %v473_v2 = vadd.f32 %v472_v62, %v467_v63  ;;  %v499_v3 = vmul.f32 %v3563_v0, %v3808_v24  ;;  %vm711_vm5 = vcmp.lt.s32.totalorder %v698_v20, %v708_v19  ;;  %vm710_vm8 = vcmp.lt.s32.totalorder %v697_v23, %v708_v19 }
 0x158   : > { %v462_v6 = vmul.f32 %v3565_v1, %v3802_v17  ;;  %v699_v17 = vadd.s32 24, %v3844_v41  ;;  %vm3884_vm6 = vmand %vm705_vm4, %vm711_vm5  ;;  %vm709_vm11 = vcmp.lt.s32.totalorder %v3844_v41, %v708_v19 }
 0x159   : > { %3457 = vmatprep.mubr.msk.f32.mxu0 %vm435_vm0, %v473_v2  ;;  %v501_v7 = vmul.f32 %v499_v3, %v466_v59  ;;  %vm3894_vm9 = vmand %vm704_vm7, %vm710_vm8 }
 0x15a   : > { %v3567_v8 = vpop.eup %3566  ;;  %v468_v9 = vmul.f32 %v466_v59, %v462_v6  ;;  %vm706_vm1 = vcmp.ge.s32.totalorder %v699_v17, %v702_v18  ;;  %vm712_vm2 = vcmp.lt.s32.totalorder %v699_v17, %v708_v19  ;;  %vm3906_vm12 = vmand %vm703_vm10, %vm709_vm11 }
 0x15b   : > { %v503_v10 = vadd.f32 %v501_v7, %v472_v62  ;;  %v500_v11 = vmul.f32 %v3567_v8, %v3810_v25  ;;  %vm3873_vm3 = vmand %vm706_vm1, %vm712_vm2  ;;  %vm818_vm2 = vcmask 31744  }
 0x15c   : > { %v474_v12 = vadd.f32 %v472_v62, %v468_v9  ;;  %3471 = vmatprep.subr.msk.mxu0 %vm3873_vm3, %v3655_v22  ;;  %vm730_vm1 = vmand %vm726_vm13, %vm729_vm14 }
 0x15d   : > { %3468 = vmatprep.mubr.msk.f32.mxu1 %vm435_vm0, %v503_v10  ;;  %v502_v13 = vmul.f32 %v500_v11, %v466_v59  ;;  %v3067_v52 = vsel %vm730_vm1, 1.0, %v3657_v51 }
 0x15e   : > { %3458 = vmatmul.mubr.msk.f32.vlgmr.msra.gmra.mxu0 %vm435_vm0, %v474_v12  ;;  %3482 = vmatprep.subr.msk.mxu1 %vm840_vm15, %v3067_v52 }
 0x15f   : > { %v504_v14 = vadd.f32 %v502_v13, %v472_v62  ;;  %3472 = vmatpush3.msk.msra.mxu0 %vm3873_vm3, %v3655_v22 }
 0x160   : > { %3473 = vmatprep.subr.msk.mxu0 %vm3884_vm6, %v3655_v22 }
 0x161   : > { %3469 = vmatmul.mubr.msk.f32.vlgmr.msra.gmra.mxu1 %vm435_vm0, %v504_v14  ;;  %3474 = vmatpush3.msk.msra.mxu0 %vm3884_vm6, %v3655_v22 }
 0x162   : > { %3475 = vmatprep.subr.msk.mxu0 %vm3894_vm9, %v3655_v22  ;;  %3483 = vmatpush3.msk.msra.mxu1 %vm840_vm15, %v3067_v52 }
 0x163   : > { %3476 = vmatpush3.msk.msra.mxu0 %vm3894_vm9, %v3655_v22  ;;  %3487 = vmatprep.subr.msk.mxu1 %vm3873_vm3, %v3655_v22 }
 0x164   : > { %3477 = vmatprep.subr.msk.mxu0 %vm3906_vm12, %v3655_v22 }
 0x165   : > { %3478 = vmatpush3.msk.msra.mxu0 %vm3906_vm12, %v3655_v22 }
 0x21e   : > { %v3459_v30 = vpop.f32.mrf.mxu0 }
 0x21f   : > { %v591_v32 = vadd.f32 %v3459_v30, %v512_v29 }
 0x220   : > { %v585_v33 = vpop.f32.mrf.mxu0 }
 0x221   : > { %v3470_v34 = vpop.f32.mrf.mxu1  ;;  %v586_v38 = vadd.f32 %v585_v33, %v512_v29 }
 0x222   : > { %v684_v35 = vadd.f32 %v3470_v34, %v682_v31  ;;  %v694_v47 = vadd.f32 %v3470_v34, %v691_v36 }
 0x223   : > { %v670_v37 = vpop.f32.mrf.mxu1 }
 0x224   : > { %v934_v39 = vmul.f32 %v684_v35, %v591_v32  ;;  %v683_v40 = vadd.f32 %v682_v31, %v670_v37  ;;  %v693_v42 = vadd.f32 %v691_v36, %v670_v37  ;;  %v734_v46 = vmul.f32 %v684_v35, %v586_v38 }
 0x226   : > { %v733_v44 = vmul.f32 %v683_v40, %v586_v38  ;;  %v933_v45 = vmul.f32 %v683_v40, %v591_v32  ;;  %921 = vrot.lane.b32.xlu1 %v693_v42, %s3656_s23  ;;  %v1125_v42 = vld [vmem:[%s5161_s6 + $0x18] sm:$0xff] }
 0x227   : > { %3503 = vmatprep.subr.mxu0 %v1125_v42 }
 0x228   : > { %3479 = vmatprep.mubr.msk.f32.mxu0 %vm435_vm0, %v733_v44  ;;  %v1124_v44 = vld [vmem:[%s5161_s6 + $0x10] sm:$0xff] }
 0x229   : > { %3480 = vmatmul.mubr.msk.f32.vlgmr.msra.gmra.mxu0 %vm435_vm0, %v734_v46  ;;  %v1122_v46 = vld [vmem:[%s5161_s6] sm:$0xff] }
 0x22a   : > { %923 = vrot.lane.b32.xlu1 %v694_v47, %s3656_s23  ;;  %3504 = vmatpush3.msra.mxu0 %v1125_v42  ;;  %v1280_v42 = vld [vmem:[%s5162_s7 + $0x98] sm:$0xff]  ;;  %s2962_s23 = sshll.u32 %s428_s22, 4  ;;  %s5102_s23 = int_to_ptr.vmem [resolvable:$true] %s2962_s23 }
 0x22b   : > { %3505 = vmatprep.subr.mxu0 %v1124_v44  ;;  %s3592_s29 = scalar_lea.vmem %s5102_s23, 256  ;;  %p3599_p2 = scmp.lt.s32.totalorder %s5102_s23, %s3597_s16 }
 0x22c   : > { %3506 = vmatpush3.msra.mxu0 %v1124_v44  ;;  %v1277_v44 = vld [vmem:[%s5162_s7 + $0x80] sm:$0xff]  ;;  %p3593_p13 = scmp.ne.s32.totalorder %s5102_s23, %s3592_s29  ;;  %p3600_p3 = scmp.lt.s32.totalorder %s3598_s17, %s3592_s29 }
 0x22e   : > { %p3594_p0 = pnand %p3593_p13, %p3754_p6  ;;  %p3601_p4 = por %p3600_p3, %p3599_p2 }
 0x230   : > { %p3595_p1 = pneg %p3594_p0 }
 0x232   : > { %p3602_p5 = pnand %p3601_p4, %p3595_p1 }
 0x298   : > { %v922_v12 = vpop.permute.xlu1 %921 }
 0x29c   : > { %v924_v13 = vpop.permute.xlu1 %923 }
 0x2e9   : > { %v3481_v53 = vpop.f32.mrf.mxu0 }
 0x2ea   : > { %v817_v54 = vmul.f32 0.35355338, %v3481_v53 }
 0x2eb   : > { %v807_v55 = vpop.f32.mrf.mxu0 }
 0x2ec   : > { %v816_v56 = vmul.f32 0.35355338, %v807_v55  ;;  %v820_v59 = vsel %vm818_vm2, %v817_v54, -inf }
 0x2ee   : > { %v819_v60 = vsel %vm818_vm2, %v816_v56, -inf }
 0x2ef   : > { %v821_v61 = vmax.f32 %v819_v60, %v820_v59 }
 0x2f1   : > { %v822_v62 = vsub.f32 %v816_v56, %v821_v61  ;;  %v823_v63 = vsub.f32 %v817_v54, %v821_v61  ;;  %v1128_v56 = vsub.s32 7, %v3844_v41 }
 0x2f3   : > { %v824_v0 = vmul.f32 1.442695, %v822_v62  ;;  %v826_v1 = vmul.f32 1.442695, %v823_v63  ;;  %v1129_v59 = vrot.slane %v3850_v43, %v1128_v56 }
 0x2f5   : > { %3568 = vpow2.f32 %v824_v0 }
 0x2f6   : > { %3570 = vpow2.f32 %v826_v1 }
 0x302   : > { %v3569_v2 = vpop.eup %3568 }
 0x303   : > { %v3571_v3 = vpop.eup %3570  ;;  %v828_v6 = vsel %vm818_vm2, %v3569_v2, 0.0 }
 0x304   : > { %v829_v7 = vsel %vm818_vm2, %v3571_v3, 0.0 }
 0x305   : > { %v830_v8 = vadd.f32 %v829_v7, %v828_v6 }
 0x307   : > { %3572 = vrcp.f32 %v830_v8 }
 0x314   : > { %v3573_v9 = vpop.eup %3572 }
 0x315   : > { %v832_v10 = vmul.f32 %v3573_v9, %v3569_v2  ;;  %v833_v11 = vmul.f32 %v3573_v9, %v3571_v3 }
 0x317   : > { %3484 = vmatprep.mubr.msk.f32.mxu1 %vm818_vm2, %v832_v10 }
 0x318   : > { %3485 = vmatmul.mubr.msk.f32.vlgmr.msra.gmra.mxu1 %vm818_vm2, %v833_v11 }
 0x319   : > { %3488 = vmatpush3.msk.msra.mxu1 %vm3873_vm3, %v3655_v22  ;;  %3495 = vmatprep.mubr.msk.f32.mxu1 %vm435_vm0, %v933_v45  ;;  %v1123_v45 = vld [vmem:[%s5161_s6 + $0x8] sm:$0xff] }
 0x31a   : > { %3489 = vmatprep.subr.msk.mxu1 %vm3884_vm6, %v3655_v22  ;;  %3507 = vmatprep.subr.mxu0 %v1123_v45 }
 0x31b   : > { %3490 = vmatpush3.msk.msra.mxu1 %vm3884_vm6, %v3655_v22  ;;  %3508 = vmatpush3.msra.mxu0 %v1123_v45  ;;  %v1279_v45 = vld [vmem:[%s5162_s7 + $0x90] sm:$0xff] }
 0x31c   : > { %3491 = vmatprep.subr.msk.mxu1 %vm3894_vm9, %v3655_v22  ;;  %3509 = vmatprep.subr.mxu0 %v1122_v46 }
 0x31d   : > { %3492 = vmatpush3.msk.msra.mxu1 %vm3894_vm9, %v3655_v22  ;;  %3510 = vmatpush3.msra.mxu0 %v1122_v46  ;;  %v1274_v46 = vld [vmem:[%s5162_s7 + $0x8] sm:$0xff] }
 0x31e   : > { %3493 = vmatprep.subr.msk.mxu1 %vm3906_vm12, %v3655_v22 }
 0x31f   : > { %3494 = vmatpush3.msk.msra.mxu1 %vm3906_vm12, %v3655_v22 }
 0x320   : > { %3496 = vmatmul.mubr.msk.f32.vlgmr.msra.gmra.mxu1 %vm435_vm0, %v934_v39  ;;  %3498 = vmatprep.subr.msk.mxu1 %vm840_vm15, %v3067_v52 }
 0x321   : > { %3499 = vmatpush3.msk.msra.mxu1 %vm840_vm15, %v3067_v52 }
 0x3d8   : > { %v3486_v14 = vpop.f32.mrf.mxu1 }
 0x3d9   : > { %v928_v15 = vmul.f32 %v3486_v14, %v924_v13 }
 0x3da   : > { %v910_v16 = vpop.f32.mrf.mxu1 }
 0x3db   : > { %v927_v17 = vmul.f32 %v922_v12, %v910_v16  ;;  %v930_v18 = vsel %vm435_vm0, %v928_v15, 0.0 }
 0x3dd   : > { %v929_v19 = vsel %vm435_vm0, %v927_v17, 0.0 }
 0x3de   : > { %v931_v20 = vadd.f32 %v930_v18, %v929_v19 }
 0x3e0   : > { %932 = vst.msk [vmem:[#allocation2] sm:$0xff] %vm435_vm0, %v931_v20  ;;  %v3497_v21 = vpop.f32.mrf.mxu1 }
 0x3e1   : > { %v1017_v22 = vmul.f32 0.35355338, %v3497_v21 }
 0x3e2   : > { %v1007_v23 = vpop.f32.mrf.mxu1 }
 0x3e3   : > { %v1016_v24 = vmul.f32 0.35355338, %v1007_v23  ;;  %v1019_v25 = vsel %vm818_vm2, %v1017_v22, -inf }
 0x3e5   : > { %v1018_v26 = vsel %vm818_vm2, %v1016_v24, -inf }
 0x3e6   : > { %v1020_v27 = vmax.f32 %v1018_v26, %v1019_v25 }
 0x3e7   : > { %v1120_v28 = vld [vmem:[#allocation2] sm:$0xff] }
 0x3e8   : > { %v1021_v29 = vsub.f32 %v1016_v24, %v1020_v27  ;;  %v1022_v30 = vsub.f32 %v1017_v22, %v1020_v27  ;;  %3511 = vmatprep.mubr.msk.f32.mxu0 %vm435_vm0, %v1120_v28 }
 0x3ea   : > { %v1023_v31 = vmul.f32 1.442695, %v1021_v29  ;;  %v1025_v32 = vmul.f32 1.442695, %v1022_v30 }
 0x3ec   : > { %3574 = vpow2.f32 %v1023_v31 }
 0x3ed   : > { %3576 = vpow2.f32 %v1025_v32  ;;  %v1286_v32 = vld [vmem:[%s5162_s7 + $0x188] sm:$0xff] }
 0x3ee   : > { %1341 = vmatprep.subr.mxu1 %v1286_v32  ;;  %v1804_v32 = vld [vmem:[%s5163_s8 + $0x3e8] sm:$0xff] }
 0x3f9   : > { %v3575_v33 = vpop.eup %3574 }
 0x3fa   : > { %v3577_v34 = vpop.eup %3576  ;;  %v1027_v35 = vsel %vm818_vm2, %v3575_v33, 0.0 }
 0x3fb   : > { %v1028_v36 = vsel %vm818_vm2, %v3577_v34, 0.0 }
 0x3fc   : > { %v1029_v37 = vadd.f32 %v1028_v36, %v1027_v35  ;;  %v1287_v35 = vld [vmem:[%s5162_s7 + $0x190] sm:$0xff]  ;;  %v1282_v36 = vld [vmem:[%s5162_s7 + $0x108] sm:$0xff] }
 0x3fe   : > { %3578 = vrcp.f32 %v1029_v37  ;;  %v1284_v37 = vld [vmem:[%s5162_s7 + $0x118] sm:$0xff] }
 0x40b   : > { %v3579_v38 = vpop.eup %3578 }
 0x40c   : > { %v1031_v39 = vmul.f32 %v3579_v38, %v3575_v33  ;;  %v1032_v40 = vmul.f32 %v3579_v38, %v3577_v34  ;;  %v1288_v33 = vld [vmem:[%s5162_s7 + $0x198] sm:$0xff]  ;;  %v1285_v34 = vld [vmem:[%s5162_s7 + $0x180] sm:$0xff] }
 0x40d   : > { %1418 = vmatprep.subr.mxu0 %v1288_v33  ;;  %v1281_v38 = vld [vmem:[%s5162_s7 + $0x100] sm:$0xff]  ;;  %v1756_v33 = vld [vmem:[%s5163_s8 + $0x268] sm:$0xff] }
 0x40e   : > { %3500 = vmatprep.mubr.msk.f32.mxu1 %vm818_vm2, %v1031_v39  ;;  %v1283_v39 = vld [vmem:[%s5162_s7 + $0x110] sm:$0xff] }
 0x40f   : > { %3501 = vmatmul.mubr.msk.f32.vlgmr.msra.gmra.mxu1 %vm818_vm2, %v1032_v40  ;;  %v1278_v40 = vld [vmem:[%s5162_s7 + $0x88] sm:$0xff] }
 0x410   : > { %1381 = vmatprep.mubr.f32.mxu1 %v3657_v51  ;;  %1342 = vmatpush1.msra.mxu1 %v1285_v34  ;;  %v1788_v34 = vld [vmem:[%s5163_s8 + $0x368] sm:$0xff] }
 0x411   : > { %1343 = vmatprep.subr.mxu1 %v1282_v36  ;;  %v1803_v36 = vld [vmem:[%s5163_s8 + $0x3e0] sm:$0xff] }
 0x412   : > { %1344 = vmatpush1.msra.mxu1 %v1281_v38  ;;  %v1787_v38 = vld [vmem:[%s5163_s8 + $0x360] sm:$0xff] }
 0x413   : > { %1345 = vmatprep.subr.mxu1 %v1278_v40  ;;  %v1802_v40 = vld [vmem:[%s5163_s8 + $0x3d8] sm:$0xff] }
 0x414   : > { %1346 = vmatpush1.msra.mxu1 %v1277_v44  ;;  %v1786_v44 = vld [vmem:[%s5163_s8 + $0x358] sm:$0xff] }
 0x415   : > { %1347 = vmatprep.subr.mxu1 %v1274_v46  ;;  %v1801_v46 = vld [vmem:[%s5163_s8 + $0x3d0] sm:$0xff] }
 0x4cf   : > { %v3502_v47 = vpop.f32.mrf.mxu1 }
 0x4d0   : > { %v1115_v48 = vmul.f32 %v3502_v47, %v924_v13  ;;  %v1276_v47 = vld [vmem:[%s5162_s7 + $0x18] sm:$0xff] }
 0x4d1   : > { %v1105_v49 = vpop.f32.mrf.mxu1 }
 0x4d2   : > { %v1114_v50 = vmul.f32 %v1105_v49, %v922_v12  ;;  %v1117_v52 = vsel %vm435_vm0, %v1115_v48, 0.0  ;;  %v1273_v48 = vld [vmem:[%s5162_s7] sm:$0xff]  ;;  %v1275_v49 = vld [vmem:[%s5162_s7 + $0x10] sm:$0xff] }
 0x4d3   : > { %1348 = vmatpush1.msra.mxu1 %v1273_v48  ;;  %v1785_v48 = vld [vmem:[%s5163_s8 + $0x350] sm:$0xff] }
 0x4d4   : > { %v1116_v53 = vsel %vm435_vm0, %v1114_v50, 0.0  ;;  %v1556_v50 = vld [vmem:[%s5162_s7 + $0x1a8] sm:$0xff] }
 0x4d5   : > { %v1118_v54 = vadd.f32 %v1117_v52, %v1116_v53  ;;  %v1558_v52 = vld [vmem:[%s5162_s7 + $0x1b8] sm:$0xff]  ;;  %1605 = vmatprep.subr.mxu1 %v1556_v50  ;;  %v1800_v50 = vld [vmem:[%s5163_s8 + $0x3c8] sm:$0xff] }
 0x4d7   : > { %1119 = vst.msk [vmem:[#allocation2 + $0x8] sm:$0xff] %vm435_vm0, %v1118_v54 }
 0x4de   : > { %v1121_v55 = vld [vmem:[#allocation2 + $0x8] sm:$0xff] }
 0x4df   : > { %3512 = vmatmul.mubr.msk.f32.vlgmr.msra.gmra.mxu0 %vm435_vm0, %v1121_v55 }
 0x4e0   : > { %1458 = vmatprep.mubr.f32.mxu0 %v3657_v51  ;;  %1419 = vmatpush1.msra.mxu0 %v1287_v35  ;;  %v1771_v35 = vld [vmem:[%s5163_s8 + $0x2e0] sm:$0xff] }
 0x4e1   : > { %1420 = vmatprep.subr.mxu0 %v1284_v37  ;;  %v1755_v37 = vld [vmem:[%s5163_s8 + $0x260] sm:$0xff] }
 0x4e2   : > { %1421 = vmatpush1.msra.mxu0 %v1283_v39  ;;  %v1770_v39 = vld [vmem:[%s5163_s8 + $0x2d8] sm:$0xff] }
 0x4e3   : > { %1422 = vmatprep.subr.mxu0 %v1280_v42  ;;  %v1754_v42 = vld [vmem:[%s5163_s8 + $0x258] sm:$0xff] }
 0x4e4   : > { %1423 = vmatpush1.msra.mxu0 %v1279_v45  ;;  %v1769_v45 = vld [vmem:[%s5163_s8 + $0x2d0] sm:$0xff] }
 0x4e5   : > { %1424 = vmatprep.subr.mxu0 %v1276_v47  ;;  %v1753_v47 = vld [vmem:[%s5163_s8 + $0x250] sm:$0xff] }
 0x4e6   : > { %1425 = vmatpush1.msra.mxu0 %v1275_v49  ;;  %v1768_v49 = vld [vmem:[%s5163_s8 + $0x2c8] sm:$0xff] }
 0x4e7   : > { %1682 = vmatprep.subr.mxu0 %v1558_v52  ;;  %v1752_v52 = vld [vmem:[%s5163_s8 + $0x248] sm:$0xff] }
 0x59f   : > { %v3513_v60 = vpop.f32.mrf.mxu0 }
 0x5a0   : > { %v1208_v61 = vadd.f32 %v3513_v60, %v1129_v59 }
 0x5a1   : > { %v1202_v62 = vpop.f32.mrf.mxu0 }
 0x5a2   : > { %v1203_v63 = vadd.f32 %v1202_v62, %v1129_v59  ;;  %v1214_v0 = vsel %vm435_vm0, %v1208_v61, -inf  ;;  %v4067_v62 = vsub.s32 3, %v3844_v41 }
 0x5a3   : > { %1215 = vmax.xlane.f32.xlu0 %v1214_v0 }
 0x5a4   : > { %v1211_v1 = vsel %vm435_vm0, %v1203_v63, -inf }
 0x5a5   : > { %1212 = vmax.xlane.f32.xlu1 %v1211_v1  ;;  %v1270_v1 = vrot.slane %v3850_v43, %v4067_v62 }
 0x62c   : > { %v1216_v2 = vpop.xlane.xlu0 %1215 }
 0x62d   : > { %v1218_v3 = vsub.f32 %v1208_v61, %v1216_v2  ;;  %v4064_v61 = vsub.s32 2, %v3844_v41  ;;  %v1557_v41 = vld [vmem:[%s5162_s7 + $0x1b0] sm:$0xff] }
 0x62e   : > { %v1213_v6 = vpop.xlane.xlu1 %1212 }
 0x62f   : > { %v1217_v7 = vsub.f32 %v1203_v63, %v1213_v6  ;;  %v1221_v8 = vmul.f32 1.442695, %v1218_v3  ;;  %v1264_v63 = vrot.slane %v3850_v43, %v4064_v61  ;;  %v1554_v43 = vld [vmem:[%s5162_s7 + $0x138] sm:$0xff] }
 0x631   : > { %v1219_v9 = vmul.f32 1.442695, %v1217_v7 }
 0x633   : > { %3580 = vpow2.f32 %v1219_v9  ;;  %v1555_v9 = vld [vmem:[%s5162_s7 + $0x1a0] sm:$0xff] }
 0x634   : > { %3582 = vpow2.f32 %v1221_v8 }
 0x640   : > { %v3581_v10 = vpop.eup %3580 }
 0x641   : > { %v1223_v11 = vsel %vm435_vm0, %v3581_v10, 0.0  ;;  %v3583_v12 = vpop.eup %3582 }
 0x642   : > { %1224 = vadd.xlane.f32.xlu0 %v1223_v11  ;;  %v1226_v13 = vsel %vm435_vm0, %v3583_v12, 0.0 }
 0x646   : > { %1227 = vadd.xlane.f32.xlu0 %v1226_v13  ;;  %v1553_v13 = vld [vmem:[%s5162_s7 + $0x130] sm:$0xff] }
 0x6cb   : > { %v1225_v14 = vpop.xlane.xlu0 %1224 }
 0x6cc   : > { %3584 = vrcp.f32 %v1225_v14 }
 0x6cf   : > { %v1228_v15 = vpop.xlane.xlu0 %1227 }
 0x6d0   : > { %3586 = vrcp.f32 %v1228_v15  ;;  %v1548_v15 = vld [vmem:[%s5162_s7 + $0xa8] sm:$0xff] }
 0x6d9   : > { %v3585_v16 = vpop.eup %3584 }
 0x6da   : > { %v1231_v17 = vmul.f32 %v3585_v16, %v3581_v10  ;;  %v1552_v10 = vld [vmem:[%s5162_s7 + $0x128] sm:$0xff]  ;;  %v1550_v16 = vld [vmem:[%s5162_s7 + $0xb8] sm:$0xff] }
 0x6dc   : > { %v3996_v18 = vadd.f32 %v1231_v17, %v3787_v4  ;;  %v1547_v17 = vld [vmem:[%s5162_s7 + $0xa0] sm:$0xff] }
 0x6dd   : > { %v3587_v19 = vpop.eup %3586 }
 0x6de   : > { %v1235_v20 = vsel %vm435_vm0, %v3996_v18, 0.0  ;;  %v1232_v21 = vmul.f32 %v3587_v19, %v3583_v12  ;;  %v1551_v12 = vld [vmem:[%s5162_s7 + $0x120] sm:$0xff]  ;;  %v1549_v19 = vld [vmem:[%s5162_s7 + $0xb0] sm:$0xff] }
 0x6df   : > { %1236 = vadd.xlane.f32.xlu1 %v1235_v20  ;;  %v1544_v20 = vld [vmem:[%s5162_s7 + $0x28] sm:$0xff] }
 0x6e0   : > { %v4001_v22 = vadd.f32 %v1232_v21, %v3789_v5  ;;  %v1546_v21 = vld [vmem:[%s5162_s7 + $0x38] sm:$0xff] }
 0x6e2   : > { %v1238_v23 = vsel %vm435_vm0, %v4001_v22, 0.0 }
 0x6e3   : > { %1239 = vadd.xlane.f32.xlu0 %v1238_v23  ;;  %v1543_v23 = vld [vmem:[%s5162_s7 + $0x20] sm:$0xff] }
 0x768   : > { %v1237_v24 = vpop.xlane.xlu1 %1236 }
 0x769   : > { %v1241_v25 = vmul.f32 0.03125, %v1237_v24  ;;  %v1545_v24 = vld [vmem:[%s5162_s7 + $0x30] sm:$0xff] }
 0x76b   : > { %v1243_v26 = vsub.f32 %v3996_v18, %v1241_v25  ;;  %v1774_v25 = vld [vmem:[%s5163_s8 + $0x2f8] sm:$0xff] }
 0x76c   : > { %v1240_v27 = vpop.xlane.xlu0 %1239 }
 0x76d   : > { %v1242_v4 = vmul.f32 0.03125, %v1240_v27  ;;  %v1245_v28 = vmul.f32 %v1243_v26, %v1243_v26  ;;  %v1758_v27 = vld [vmem:[%s5163_s8 + $0x278] sm:$0xff] }
 0x76f   : > { %v1244_v29 = vsub.f32 %v4001_v22, %v1242_v4  ;;  %v1247_v30 = vsel %vm435_vm0, %v1245_v28, 0.0  ;;  %v1790_v4 = vld [vmem:[%s5163_s8 + $0x378] sm:$0xff]  ;;  %v1773_v28 = vld [vmem:[%s5163_s8 + $0x2f0] sm:$0xff] }
 0x770   : > { %1248 = vadd.xlane.f32.xlu1 %v1247_v30  ;;  %v1757_v30 = vld [vmem:[%s5163_s8 + $0x270] sm:$0xff] }
 0x771   : > { %v1246_v31 = vmul.f32 %v1244_v29, %v1244_v29 }
 0x773   : > { %v1250_v5 = vsel %vm435_vm0, %v1246_v31, 0.0  ;;  %v1789_v31 = vld [vmem:[%s5163_s8 + $0x370] sm:$0xff] }
 0x774   : > { %1251 = vadd.xlane.f32.xlu0 %v1250_v5  ;;  %v1772_v5 = vld [vmem:[%s5163_s8 + $0x2e8] sm:$0xff] }
 0x7f9   : > { %v1249_v53 = vpop.xlane.xlu1 %1248 }
 0x7fa   : > { %v1253_v54 = vmul.f32 0.03125, %v1249_v53  ;;  %v1784_v53 = vld [vmem:[%s5163_s8 + $0x348] sm:$0xff] }
 0x7fc   : > { %v1255_v55 = vadd.f32 1e-05, %v1253_v54  ;;  %v1767_v54 = vld [vmem:[%s5163_s8 + $0x2c0] sm:$0xff] }
 0x7fd   : > { %v1252_v56 = vpop.xlane.xlu0 %1251 }
 0x7fe   : > { %3588 = vrsqrt.f32 %v1255_v55  ;;  %v1254_v59 = vmul.f32 0.03125, %v1252_v56  ;;  %v1799_v55 = vld [vmem:[%s5163_s8 + $0x3c0] sm:$0xff] }
 0x7ff   : > { %v1751_v56 = vld [vmem:[%s5163_s8 + $0x240] sm:$0xff] }
 0x800   : > { %v1256_v60 = vadd.f32 1e-05, %v1254_v59  ;;  %v1783_v59 = vld [vmem:[%s5163_s8 + $0x340] sm:$0xff] }
 0x802   : > { %3590 = vrsqrt.f32 %v1256_v60  ;;  %v1766_v60 = vld [vmem:[%s5163_s8 + $0x2b8] sm:$0xff] }
 0x80b   : > { %v3589_v0 = vpop.eup %3588 }
 0x80c   : > { %v1259_v2 = vmul.f32 %v3589_v0, %v1243_v26  ;;  %v1806_v26 = vld [vmem:[%s5163_s8 + $0x3f8] sm:$0xff] }
 0x80d   : > { %v1750_v0 = vld [vmem:[%s5163_s8 + $0x238] sm:$0xff] }
 0x80e   : > { %v1265_v3 = vmul.f32 %v1264_v63, %v1259_v2  ;;  %v1765_v2 = vld [vmem:[%s5163_s8 + $0x2b0] sm:$0xff] }
 0x80f   : > { %v3591_v6 = vpop.eup %3590 }
 0x810   : > { %v4073_v7 = vadd.f32 %v1270_v1, %v1265_v3  ;;  %v1260_v8 = vmul.f32 %v3591_v6, %v1244_v29  ;;  %v1805_v29 = vld [vmem:[%s5163_s8 + $0x3f0] sm:$0xff] }
 0x811   : > { %v1797_v3 = vld [vmem:[%s5163_s8 + $0x3b0] sm:$0xff] }
 0x812   : > { %v1266_v11 = vmul.f32 %v1264_v63, %v1260_v8  ;;  %3088 = vmatmul.mubr.msk.f32.vlgmr.msra.gmra.mxu1 %vm435_vm0, %v4073_v7  ;;  %3090 = vmatmul.mubr.msk.f32.vlgmr.msra.gmra.mxu0 %vm435_vm0, %v4073_v7  ;;  %v1798_v63 = vld [vmem:[%s5163_s8 + $0x3b8] sm:$0xff]  ;;  %v1749_v6 = vld [vmem:[%s5163_s8 + $0x230] sm:$0xff] }
 0x813   : > { %1606 = vmatpush1.msra.mxu1 %v1555_v9  ;;  %1683 = vmatpush1.msra.mxu0 %v1557_v41  ;;  %v1781_v8 = vld [vmem:[%s5163_s8 + $0x330] sm:$0xff]  ;;  %v1764_v9 = vld [vmem:[%s5163_s8 + $0x2a8] sm:$0xff] }
 0x814   : > { %v4097_v14 = vadd.f32 %v1270_v1, %v1266_v11  ;;  %1607 = vmatprep.subr.mxu1 %v1552_v10  ;;  %1684 = vmatprep.subr.mxu0 %v1554_v43  ;;  %v1782_v1 = vld [vmem:[%s5163_s8 + $0x338] sm:$0xff]  ;;  %v1796_v41 = vld [vmem:[%s5163_s8 + $0x3a8] sm:$0xff]  ;;  %v1763_v11 = vld [vmem:[%s5163_s8 + $0x2a0] sm:$0xff] }
 0x815   : > { %1387 = vmatprep.mubr.f32.mxu1 %v3657_v51  ;;  %1464 = vmatprep.mubr.f32.mxu0 %v3657_v51  ;;  %v1748_v10 = vld [vmem:[%s5163_s8 + $0x228] sm:$0xff] }
 0x816   : > { %1608 = vmatpush1.msra.mxu1 %v1551_v12  ;;  %1685 = vmatpush1.msra.mxu0 %v1553_v13  ;;  %v1780_v43 = vld [vmem:[%s5163_s8 + $0x328] sm:$0xff]  ;;  %v1795_v12 = vld [vmem:[%s5163_s8 + $0x3a0] sm:$0xff] }
 0x817   : > { %3089 = vmatmul.mubr.msk.f32.gmra.mxu1 %vm435_vm0, %v4097_v14  ;;  %3091 = vmatmul.mubr.msk.f32.gmra.mxu0 %vm435_vm0, %v4097_v14  ;;  %v1747_v13 = vld [vmem:[%s5163_s8 + $0x220] sm:$0xff] }
 0x818   : > { %1609 = vmatprep.subr.mxu1 %v1548_v15  ;;  %1686 = vmatprep.subr.mxu0 %v1550_v16  ;;  %v1779_v15 = vld [vmem:[%s5163_s8 + $0x320] sm:$0xff]  ;;  %v1762_v16 = vld [vmem:[%s5163_s8 + $0x298] sm:$0xff] }
 0x819   : > { %1610 = vmatpush1.msra.mxu1 %v1547_v17  ;;  %1687 = vmatpush1.msra.mxu0 %v1549_v19  ;;  %v1794_v17 = vld [vmem:[%s5163_s8 + $0x398] sm:$0xff] }
 0x81a   : > { %1611 = vmatprep.subr.mxu1 %v1544_v20  ;;  %1688 = vmatprep.subr.mxu0 %v1546_v21  ;;  %v1746_v19 = vld [vmem:[%s5163_s8 + $0x218] sm:$0xff]  ;;  %v1761_v21 = vld [vmem:[%s5163_s8 + $0x290] sm:$0xff] }
 0x81b   : > { %1612 = vmatpush1.msra.mxu1 %v1543_v23  ;;  %1645 = vmatprep.mubr.f32.mxu1 %v3657_v51  ;;  %v1778_v20 = vld [vmem:[%s5163_s8 + $0x318] sm:$0xff]  ;;  %v1793_v23 = vld [vmem:[%s5163_s8 + $0x390] sm:$0xff] }
 0x81c   : > { %1689 = vmatpush1.msra.mxu0 %v1545_v24  ;;  %1722 = vmatprep.mubr.f32.mxu0 %v3657_v51  ;;  %v1745_v24 = vld [vmem:[%s5163_s8 + $0x210] sm:$0xff] }
 0x81d   : > { %3092 = vmatmul.mubr.msk.f32.vlgmr.msra.gmra.mxu1 %vm435_vm0, %v4073_v7  ;;  %3094 = vmatmul.mubr.msk.f32.vlgmr.msra.gmra.mxu0 %vm435_vm0, %v4073_v7 }
 0x81e   : > { %1651 = vmatprep.mubr.f32.mxu1 %v3657_v51  ;;  %1728 = vmatprep.mubr.f32.mxu0 %v3657_v51 }
 0x81f   : > { %3145 = vmatprep.subr.mxu1 %v1774_v25  ;;  %3183 = vmatprep.subr.mxu0 %v1806_v26  ;;  %v1777_v25 = vld [vmem:[%s5163_s8 + $0x310] sm:$0xff]  ;;  %v1760_v26 = vld [vmem:[%s5163_s8 + $0x288] sm:$0xff] }
 0x820   : > { %3146 = vmatpush3.msra.mxu1 %v1758_v27  ;;  %3184 = vmatpush3.msra.mxu0 %v1790_v4  ;;  %v1792_v27 = vld [vmem:[%s5163_s8 + $0x388] sm:$0xff] }
 0x821   : > { %3093 = vmatmul.mubr.msk.f32.gmra.mxu1 %vm435_vm0, %v4097_v14  ;;  %3095 = vmatmul.mubr.msk.f32.gmra.mxu0 %vm435_vm0, %v4097_v14  ;;  %v1744_v4 = vld [vmem:[%s5163_s8 + $0x208] sm:$0xff] }
 0x822   : > { %3147 = vmatprep.subr.mxu1 %v1773_v28  ;;  %3185 = vmatprep.subr.mxu0 %v1805_v29  ;;  %v1776_v28 = vld [vmem:[%s5163_s8 + $0x308] sm:$0xff]  ;;  %v1759_v29 = vld [vmem:[%s5163_s8 + $0x280] sm:$0xff] }
 0x823   : > { %3148 = vmatpush3.msra.mxu1 %v1757_v30  ;;  %3186 = vmatpush3.msra.mxu0 %v1789_v31  ;;  %v1791_v30 = vld [vmem:[%s5163_s8 + $0x380] sm:$0xff] }
 0x824   : > { %3149 = vmatprep.subr.mxu1 %v1772_v5  ;;  %3187 = vmatprep.subr.mxu0 %v1804_v32  ;;  %v1743_v31 = vld [vmem:[%s5163_s8 + $0x200] sm:$0xff]  ;;  %v1510_v32 = vld [vmem:[%s5163_s8 + $0xf8] sm:$0xff] }
 0x825   : > { %3150 = vmatpush3.msra.mxu1 %v1756_v33  ;;  %3188 = vmatpush3.msra.mxu0 %v1788_v34  ;;  %v1775_v5 = vld [vmem:[%s5163_s8 + $0x300] sm:$0xff]  ;;  %v1542_v33 = vld [vmem:[%s5163_s8 + $0x1f8] sm:$0xff] }
 0x826   : > { %3151 = vmatprep.subr.mxu1 %v1771_v35  ;;  %3189 = vmatprep.subr.mxu0 %v1803_v36 }
 0x827   : > { %3152 = vmatpush3.msra.mxu1 %v1755_v37  ;;  %3190 = vmatpush3.msra.mxu0 %v1787_v38 }
 0x828   : > { %3153 = vmatprep.subr.mxu1 %v1770_v39  ;;  %3191 = vmatprep.subr.mxu0 %v1802_v40  ;;  %v1559_v40 = vld [vmem:[%s5158_s3 + $0x4] sm:$0xf] }
 0x829   : > { %3154 = vmatpush3.msra.mxu1 %v1754_v42  ;;  %3192 = vmatpush3.msra.mxu0 %v1786_v44 }
 0x82a   : > { %3155 = vmatprep.subr.mxu1 %v1769_v45  ;;  %3193 = vmatprep.subr.mxu0 %v1801_v46  ;;  %v1564_v45 = vrot.slane %v1559_v40, %v3854_v57  ;;  %v1572_v46 = vrot.slane %v1559_v40, %v4064_v61 }
 0x82b   : > { %3156 = vmatpush3.msra.mxu1 %v1753_v47  ;;  %3194 = vmatpush3.msra.mxu0 %v1785_v48  ;;  %v1568_v47 = vrot.slane %v1559_v40, %v3857_v58  ;;  %v1576_v48 = vrot.slane %v1559_v40, %v4067_v62  ;;  %v1523_v40 = vld [vmem:[%s5163_s8 + $0x160] sm:$0xff] }
 0x82c   : > { %3157 = vmatprep.subr.mxu1 %v1768_v49  ;;  %3195 = vmatprep.subr.mxu0 %v1800_v50 }
 0x82d   : > { %3158 = vmatpush3.msra.mxu1 %v1752_v52  ;;  %3196 = vmatpush3.msra.mxu0 %v1784_v53 }
 0x82e   : > { %3159 = vmatprep.subr.mxu1 %v1767_v54  ;;  %3197 = vmatprep.subr.mxu0 %v1799_v55 }
 0x82f   : > { %3160 = vmatpush3.msra.mxu1 %v1751_v56  ;;  %3198 = vmatpush3.msra.mxu0 %v1783_v59 }
 0x830   : > { %3161 = vmatprep.subr.mxu1 %v1766_v60  ;;  %3199 = vmatprep.subr.mxu0 %v1798_v63 }
 0x831   : > { %3162 = vmatpush3.msra.mxu1 %v1750_v0  ;;  %3200 = vmatpush3.msra.mxu0 %v1782_v1  ;;  %v4361_v0 = vld [vmem:[%s5158_s3] sm:$0xf] }
 0x832   : > { %3163 = vmatprep.subr.mxu1 %v1765_v2  ;;  %3201 = vmatprep.subr.mxu0 %v1797_v3  ;;  %v4365_v3 = vrot.slane %v4361_v0, %v3857_v58 }
 0x833   : > { %3164 = vmatpush3.msra.mxu1 %v1749_v6  ;;  %3202 = vmatpush3.msra.mxu0 %v1781_v8 }
 0x834   : > { %3165 = vmatprep.subr.mxu1 %v1764_v9  ;;  %3203 = vmatprep.subr.mxu0 %v1796_v41 }
 0x835   : > { %3166 = vmatpush3.msra.mxu1 %v1748_v10  ;;  %3204 = vmatpush3.msra.mxu0 %v1780_v43  ;;  %v1494_v10 = vld [vmem:[%s5163_s8 + $0x78] sm:$0xff] }
 0x836   : > { %3167 = vmatprep.subr.mxu1 %v1763_v11  ;;  %3205 = vmatprep.subr.mxu0 %v1795_v12  ;;  %v1526_v43 = vld [vmem:[%s5163_s8 + $0x178] sm:$0xff]  ;;  %v4375_v11 = vrot.slane %v4361_v0, %v4067_v62 }
 0x837   : > { %3168 = vmatpush3.msra.mxu1 %v1747_v13  ;;  %3206 = vmatpush3.msra.mxu0 %v1779_v15  ;;  %v1509_v15 = vld [vmem:[%s5163_s8 + $0xf0] sm:$0xff] }
 0x838   : > { %3169 = vmatprep.subr.mxu1 %v1762_v16  ;;  %3207 = vmatprep.subr.mxu0 %v1794_v17  ;;  %v1541_v16 = vld [vmem:[%s5163_s8 + $0x1f0] sm:$0xff] }
 0x839   : > { %3170 = vmatpush3.msra.mxu1 %v1746_v19  ;;  %3208 = vmatpush3.msra.mxu0 %v1778_v20  ;;  %v1493_v20 = vld [vmem:[%s5163_s8 + $0x70] sm:$0xff] }
 0x83a   : > { %3171 = vmatprep.subr.mxu1 %v1761_v21  ;;  %3209 = vmatprep.subr.mxu0 %v1793_v23  ;;  %v1525_v21 = vld [vmem:[%s5163_s8 + $0x170] sm:$0xff] }
 0x83b   : > { %3172 = vmatpush3.msra.mxu1 %v1745_v24  ;;  %3210 = vmatpush3.msra.mxu0 %v1777_v25 }
 0x83c   : > { %3173 = vmatprep.subr.mxu1 %v1760_v26  ;;  %3211 = vmatprep.subr.mxu0 %v1792_v27  ;;  %v1508_v26 = vld [vmem:[%s5163_s8 + $0xe8] sm:$0xff] }
 0x83d   : > { %3174 = vmatpush3.msra.mxu1 %v1744_v4  ;;  %3212 = vmatpush3.msra.mxu0 %v1776_v28  ;;  %v1540_v27 = vld [vmem:[%s5163_s8 + $0x1e8] sm:$0xff] }
 0x83e   : > { %3175 = vmatprep.subr.mxu1 %v1759_v29  ;;  %3213 = vmatprep.subr.mxu0 %v1791_v30  ;;  %v1492_v30 = vld [vmem:[%s5163_s8 + $0x68] sm:$0xff] }
 0x83f   : > { %3176 = vmatpush3.msra.mxu1 %v1743_v31  ;;  %3214 = vmatpush3.msra.mxu0 %v1775_v5  ;;  %v1524_v31 = vld [vmem:[%s5163_s8 + $0x168] sm:$0xff]  ;;  %v1507_v5 = vld [vmem:[%s5163_s8 + $0xe0] sm:$0xff] }
 0x840   : > { %3221 = vmatprep.subr.mxu1 %v1510_v32  ;;  %3259 = vmatprep.subr.mxu0 %v1542_v33  ;;  %v1539_v33 = vld [vmem:[%s5163_s8 + $0x1e0] sm:$0xff] }
 0x8d2   : > { %v4339_v34 = vpop.f32.mrf.mxu1  ;;  %v4341_v35 = vpop.f32.mrf.mxu0 }
 0x8d4   : > { %v1385_v36 = vpop.f32.mrf.mxu1  ;;  %v1462_v37 = vpop.f32.mrf.mxu0 }
 0x8d5   : > { %v1386_v25 = vadd.f32 %v1385_v36, %v4365_v3  ;;  %v1463_v4 = vadd.f32 %v1462_v37, %v4375_v11  ;;  %v1491_v37 = vld [vmem:[%s5163_s8 + $0x60] sm:$0xff] }
 0x8d7   : > { %v4343_v38 = vpop.f32.mrf.mxu1  ;;  %v4345_v39 = vpop.f32.mrf.mxu0  ;;  %v1472_v32 = vmax.f32 %v1386_v25, 0.0  ;;  %v1474_v36 = vmax.f32 %v1463_v4, 0.0  ;;  %v1498_v25 = vld [vmem:[%s5163_s8 + $0x98] sm:$0xff]  ;;  %v1302_v4 = vrot.slane %v4361_v0, %v4064_v61 }
 0x8d9   : > { %v4350_v42 = vpop.f32.mrf.mxu1  ;;  %v4352_v44 = vpop.f32.mrf.mxu0 }
 0x8dd   : > { %v1647_v49 = vpop.f32.mrf.mxu1  ;;  %v1724_v50 = vpop.f32.mrf.mxu0 }
 0x8de   : > { %v1648_v52 = vadd.f32 %v1647_v49, %v1564_v45  ;;  %v1725_v53 = vadd.f32 %v1724_v50, %v1572_v46  ;;  %v1505_v49 = vld [vmem:[%s5163_s8 + $0xd0] sm:$0xff] }
 0x8df   : > { %v1649_v54 = vpop.f32.mrf.mxu1  ;;  %v1726_v55 = vpop.f32.mrf.mxu0  ;;  %v1537_v50 = vld [vmem:[%s5163_s8 + $0x1d0] sm:$0xff] }
 0x8e0   : > { %v1650_v56 = vadd.f32 %v1649_v54, %v1568_v47  ;;  %v1727_v59 = vadd.f32 %v1726_v55, %v1576_v48  ;;  %v1735_v6 = vmax.f32 %v1648_v52, 0.0  ;;  %v1737_v8 = vmax.f32 %v1725_v53, 0.0  ;;  %v1489_v52 = vld [vmem:[%s5163_s8 + $0x50] sm:$0xff]  ;;  %v1504_v54 = vld [vmem:[%s5163_s8 + $0xc8] sm:$0xff] }
 0x8e1   : > { %v1653_v60 = vpop.f32.mrf.mxu1  ;;  %v1730_v63 = vpop.f32.mrf.mxu0  ;;  %v1521_v53 = vld [vmem:[%s5163_s8 + $0x150] sm:$0xff]  ;;  %v1536_v55 = vld [vmem:[%s5163_s8 + $0x1c8] sm:$0xff] }
 0x8e2   : > { %v1736_v1 = vmax.f32 %v1650_v56, 0.0  ;;  %v1738_v2 = vmax.f32 %v1727_v59, 0.0  ;;  %v1654_v17 = vadd.f32 %v1653_v60, %v1564_v45  ;;  %v1731_v19 = vadd.f32 %v1730_v63, %v1572_v46  ;;  %v1506_v45 = vld [vmem:[%s5163_s8 + $0xd8] sm:$0xff]  ;;  %v1488_v56 = vld [vmem:[%s5163_s8 + $0x48] sm:$0xff]  ;;  %v1503_v60 = vld [vmem:[%s5163_s8 + $0xc0] sm:$0xff] }
 0x8e3   : > { %v1655_v9 = vpop.f32.mrf.mxu1  ;;  %v1732_v41 = vpop.f32.mrf.mxu0  ;;  %v1538_v46 = vld [vmem:[%s5163_s8 + $0x1d8] sm:$0xff]  ;;  %v1520_v59 = vld [vmem:[%s5163_s8 + $0x148] sm:$0xff]  ;;  %v1535_v63 = vld [vmem:[%s5163_s8 + $0x1c0] sm:$0xff] }
 0x8e4   : > { %v1656_v12 = vadd.f32 %v1655_v9, %v1568_v47  ;;  %v1733_v13 = vadd.f32 %v1732_v41, %v1576_v48  ;;  %1871 = vmatprep.mubr.f32.mxu1 %v1736_v1  ;;  %1946 = vmatprep.mubr.f32.mxu0 %v1738_v2  ;;  %v1739_v28 = vmax.f32 %v1654_v17, 0.0  ;;  %v1741_v29 = vmax.f32 %v1731_v19, 0.0  ;;  %v1490_v47 = vld [vmem:[%s5163_s8 + $0x58] sm:$0xff]  ;;  %v1487_v1 = vld [vmem:[%s5163_s8 + $0x40] sm:$0xff]  ;;  %v1484_v17 = vld [vmem:[%s5163_s8 + $0x28] sm:$0xff] }
 0x8e5   : > { %1872 = vmatmul.mubr.f32.vlgmr.msra.gmra.mxu1 %v1735_v6  ;;  %1947 = vmatmul.mubr.f32.vlgmr.msra.gmra.mxu0 %v1737_v8  ;;  %v1522_v48 = vld [vmem:[%s5163_s8 + $0x158] sm:$0xff]  ;;  %v1519_v2 = vld [vmem:[%s5163_s8 + $0x140] sm:$0xff]  ;;  %v1516_v19 = vld [vmem:[%s5163_s8 + $0x128] sm:$0xff] }
 0x8e6   : > { %v1740_v23 = vmax.f32 %v1656_v12, 0.0  ;;  %v1742_v24 = vmax.f32 %v1733_v13, 0.0  ;;  %3222 = vmatpush3.msra.mxu1 %v1494_v10  ;;  %3260 = vmatpush3.msra.mxu0 %v1526_v43  ;;  %v1502_v6 = vld [vmem:[%s5163_s8 + $0xb8] sm:$0xff]  ;;  %v1501_v10 = vld [vmem:[%s5163_s8 + $0xb0] sm:$0xff] }
 0x8e7   : > { %3223 = vmatprep.subr.mxu1 %v1509_v15  ;;  %3261 = vmatprep.subr.mxu0 %v1541_v16  ;;  %v1534_v8 = vld [vmem:[%s5163_s8 + $0x1b8] sm:$0xff]  ;;  %v1533_v43 = vld [vmem:[%s5163_s8 + $0x1b0] sm:$0xff]  ;;  %v1500_v15 = vld [vmem:[%s5163_s8 + $0xa8] sm:$0xff] }
 0x8e8   : > { %3224 = vmatpush3.msra.mxu1 %v1493_v20  ;;  %3262 = vmatpush3.msra.mxu0 %v1525_v21  ;;  %v1486_v9 = vld [vmem:[%s5163_s8 + $0x38] sm:$0xff]  ;;  %v1485_v12 = vld [vmem:[%s5163_s8 + $0x30] sm:$0xff]  ;;  %v1532_v16 = vld [vmem:[%s5163_s8 + $0x1a8] sm:$0xff] }
 0x8e9   : > { %1876 = vmatprep.mubr.f32.mxu1 %v1740_v23  ;;  %1951 = vmatprep.mubr.f32.mxu0 %v1742_v24  ;;  %v1518_v41 = vld [vmem:[%s5163_s8 + $0x138] sm:$0xff]  ;;  %v1517_v13 = vld [vmem:[%s5163_s8 + $0x130] sm:$0xff]  ;;  %v1499_v20 = vld [vmem:[%s5163_s8 + $0xa0] sm:$0xff] }
 0x8ea   : > { %3225 = vmatprep.subr.mxu1 %v1508_v26  ;;  %3263 = vmatprep.subr.mxu0 %v1540_v27  ;;  %v1531_v21 = vld [vmem:[%s5163_s8 + $0x1a0] sm:$0xff]  ;;  %v1530_v26 = vld [vmem:[%s5163_s8 + $0x198] sm:$0xff]  ;;  %v1294_v27 = vrot.slane %v4361_v0, %v3854_v57  ;;  %v1529_v0 = vld [vmem:[%s5163_s8 + $0x190] sm:$0xff] }
 0x8eb   : > { %1877 = vmatmul.mubr.f32.gmra.mxu1 %v1739_v28  ;;  %1952 = vmatmul.mubr.f32.gmra.mxu0 %v1741_v29  ;;  %v1483_v23 = vld [vmem:[%s5163_s8 + $0x20] sm:$0xff]  ;;  %v1482_v28 = vld [vmem:[%s5163_s8 + $0x18] sm:$0xff] }
 0x8ec   : > { %3226 = vmatpush3.msra.mxu1 %v1492_v30  ;;  %3264 = vmatpush3.msra.mxu0 %v1524_v31  ;;  %v1515_v24 = vld [vmem:[%s5163_s8 + $0x120] sm:$0xff]  ;;  %v1514_v29 = vld [vmem:[%s5163_s8 + $0x118] sm:$0xff]  ;;  %v1497_v30 = vld [vmem:[%s5163_s8 + $0x90] sm:$0xff] }
 0x8ed   : > { %3227 = vmatprep.subr.mxu1 %v1507_v5  ;;  %2021 = vmatprep.mubr.f32.mxu1 %v1472_v32  ;;  %v1481_v31 = vld [vmem:[%s5163_s8 + $0x10] sm:$0xff]  ;;  %v1496_v32 = vld [vmem:[%s5163_s8 + $0x88] sm:$0xff] }
 0x8ee   : > { %3265 = vmatprep.subr.mxu0 %v1539_v33  ;;  %2096 = vmatprep.mubr.f32.mxu0 %v1474_v36  ;;  %v1513_v5 = vld [vmem:[%s5163_s8 + $0x110] sm:$0xff]  ;;  %v1528_v33 = vld [vmem:[%s5163_s8 + $0x188] sm:$0xff]  ;;  %v1384_v36 = vadd.f32 %v4339_v34, %v1294_v27  ;;  %v1527_v34 = vld [vmem:[%s5163_s8 + $0x180] sm:$0xff] }
 0x8ef   : > { %3228 = vmatpush3.msra.mxu1 %v1491_v37  ;;  %3266 = vmatpush3.msra.mxu0 %v1523_v40  ;;  %v1461_v37 = vadd.f32 %v4341_v35, %v1302_v4  ;;  %v1480_v40 = vld [vmem:[%s5163_s8 + $0x8] sm:$0xff]  ;;  %v1392_v35 = vadd.f32 %v4350_v42, %v4365_v3  ;;  %v1390_v3 = vadd.f32 %v4343_v38, %v1294_v27 }
 0x8f0   : > { %3229 = vmatprep.subr.mxu1 %v1506_v45  ;;  %3267 = vmatprep.subr.mxu0 %v1538_v46  ;;  %v1512_v45 = vld [vmem:[%s5163_s8 + $0x108] sm:$0xff]  ;;  %v1495_v46 = vld [vmem:[%s5163_s8 + $0x80] sm:$0xff] }
 0x8f1   : > { %3230 = vmatpush3.msra.mxu1 %v1490_v47  ;;  %3268 = vmatpush3.msra.mxu0 %v1522_v48  ;;  %v1469_v47 = vadd.f32 %v4352_v44, %v4375_v11  ;;  %v1479_v48 = vld [vmem:[%s5163_s8] sm:$0xff]  ;;  %v2120_v42 = vld [vmem:[%s5162_s7 + $0x1c8] sm:$0xff]  ;;  %v2122_v44 = vld [vmem:[%s5162_s7 + $0x1d8] sm:$0xff]  ;;  %v1467_v11 = vadd.f32 %v4345_v39, %v1302_v4 }
 0x8f2   : > { %3231 = vmatprep.subr.mxu1 %v1505_v49  ;;  %3269 = vmatprep.subr.mxu0 %v1537_v50  ;;  %v1511_v49 = vld [vmem:[%s5163_s8 + $0x100] sm:$0xff]  ;;  %v1471_v50 = vmax.f32 %v1384_v36, 0.0  ;;  %v2116_v38 = vld [vmem:[%s5162_s7 + $0x148] sm:$0xff]  ;;  %v2118_v39 = vld [vmem:[%s5162_s7 + $0x158] sm:$0xff] }
 0x8f3   : > { %3232 = vmatpush3.msra.mxu1 %v1489_v52  ;;  %3270 = vmatpush3.msra.mxu0 %v1521_v53  ;;  %v1473_v52 = vmax.f32 %v1461_v37, 0.0  ;;  %v1476_v53 = vmax.f32 %v1392_v35, 0.0  ;;  %v2352_v27 = vld [vmem:[%s5163_s8 + $0x568] sm:$0xff]  ;;  %v2335_v4 = vld [vmem:[%s5163_s8 + $0x4e0] sm:$0xff]  ;;  %v2365_v36 = vld [vmem:[%s5163_s8 + $0x5d0] sm:$0xff] }
 0x8f4   : > { %3233 = vmatprep.subr.mxu1 %v1504_v54  ;;  %3271 = vmatprep.subr.mxu0 %v1536_v55  ;;  %v1478_v54 = vmax.f32 %v1469_v47, 0.0  ;;  %v2119_v55 = vld [vmem:[%s5162_s7 + $0x1c0] sm:$0xff]  ;;  %v2317_v37 = vld [vmem:[%s5163_s8 + $0x450] sm:$0xff]  ;;  %v2348_v35 = vld [vmem:[%s5163_s8 + $0x548] sm:$0xff] }
 0x8f5   : > { %3234 = vmatpush3.msra.mxu1 %v1488_v56  ;;  %3272 = vmatpush3.msra.mxu0 %v1520_v59  ;;  %v2121_v56 = vld [vmem:[%s5162_s7 + $0x1d0] sm:$0xff]  ;;  %v2115_v59 = vld [vmem:[%s5162_s7 + $0x140] sm:$0xff] }
 0x8f6   : > { %3235 = vmatprep.subr.mxu1 %v1503_v60  ;;  %3273 = vmatprep.subr.mxu0 %v1535_v63  ;;  %v2117_v60 = vld [vmem:[%s5162_s7 + $0x150] sm:$0xff]  ;;  %v1475_v63 = vmax.f32 %v1390_v3, 0.0  ;;  %v2331_v47 = vld [vmem:[%s5163_s8 + $0x4c0] sm:$0xff]  ;;  %v2346_v3 = vld [vmem:[%s5163_s8 + $0x538] sm:$0xff] }
 0x8f7   : > { %3236 = vmatpush3.msra.mxu1 %v1487_v1  ;;  %3274 = vmatpush3.msra.mxu0 %v1519_v2  ;;  %v1477_v1 = vmax.f32 %v1467_v11, 0.0  ;;  %v2112_v2 = vld [vmem:[%s5162_s7 + $0xc8] sm:$0xff]  ;;  %v2329_v11 = vld [vmem:[%s5163_s8 + $0x4b0] sm:$0xff] }
 0x8f8   : > { %3237 = vmatprep.subr.mxu1 %v1502_v6  ;;  %3275 = vmatprep.subr.mxu0 %v1534_v8  ;;  %v2114_v6 = vld [vmem:[%s5162_s7 + $0xd8] sm:$0xff]  ;;  %v2111_v8 = vld [vmem:[%s5162_s7 + $0xc0] sm:$0xff] }
 0x8f9   : > { %3238 = vmatpush3.msra.mxu1 %v1486_v9  ;;  %3276 = vmatpush3.msra.mxu0 %v1518_v41  ;;  %v2113_v9 = vld [vmem:[%s5162_s7 + $0xd0] sm:$0xff]  ;;  %v2108_v41 = vld [vmem:[%s5162_s7 + $0x48] sm:$0xff] }
 0x8fa   : > { %3239 = vmatprep.subr.mxu1 %v1501_v10  ;;  %3277 = vmatprep.subr.mxu0 %v1533_v43  ;;  %v2110_v10 = vld [vmem:[%s5162_s7 + $0x58] sm:$0xff]  ;;  %v2107_v43 = vld [vmem:[%s5162_s7 + $0x40] sm:$0xff] }
 0x8fb   : > { %3240 = vmatpush3.msra.mxu1 %v1485_v12  ;;  %3278 = vmatpush3.msra.mxu0 %v1517_v13  ;;  %v2109_v12 = vld [vmem:[%s5162_s7 + $0x50] sm:$0xff]  ;;  %v2338_v13 = vld [vmem:[%s5163_s8 + $0x4f8] sm:$0xff] }
 0x8fc   : > { %3241 = vmatprep.subr.mxu1 %v1500_v15  ;;  %3279 = vmatprep.subr.mxu0 %v1532_v16  ;;  %v2370_v15 = vld [vmem:[%s5163_s8 + $0x5f8] sm:$0xff] }
 0x8fd   : > { %3242 = vmatpush3.msra.mxu1 %v1484_v17  ;;  %3280 = vmatpush3.msra.mxu0 %v1516_v19  ;;  %v2322_v16 = vld [vmem:[%s5163_s8 + $0x478] sm:$0xff]  ;;  %v2337_v19 = vld [vmem:[%s5163_s8 + $0x4f0] sm:$0xff] }
 0x8fe   : > { %3243 = vmatprep.subr.mxu1 %v1499_v20  ;;  %3281 = vmatprep.subr.mxu0 %v1531_v21  ;;  %v2354_v17 = vld [vmem:[%s5163_s8 + $0x578] sm:$0xff]  ;;  %v2369_v20 = vld [vmem:[%s5163_s8 + $0x5f0] sm:$0xff] }
 0x8ff   : > { %3244 = vmatpush3.msra.mxu1 %v1483_v23  ;;  %3282 = vmatpush3.msra.mxu0 %v1515_v24  ;;  %v2321_v21 = vld [vmem:[%s5163_s8 + $0x470] sm:$0xff]  ;;  %v2336_v24 = vld [vmem:[%s5163_s8 + $0x4e8] sm:$0xff] }
 0x900   : > { %3245 = vmatprep.subr.mxu1 %v1498_v25  ;;  %3283 = vmatprep.subr.mxu0 %v1530_v26  ;;  %v2353_v23 = vld [vmem:[%s5163_s8 + $0x570] sm:$0xff]  ;;  %v2368_v25 = vld [vmem:[%s5163_s8 + $0x5e8] sm:$0xff] }
 0x901   : > { %3246 = vmatpush3.msra.mxu1 %v1482_v28  ;;  %3284 = vmatpush3.msra.mxu0 %v1514_v29  ;;  %v2320_v26 = vld [vmem:[%s5163_s8 + $0x468] sm:$0xff]  ;;  %v2367_v28 = vld [vmem:[%s5163_s8 + $0x5e0] sm:$0xff] }
 0x902   : > { %3247 = vmatprep.subr.mxu1 %v1497_v30  ;;  %3285 = vmatprep.subr.mxu0 %v1529_v0  ;;  %v2319_v29 = vld [vmem:[%s5163_s8 + $0x460] sm:$0xff]  ;;  %v2334_v0 = vld [vmem:[%s5163_s8 + $0x4d8] sm:$0xff] }
 0x903   : > { %3248 = vmatpush3.msra.mxu1 %v1481_v31  ;;  %3286 = vmatpush3.msra.mxu0 %v1513_v5  ;;  %v2351_v30 = vld [vmem:[%s5163_s8 + $0x560] sm:$0xff]  ;;  %v2366_v31 = vld [vmem:[%s5163_s8 + $0x5d8] sm:$0xff] }
 0x904   : > { %3249 = vmatprep.subr.mxu1 %v1496_v32  ;;  %3287 = vmatprep.subr.mxu0 %v1528_v33  ;;  %v2318_v5 = vld [vmem:[%s5163_s8 + $0x458] sm:$0xff]  ;;  %v2333_v33 = vld [vmem:[%s5163_s8 + $0x4d0] sm:$0xff] }
 0x905   : > { %3250 = vmatpush3.msra.mxu1 %v1480_v40  ;;  %3288 = vmatpush3.msra.mxu0 %v1512_v45  ;;  %v2350_v32 = vld [vmem:[%s5163_s8 + $0x558] sm:$0xff]  ;;  %v2349_v40 = vld [vmem:[%s5163_s8 + $0x550] sm:$0xff]  ;;  %v2332_v45 = vld [vmem:[%s5163_s8 + $0x4c8] sm:$0xff] }
 0x906   : > { %3251 = vmatprep.subr.mxu1 %v1495_v46  ;;  %3289 = vmatprep.subr.mxu0 %v1527_v34  ;;  %v2364_v46 = vld [vmem:[%s5163_s8 + $0x5c8] sm:$0xff] }
 0x907   : > { %3252 = vmatpush3.msra.mxu1 %v1479_v48  ;;  %3290 = vmatpush3.msra.mxu0 %v1511_v49  ;;  %v2316_v34 = vld [vmem:[%s5163_s8 + $0x448] sm:$0xff]  ;;  %v2363_v48 = vld [vmem:[%s5163_s8 + $0x5c0] sm:$0xff] }
 0x908   : > { %2022 = vmatmul.mubr.f32.vlgmr.msra.gmra.mxu1 %v1471_v50  ;;  %2097 = vmatmul.mubr.f32.vlgmr.msra.gmra.mxu0 %v1473_v52  ;;  %v2315_v49 = vld [vmem:[%s5163_s8 + $0x440] sm:$0xff]  ;;  %v2330_v52 = vld [vmem:[%s5163_s8 + $0x4b8] sm:$0xff] }
 0x909   : > { %2169 = vmatprep.subr.mxu1 %v2120_v42  ;;  %2246 = vmatprep.subr.mxu0 %v2122_v44  ;;  %v2347_v50 = vld [vmem:[%s5163_s8 + $0x540] sm:$0xff]  ;;  %v2362_v42 = vld [vmem:[%s5163_s8 + $0x5b8] sm:$0xff] }
 0x90a   : > { %2026 = vmatprep.mubr.f32.mxu1 %v1476_v53  ;;  %2101 = vmatprep.mubr.f32.mxu0 %v1478_v54  ;;  %v2314_v44 = vld [vmem:[%s5163_s8 + $0x438] sm:$0xff]  ;;  %v2361_v53 = vld [vmem:[%s5163_s8 + $0x5b0] sm:$0xff] }
 0x90b   : > { %2170 = vmatpush1.msra.mxu1 %v2119_v55  ;;  %2247 = vmatpush1.msra.mxu0 %v2121_v56  ;;  %v2313_v54 = vld [vmem:[%s5163_s8 + $0x430] sm:$0xff]  ;;  %v2328_v56 = vld [vmem:[%s5163_s8 + $0x4a8] sm:$0xff] }
 0x90c   : > { %2171 = vmatprep.subr.mxu1 %v2116_v38  ;;  %2248 = vmatprep.subr.mxu0 %v2118_v39  ;;  %v2345_v55 = vld [vmem:[%s5163_s8 + $0x530] sm:$0xff]  ;;  %v2360_v38 = vld [vmem:[%s5163_s8 + $0x5a8] sm:$0xff] }
 0x90d   : > { %2172 = vmatpush1.msra.mxu1 %v2115_v59  ;;  %2249 = vmatpush1.msra.mxu0 %v2117_v60  ;;  %v2312_v39 = vld [vmem:[%s5163_s8 + $0x428] sm:$0xff]  ;;  %v2327_v60 = vld [vmem:[%s5163_s8 + $0x4a0] sm:$0xff] }
 0x90e   : > { %2027 = vmatmul.mubr.f32.gmra.mxu1 %v1475_v63  ;;  %2102 = vmatmul.mubr.f32.gmra.mxu0 %v1477_v1  ;;  %v2344_v59 = vld [vmem:[%s5163_s8 + $0x528] sm:$0xff]  ;;  %v2359_v63 = vld [vmem:[%s5163_s8 + $0x5a0] sm:$0xff] }
 0x90f   : > { %2173 = vmatprep.subr.mxu1 %v2112_v2  ;;  %2250 = vmatprep.subr.mxu0 %v2114_v6  ;;  %v2311_v1 = vld [vmem:[%s5163_s8 + $0x420] sm:$0xff]  ;;  %v2326_v6 = vld [vmem:[%s5163_s8 + $0x498] sm:$0xff] }
 0x910   : > { %2174 = vmatpush1.msra.mxu1 %v2111_v8  ;;  %2251 = vmatpush1.msra.mxu0 %v2113_v9  ;;  %v2343_v2 = vld [vmem:[%s5163_s8 + $0x520] sm:$0xff]  ;;  %v2358_v8 = vld [vmem:[%s5163_s8 + $0x598] sm:$0xff] }
 0x911   : > { %2175 = vmatprep.subr.mxu1 %v2108_v41  ;;  %2252 = vmatprep.subr.mxu0 %v2110_v10  ;;  %v2310_v9 = vld [vmem:[%s5163_s8 + $0x418] sm:$0xff]  ;;  %v2325_v10 = vld [vmem:[%s5163_s8 + $0x490] sm:$0xff] }
 0x912   : > { %2176 = vmatpush1.msra.mxu1 %v2107_v43  ;;  %2209 = vmatprep.mubr.f32.mxu1 %v3657_v51  ;;  %v2342_v41 = vld [vmem:[%s5163_s8 + $0x518] sm:$0xff]  ;;  %v2357_v43 = vld [vmem:[%s5163_s8 + $0x590] sm:$0xff] }
 0x913   : > { %2253 = vmatpush1.msra.mxu0 %v2109_v12  ;;  %2286 = vmatprep.mubr.f32.mxu0 %v3657_v51  ;;  %v2309_v12 = vld [vmem:[%s5163_s8 + $0x410] sm:$0xff] }
 0x914   : > { %3096 = vmatmul.mubr.msk.f32.vlgmr.msra.gmra.mxu1 %vm435_vm0, %v4073_v7  ;;  %3098 = vmatmul.mubr.msk.f32.vlgmr.msra.gmra.mxu0 %vm435_vm0, %v4073_v7 }
 0x915   : > { %2215 = vmatprep.mubr.f32.mxu1 %v3657_v51  ;;  %2292 = vmatprep.mubr.f32.mxu0 %v3657_v51 }
 0x916   : > { %3297 = vmatprep.subr.mxu1 %v2338_v13  ;;  %3335 = vmatprep.subr.mxu0 %v2370_v15  ;;  %v2341_v13 = vld [vmem:[%s5163_s8 + $0x510] sm:$0xff]  ;;  %v2324_v15 = vld [vmem:[%s5163_s8 + $0x488] sm:$0xff] }
 0x917   : > { %3298 = vmatpush3.msra.mxu1 %v2322_v16  ;;  %3336 = vmatpush3.msra.mxu0 %v2354_v17  ;;  %v2356_v16 = vld [vmem:[%s5163_s8 + $0x588] sm:$0xff] }
 0x918   : > { %3097 = vmatmul.mubr.msk.f32.gmra.mxu1 %vm435_vm0, %v4097_v14  ;;  %3099 = vmatmul.mubr.msk.f32.gmra.mxu0 %vm435_vm0, %v4097_v14  ;;  %v2308_v17 = vld [vmem:[%s5163_s8 + $0x408] sm:$0xff] }
 0x919   : > { %3299 = vmatprep.subr.mxu1 %v2337_v19  ;;  %3337 = vmatprep.subr.mxu0 %v2369_v20  ;;  %v2340_v19 = vld [vmem:[%s5163_s8 + $0x508] sm:$0xff]  ;;  %v2323_v20 = vld [vmem:[%s5163_s8 + $0x480] sm:$0xff] }
 0x91a   : > { %3300 = vmatpush3.msra.mxu1 %v2321_v21  ;;  %3338 = vmatpush3.msra.mxu0 %v2353_v23  ;;  %v2355_v21 = vld [vmem:[%s5163_s8 + $0x580] sm:$0xff] }
 0x91b   : > { %3301 = vmatprep.subr.mxu1 %v2336_v24  ;;  %3339 = vmatprep.subr.mxu0 %v2368_v25  ;;  %v2307_v23 = vld [vmem:[%s5163_s8 + $0x400] sm:$0xff]  ;;  %v2536_v25 = vld [vmem:[%s5162_s7 + $0x1e8] sm:$0xff] }
 0x91c   : > { %3302 = vmatpush3.msra.mxu1 %v2320_v26  ;;  %3340 = vmatpush3.msra.mxu0 %v2352_v27  ;;  %v2339_v24 = vld [vmem:[%s5163_s8 + $0x500] sm:$0xff]  ;;  %v2538_v26 = vld [vmem:[%s5162_s7 + $0x1f8] sm:$0xff] }
 0x91d   : > { %3303 = vmatprep.subr.mxu1 %v2335_v4  ;;  %3341 = vmatprep.subr.mxu0 %v2367_v28 }
 0x91e   : > { %3304 = vmatpush3.msra.mxu1 %v2319_v29  ;;  %3342 = vmatpush3.msra.mxu0 %v2351_v30 }
 0x91f   : > { %3305 = vmatprep.subr.mxu1 %v2334_v0  ;;  %3343 = vmatprep.subr.mxu0 %v2366_v31 }
 0x920   : > { %3306 = vmatpush3.msra.mxu1 %v2318_v5  ;;  %3344 = vmatpush3.msra.mxu0 %v2350_v32 }
 0x921   : > { %3307 = vmatprep.subr.mxu1 %v2333_v33  ;;  %3345 = vmatprep.subr.mxu0 %v2365_v36 }
 0x922   : > { %3308 = vmatpush3.msra.mxu1 %v2317_v37  ;;  %3346 = vmatpush3.msra.mxu0 %v2349_v40 }
 0x923   : > { %3309 = vmatprep.subr.mxu1 %v2332_v45  ;;  %3347 = vmatprep.subr.mxu0 %v2364_v46 }
 0x924   : > { %3310 = vmatpush3.msra.mxu1 %v2316_v34  ;;  %3348 = vmatpush3.msra.mxu0 %v2348_v35 }
 0x925   : > { %3311 = vmatprep.subr.mxu1 %v2331_v47  ;;  %3349 = vmatprep.subr.mxu0 %v2363_v48 }
 0x926   : > { %3312 = vmatpush3.msra.mxu1 %v2315_v49  ;;  %3350 = vmatpush3.msra.mxu0 %v2347_v50 }
 0x927   : > { %3313 = vmatprep.subr.mxu1 %v2330_v52  ;;  %3351 = vmatprep.subr.mxu0 %v2362_v42 }
 0x928   : > { %3314 = vmatpush3.msra.mxu1 %v2314_v44  ;;  %3352 = vmatpush3.msra.mxu0 %v2346_v3  ;;  %v2123_v3 = vld [vmem:[%s5158_s3 + $0x8] sm:$0xf] }
 0x929   : > { %3315 = vmatprep.subr.mxu1 %v2329_v11  ;;  %3353 = vmatprep.subr.mxu0 %v2361_v53 }
 0x92a   : > { %3316 = vmatpush3.msra.mxu1 %v2313_v54  ;;  %3354 = vmatpush3.msra.mxu0 %v2345_v55 }
 0x92b   : > { %3317 = vmatprep.subr.mxu1 %v2328_v56  ;;  %3355 = vmatprep.subr.mxu0 %v2360_v38  ;;  %v2128_v56 = vrot.slane %v2123_v3, %v3854_v57  ;;  %v2136_v38 = vrot.slane %v2123_v3, %v4064_v61 }
 0x92c   : > { %3318 = vmatpush3.msra.mxu1 %v2312_v39  ;;  %3356 = vmatpush3.msra.mxu0 %v2344_v59  ;;  %v2132_v59 = vrot.slane %v2123_v3, %v3857_v58 }
 0x92d   : > { %3319 = vmatprep.subr.mxu1 %v2327_v60  ;;  %3357 = vmatprep.subr.mxu0 %v2359_v63  ;;  %v2140_v60 = vrot.slane %v2123_v3, %v4067_v62  ;;  %v2737_v3 = vld [vmem:[%s5163_s8 + $0x670] sm:$0xff] }
 0x92e   : > { %3320 = vmatpush3.msra.mxu1 %v2311_v1  ;;  %3358 = vmatpush3.msra.mxu0 %v2343_v2 }
 0x92f   : > { %3321 = vmatprep.subr.mxu1 %v2326_v6  ;;  %3359 = vmatprep.subr.mxu0 %v2358_v8 }
 0x930   : > { %3322 = vmatpush3.msra.mxu1 %v2310_v9  ;;  %3360 = vmatpush3.msra.mxu0 %v2342_v41 }
 0x931   : > { %3323 = vmatprep.subr.mxu1 %v2325_v10  ;;  %3361 = vmatprep.subr.mxu0 %v2357_v43 }
 0x932   : > { %3324 = vmatpush3.msra.mxu1 %v2309_v12  ;;  %3362 = vmatpush3.msra.mxu0 %v2341_v13 }
 0x933   : > { %3325 = vmatprep.subr.mxu1 %v2324_v15  ;;  %3363 = vmatprep.subr.mxu0 %v2356_v16 }
 0x934   : > { %3326 = vmatpush3.msra.mxu1 %v2308_v17  ;;  %3364 = vmatpush3.msra.mxu0 %v2340_v19 }
 0x935   : > { %3327 = vmatprep.subr.mxu1 %v2323_v20  ;;  %3365 = vmatprep.subr.mxu0 %v2355_v21 }
 0x936   : > { %3328 = vmatpush3.msra.mxu1 %v2307_v23  ;;  %3366 = vmatpush3.msra.mxu0 %v2339_v24  ;;  %v2535_v24 = vld [vmem:[%s5162_s7 + $0x1e0] sm:$0xff] }
 0x937   : > { %2585 = vmatprep.subr.mxu1 %v2536_v25  ;;  %2662 = vmatprep.subr.mxu0 %v2538_v26  ;;  %v2537_v25 = vld [vmem:[%s5162_s7 + $0x1f0] sm:$0xff] }
 0x9a5   : > { %v3177_v27 = vpop.f32.mrf.mxu1  ;;  %v3215_v4 = vpop.f32.mrf.mxu0 }
 0x9a7   : > { %v3178_v28 = vpop.f32.mrf.mxu1  ;;  %v3216_v29 = vpop.f32.mrf.mxu0 }
 0x9a8   : > { %v3179_v30 = vadd.f32 %v3178_v28, %v3177_v27  ;;  %v3217_v0 = vadd.f32 %v3216_v29, %v3215_v4  ;;  %v2532_v28 = vld [vmem:[%s5162_s7 + $0x168] sm:$0xff]  ;;  %v2534_v29 = vld [vmem:[%s5162_s7 + $0x178] sm:$0xff] }
 0x9aa   : > { %v1949_v31 = vadd.f32 %v3217_v0, %v3179_v30 }
 0x9ab   : > { %v3180_v5 = vpop.f32.mrf.mxu1  ;;  %v3218_v32 = vpop.f32.mrf.mxu0 }
 0x9ad   : > { %v3181_v33 = vpop.f32.mrf.mxu1  ;;  %v3219_v36 = vpop.f32.mrf.mxu0 }
 0x9ae   : > { %v3182_v37 = vadd.f32 %v3181_v33, %v3180_v5  ;;  %v3220_v40 = vadd.f32 %v3219_v36, %v3218_v32  ;;  %v2533_v5 = vld [vmem:[%s5162_s7 + $0x170] sm:$0xff]  ;;  %v2528_v36 = vld [vmem:[%s5162_s7 + $0xe8] sm:$0xff] }
 0x9b0   : > { %v1954_v45 = vadd.f32 %v3220_v40, %v3182_v37  ;;  %v2530_v37 = vld [vmem:[%s5162_s7 + $0xf8] sm:$0xff]  ;;  %v2527_v40 = vld [vmem:[%s5162_s7 + $0xe0] sm:$0xff] }
 0x9c8   : > { %v3253_v46 = vpop.f32.mrf.mxu1  ;;  %v3291_v34 = vpop.f32.mrf.mxu0 }
 0x9ca   : > { %v3254_v35 = vpop.f32.mrf.mxu1  ;;  %v3292_v47 = vpop.f32.mrf.mxu0 }
 0x9cb   : > { %v3255_v48 = vadd.f32 %v3254_v35, %v3253_v46  ;;  %v3293_v49 = vadd.f32 %v3292_v47, %v3291_v34  ;;  %v2524_v46 = vld [vmem:[%s5162_s7 + $0x68] sm:$0xff]  ;;  %v2526_v34 = vld [vmem:[%s5162_s7 + $0x78] sm:$0xff]  ;;  %v2523_v35 = vld [vmem:[%s5162_s7 + $0x60] sm:$0xff] }
 0x9cc   : > { %v2525_v47 = vld [vmem:[%s5162_s7 + $0x70] sm:$0xff] }
 0x9cd   : > { %v2024_v50 = vadd.f32 %v3255_v48, %v1949_v31  ;;  %v2531_v31 = vld [vmem:[%s5162_s7 + $0x160] sm:$0xff]  ;;  %v2754_v48 = vld [vmem:[%s5163_s8 + $0x6f8] sm:$0xff] }
 0x9ce   : > { %v3256_v52 = vpop.f32.mrf.mxu1  ;;  %v3294_v42 = vpop.f32.mrf.mxu0 }
 0x9cf   : > { %v4829_v44 = vadd.f32 %v3293_v49, %v2024_v50  ;;  %v2786_v49 = vld [vmem:[%s5163_s8 + $0x7f8] sm:$0xff] }
 0x9d0   : > { %v3257_v11 = vpop.f32.mrf.mxu1  ;;  %v3295_v53 = vpop.f32.mrf.mxu0  ;;  %v2738_v50 = vld [vmem:[%s5163_s8 + $0x678] sm:$0xff] }
 0x9d1   : > { %v3258_v54 = vadd.f32 %v3257_v11, %v3256_v52  ;;  %v3296_v55 = vadd.f32 %v3295_v53, %v3294_v42  ;;  %v2770_v52 = vld [vmem:[%s5163_s8 + $0x778] sm:$0xff]  ;;  %v2753_v42 = vld [vmem:[%s5163_s8 + $0x6f0] sm:$0xff]  ;;  %v2752_v11 = vld [vmem:[%s5163_s8 + $0x6e8] sm:$0xff] }
 0x9d2   : > { %v2784_v53 = vld [vmem:[%s5163_s8 + $0x7e8] sm:$0xff] }
 0x9d3   : > { %v2029_v39 = vadd.f32 %v3258_v54, %v1954_v45  ;;  %v2529_v45 = vld [vmem:[%s5162_s7 + $0xf0] sm:$0xff]  ;;  %v2736_v54 = vld [vmem:[%s5163_s8 + $0x668] sm:$0xff] }
 0x9d4   : > { %v2211_v63 = vpop.f32.mrf.mxu1  ;;  %v2288_v1 = vpop.f32.mrf.mxu0 }
 0x9d5   : > { %v4838_v2 = vadd.f32 %v3296_v55, %v2029_v39  ;;  %v2212_v6 = vadd.f32 %v2211_v63, %v2128_v56  ;;  %v2289_v8 = vadd.f32 %v2288_v1, %v2136_v38  ;;  %v2768_v55 = vld [vmem:[%s5163_s8 + $0x768] sm:$0xff]  ;;  %v2767_v39 = vld [vmem:[%s5163_s8 + $0x760] sm:$0xff]  ;;  %v2734_v63 = vld [vmem:[%s5163_s8 + $0x658] sm:$0xff] }
 0x9d6   : > { %v2213_v9 = vpop.f32.mrf.mxu1  ;;  %v2290_v41 = vpop.f32.mrf.mxu0  ;;  %v2766_v1 = vld [vmem:[%s5163_s8 + $0x758] sm:$0xff] }
 0x9d7   : > { %v2214_v10 = vadd.f32 %v2213_v9, %v2132_v59  ;;  %v2291_v43 = vadd.f32 %v2290_v41, %v2140_v60  ;;  %v2299_v17 = vmax.f32 %v2212_v6, 0.0  ;;  %v2301_v19 = vmax.f32 %v2289_v8, 0.0  ;;  %v2749_v6 = vld [vmem:[%s5163_s8 + $0x6d0] sm:$0xff] }
 0x9d8   : > { %v2217_v12 = vpop.f32.mrf.mxu1  ;;  %v2294_v13 = vpop.f32.mrf.mxu0  ;;  %v2781_v8 = vld [vmem:[%s5163_s8 + $0x7d0] sm:$0xff] }
 0x9d9   : > { %v2300_v15 = vmax.f32 %v2214_v10, 0.0  ;;  %v2302_v16 = vmax.f32 %v2291_v43, 0.0  ;;  %v2218_v20 = vadd.f32 %v2217_v12, %v2128_v56  ;;  %v2295_v26 = vadd.f32 %v2294_v13, %v2136_v38  ;;  %v2783_v56 = vld [vmem:[%s5163_s8 + $0x7e0] sm:$0xff]  ;;  %v2733_v9 = vld [vmem:[%s5163_s8 + $0x650] sm:$0xff]  ;;  %v2748_v10 = vld [vmem:[%s5163_s8 + $0x6c8] sm:$0xff] }
 0x9da   : > { %v2219_v21 = vpop.f32.mrf.mxu1  ;;  %v2296_v23 = vpop.f32.mrf.mxu0  ;;  %v2735_v38 = vld [vmem:[%s5163_s8 + $0x660] sm:$0xff]  ;;  %v2765_v41 = vld [vmem:[%s5163_s8 + $0x750] sm:$0xff]  ;;  %v2780_v43 = vld [vmem:[%s5163_s8 + $0x7c8] sm:$0xff] }
 0x9db   : > { %v2220_v27 = vadd.f32 %v2219_v21, %v2132_v59  ;;  %v2297_v4 = vadd.f32 %v2296_v23, %v2140_v60  ;;  %2435 = vmatprep.mubr.f32.mxu1 %v2300_v15  ;;  %2510 = vmatprep.mubr.f32.mxu0 %v2302_v16  ;;  %v2303_v32 = vmax.f32 %v2218_v20, 0.0  ;;  %v2305_v33 = vmax.f32 %v2295_v26, 0.0  ;;  %v2750_v59 = vld [vmem:[%s5163_s8 + $0x6d8] sm:$0xff]  ;;  %v2732_v12 = vld [vmem:[%s5163_s8 + $0x648] sm:$0xff]  ;;  %v2747_v15 = vld [vmem:[%s5163_s8 + $0x6c0] sm:$0xff] }
 0x9dc   : > { %2436 = vmatmul.mubr.f32.vlgmr.msra.gmra.mxu1 %v2299_v17  ;;  %2511 = vmatmul.mubr.f32.vlgmr.msra.gmra.mxu0 %v2301_v19  ;;  %v2782_v60 = vld [vmem:[%s5163_s8 + $0x7d8] sm:$0xff]  ;;  %v2764_v13 = vld [vmem:[%s5163_s8 + $0x748] sm:$0xff]  ;;  %v2779_v16 = vld [vmem:[%s5163_s8 + $0x7c0] sm:$0xff] }
 0x9dd   : > { %v2304_v30 = vmax.f32 %v2220_v27, 0.0  ;;  %v2306_v0 = vmax.f32 %v2297_v4, 0.0  ;;  %2586 = vmatpush1.msra.mxu1 %v2535_v24  ;;  %2663 = vmatpush1.msra.mxu0 %v2537_v25  ;;  %v2731_v17 = vld [vmem:[%s5163_s8 + $0x640] sm:$0xff]  ;;  %v2746_v20 = vld [vmem:[%s5163_s8 + $0x6b8] sm:$0xff]  ;;  %v2745_v25 = vld [vmem:[%s5163_s8 + $0x6b0] sm:$0xff] }
 0x9de   : > { %2587 = vmatprep.subr.mxu1 %v2532_v28  ;;  %2664 = vmatprep.subr.mxu0 %v2534_v29  ;;  %v2763_v19 = vld [vmem:[%s5163_s8 + $0x740] sm:$0xff]  ;;  %v2778_v21 = vld [vmem:[%s5163_s8 + $0x7b8] sm:$0xff]  ;;  %v2777_v26 = vld [vmem:[%s5163_s8 + $0x7b0] sm:$0xff] }
 0x9df   : > { %2440 = vmatprep.mubr.f32.mxu1 %v2304_v30  ;;  %2515 = vmatprep.mubr.f32.mxu0 %v2306_v0  ;;  %v2730_v23 = vld [vmem:[%s5163_s8 + $0x638] sm:$0xff]  ;;  %v2729_v27 = vld [vmem:[%s5163_s8 + $0x630] sm:$0xff]  ;;  %v2744_v28 = vld [vmem:[%s5163_s8 + $0x6a8] sm:$0xff] }
 0x9e0   : > { %2588 = vmatpush1.msra.mxu1 %v2531_v31  ;;  %2665 = vmatpush1.msra.mxu0 %v2533_v5  ;;  %v2762_v24 = vld [vmem:[%s5163_s8 + $0x738] sm:$0xff]  ;;  %v2761_v4 = vld [vmem:[%s5163_s8 + $0x730] sm:$0xff]  ;;  %v2776_v29 = vld [vmem:[%s5163_s8 + $0x7a8] sm:$0xff] }
 0x9e1   : > { %2441 = vmatmul.mubr.f32.gmra.mxu1 %v2303_v32  ;;  %2516 = vmatmul.mubr.f32.gmra.mxu0 %v2305_v33  ;;  %v2728_v30 = vld [vmem:[%s5163_s8 + $0x628] sm:$0xff]  ;;  %v2743_v31 = vld [vmem:[%s5163_s8 + $0x6a0] sm:$0xff] }
 0x9e2   : > { %2589 = vmatprep.subr.mxu1 %v2528_v36  ;;  %2666 = vmatprep.subr.mxu0 %v2530_v37  ;;  %v2760_v0 = vld [vmem:[%s5163_s8 + $0x728] sm:$0xff]  ;;  %v2775_v5 = vld [vmem:[%s5163_s8 + $0x7a0] sm:$0xff]  ;;  %v2742_v36 = vld [vmem:[%s5163_s8 + $0x698] sm:$0xff] }
 0x9e3   : > { %2590 = vmatpush1.msra.mxu1 %v2527_v40  ;;  %2667 = vmatpush1.msra.mxu0 %v2529_v45  ;;  %v2727_v32 = vld [vmem:[%s5163_s8 + $0x620] sm:$0xff]  ;;  %v2774_v37 = vld [vmem:[%s5163_s8 + $0x798] sm:$0xff] }
 0x9e4   : > { %2591 = vmatprep.subr.mxu1 %v2524_v46  ;;  %2668 = vmatprep.subr.mxu0 %v2526_v34  ;;  %v2759_v33 = vld [vmem:[%s5163_s8 + $0x720] sm:$0xff]  ;;  %v2726_v40 = vld [vmem:[%s5163_s8 + $0x618] sm:$0xff]  ;;  %v2741_v46 = vld [vmem:[%s5163_s8 + $0x690] sm:$0xff] }
 0x9e5   : > { %2592 = vmatpush1.msra.mxu1 %v2523_v35  ;;  %2625 = vmatprep.mubr.f32.mxu1 %v3657_v51  ;;  %v2758_v45 = vld [vmem:[%s5163_s8 + $0x718] sm:$0xff]  ;;  %v2773_v34 = vld [vmem:[%s5163_s8 + $0x790] sm:$0xff] }
 0x9e6   : > { %2669 = vmatpush1.msra.mxu0 %v2525_v47  ;;  %2702 = vmatprep.mubr.f32.mxu0 %v3657_v51  ;;  %v2725_v35 = vld [vmem:[%s5163_s8 + $0x610] sm:$0xff] }
 0x9e7   : > { %3100 = vmatmul.mubr.msk.f32.vlgmr.msra.gmra.mxu1 %vm435_vm0, %v4073_v7  ;;  %3102 = vmatmul.mubr.msk.f32.vlgmr.msra.gmra.mxu0 %vm435_vm0, %v4073_v7  ;;  %v2785_v7 = vld [vmem:[%s5163_s8 + $0x7f0] sm:$0xff] }
 0x9e8   : > { %2631 = vmatprep.mubr.f32.mxu1 %v3657_v51  ;;  %2708 = vmatprep.mubr.f32.mxu0 %v3657_v51  ;;  %v2769_v51 = vld [vmem:[%s5163_s8 + $0x770] sm:$0xff] }
 0x9e9   : > { %3373 = vmatprep.subr.mxu1 %v2754_v48  ;;  %3411 = vmatprep.subr.mxu0 %v2786_v49  ;;  %v2757_v47 = vld [vmem:[%s5163_s8 + $0x710] sm:$0xff]  ;;  %v2740_v48 = vld [vmem:[%s5163_s8 + $0x688] sm:$0xff] }
 0x9ea   : > { %3374 = vmatpush3.msra.mxu1 %v2738_v50  ;;  %3412 = vmatpush3.msra.mxu0 %v2770_v52  ;;  %v2772_v49 = vld [vmem:[%s5163_s8 + $0x788] sm:$0xff] }
 0x9eb   : > { %3101 = vmatmul.mubr.msk.f32.gmra.mxu1 %vm435_vm0, %v4097_v14  ;;  %3103 = vmatmul.mubr.msk.f32.gmra.mxu0 %vm435_vm0, %v4097_v14  ;;  %v2751_v14 = vld [vmem:[%s5163_s8 + $0x6e0] sm:$0xff]  ;;  %v2724_v50 = vld [vmem:[%s5163_s8 + $0x608] sm:$0xff] }
 0x9ec   : > { %3375 = vmatprep.subr.mxu1 %v2753_v42  ;;  %3413 = vmatprep.subr.mxu0 %v2785_v7  ;;  %v2756_v52 = vld [vmem:[%s5163_s8 + $0x708] sm:$0xff]  ;;  %v2739_v42 = vld [vmem:[%s5163_s8 + $0x680] sm:$0xff] }
 0x9ed   : > { %3376 = vmatpush3.msra.mxu1 %v2737_v3  ;;  %3414 = vmatpush3.msra.mxu0 %v2769_v51  ;;  %v2771_v7 = vld [vmem:[%s5163_s8 + $0x780] sm:$0xff] }
 0x9ee   : > { %3377 = vmatprep.subr.mxu1 %v2752_v11  ;;  %3415 = vmatprep.subr.mxu0 %v2784_v53  ;;  %v2723_v3 = vld [vmem:[%s5163_s8 + $0x600] sm:$0xff] }
 0x9ef   : > { %3378 = vmatpush3.msra.mxu1 %v2736_v54  ;;  %3416 = vmatpush3.msra.mxu0 %v2768_v55  ;;  %v2755_v51 = vld [vmem:[%s5163_s8 + $0x700] sm:$0xff] }
 0x9f0   : > { %3379 = vmatprep.subr.mxu1 %v2751_v14  ;;  %3417 = vmatprep.subr.mxu0 %v2783_v56 }
 0x9f1   : > { %3380 = vmatpush3.msra.mxu1 %v2735_v38  ;;  %3418 = vmatpush3.msra.mxu0 %v2767_v39 }
 0x9f2   : > { %3381 = vmatprep.subr.mxu1 %v2750_v59  ;;  %3419 = vmatprep.subr.mxu0 %v2782_v60  ;;  %v2539_v60 = vld [vmem:[%s5158_s3 + $0xc] sm:$0xf] }
 0x9f3   : > { %3382 = vmatpush3.msra.mxu1 %v2734_v63  ;;  %3420 = vmatpush3.msra.mxu0 %v2766_v1 }
 0x9f4   : > { %3383 = vmatprep.subr.mxu1 %v2749_v6  ;;  %3421 = vmatprep.subr.mxu0 %v2781_v8 }
 0x9f5   : > { %3384 = vmatpush3.msra.mxu1 %v2733_v9  ;;  %3422 = vmatpush3.msra.mxu0 %v2765_v41  ;;  %v2544_v41 = vrot.slane %v2539_v60, %v3854_v57 }
 0x9f6   : > { %3385 = vmatprep.subr.mxu1 %v2748_v10  ;;  %3423 = vmatprep.subr.mxu0 %v2780_v43  ;;  %v2552_v10 = vrot.slane %v2539_v60, %v4064_v61 }
 0x9f7   : > { %3386 = vmatpush3.msra.mxu1 %v2732_v12  ;;  %3424 = vmatpush3.msra.mxu0 %v2764_v13  ;;  %v2548_v12 = vrot.slane %v2539_v60, %v3857_v58  ;;  %v2556_v13 = vrot.slane %v2539_v60, %v4067_v62 }
 0x9f8   : > { %3387 = vmatprep.subr.mxu1 %v2747_v15  ;;  %3425 = vmatprep.subr.mxu0 %v2779_v16 }
 0x9f9   : > { %3388 = vmatpush3.msra.mxu1 %v2731_v17  ;;  %3426 = vmatpush3.msra.mxu0 %v2763_v19 }
 0x9fa   : > { %3389 = vmatprep.subr.mxu1 %v2746_v20  ;;  %3427 = vmatprep.subr.mxu0 %v2778_v21 }
 0x9fb   : > { %3390 = vmatpush3.msra.mxu1 %v2730_v23  ;;  %3428 = vmatpush3.msra.mxu0 %v2762_v24 }
 0x9fc   : > { %3391 = vmatprep.subr.mxu1 %v2745_v25  ;;  %3429 = vmatprep.subr.mxu0 %v2777_v26 }
 0x9fd   : > { %3392 = vmatpush3.msra.mxu1 %v2729_v27  ;;  %3430 = vmatpush3.msra.mxu0 %v2761_v4 }
 0x9fe   : > { %3393 = vmatprep.subr.mxu1 %v2744_v28  ;;  %3431 = vmatprep.subr.mxu0 %v2776_v29 }
 0x9ff   : > { %3394 = vmatpush3.msra.mxu1 %v2728_v30  ;;  %3432 = vmatpush3.msra.mxu0 %v2760_v0 }
 0xa00   : > { %3395 = vmatprep.subr.mxu1 %v2743_v31  ;;  %3433 = vmatprep.subr.mxu0 %v2775_v5 }
 0xa01   : > { %3396 = vmatpush3.msra.mxu1 %v2727_v32  ;;  %3434 = vmatpush3.msra.mxu0 %v2759_v33 }
 0xa02   : > { %3397 = vmatprep.subr.mxu1 %v2742_v36  ;;  %3435 = vmatprep.subr.mxu0 %v2774_v37 }
 0xa03   : > { %3398 = vmatpush3.msra.mxu1 %v2726_v40  ;;  %3436 = vmatpush3.msra.mxu0 %v2758_v45 }
 0xa04   : > { %3399 = vmatprep.subr.mxu1 %v2741_v46  ;;  %3437 = vmatprep.subr.mxu0 %v2773_v34 }
 0xa05   : > { %3400 = vmatpush3.msra.mxu1 %v2725_v35  ;;  %3438 = vmatpush3.msra.mxu0 %v2757_v47 }
 0xa06   : > { %3401 = vmatprep.subr.mxu1 %v2740_v48  ;;  %3439 = vmatprep.subr.mxu0 %v2772_v49  ;;  %v3104_v48 = vld [vmem:[%s5157_s2 + $0x8] ss:$0 sm:$0xff] }
 0xa07   : > { %3402 = vmatpush3.msra.mxu1 %v2724_v50  ;;  %3440 = vmatpush3.msra.mxu0 %v2756_v52 }
 0xa08   : > { %3403 = vmatprep.subr.mxu1 %v2739_v42  ;;  %3441 = vmatprep.subr.mxu0 %v2771_v7 }
 0xa09   : > { %3404 = vmatpush3.msra.mxu1 %v2723_v3  ;;  %3442 = vmatpush3.msra.mxu0 %v2755_v51 }
 0xa9c   : > { %v3329_v11 = vpop.f32.mrf.mxu1  ;;  %v3367_v53 = vpop.f32.mrf.mxu0 }
 0xa9e   : > { %v3330_v54 = vpop.f32.mrf.mxu1  ;;  %v3368_v55 = vpop.f32.mrf.mxu0 }
 0xa9f   : > { %v3331_v14 = vadd.f32 %v3330_v54, %v3329_v11  ;;  %v3369_v56 = vadd.f32 %v3368_v55, %v3367_v53 }
 0xaa1   : > { %v2513_v38 = vadd.f32 %v3369_v56, %v3331_v14  ;;  %v3332_v39 = vpop.f32.mrf.mxu1  ;;  %v3370_v59 = vpop.f32.mrf.mxu0 }
 0xaa3   : > { %v2521_v63 = vadd.f32 %v2513_v38, %v4829_v44  ;;  %v3333_v1 = vpop.f32.mrf.mxu1  ;;  %v3371_v6 = vpop.f32.mrf.mxu0 }
 0xaa4   : > { %v3334_v8 = vadd.f32 %v3333_v1, %v3332_v39  ;;  %v3372_v9 = vadd.f32 %v3371_v6, %v3370_v59 }
 0xaa6   : > { %v2518_v43 = vadd.f32 %v3372_v9, %v3334_v8 }
 0xaa7   : > { %v2627_v15 = vpop.f32.mrf.mxu1  ;;  %v2704_v16 = vpop.f32.mrf.mxu0 }
 0xaa8   : > { %v2522_v17 = vadd.f32 %v2518_v43, %v4838_v2  ;;  %v2628_v19 = vadd.f32 %v2627_v15, %v2544_v41  ;;  %v2705_v20 = vadd.f32 %v2704_v16, %v2552_v10 }
 0xaa9   : > { %v2629_v44 = vpop.f32.mrf.mxu1  ;;  %v2706_v21 = vpop.f32.mrf.mxu0 }
 0xaaa   : > { %v2630_v23 = vadd.f32 %v2629_v44, %v2548_v12  ;;  %v2707_v24 = vadd.f32 %v2706_v21, %v2556_v13  ;;  %v2715_v61 = vmax.f32 %v2628_v19, 0.0  ;;  %v2717_v4 = vmax.f32 %v2705_v20, 0.0 }
 0xaab   : > { %v2633_v25 = vpop.f32.mrf.mxu1  ;;  %v2710_v26 = vpop.f32.mrf.mxu0 }
 0xaac   : > { %v2716_v57 = vmax.f32 %v2630_v23, 0.0  ;;  %v2718_v27 = vmax.f32 %v2707_v24, 0.0  ;;  %v2634_v28 = vadd.f32 %v2633_v25, %v2544_v41  ;;  %v2711_v58 = vadd.f32 %v2710_v26, %v2552_v10 }
 0xaad   : > { %v2635_v29 = vpop.f32.mrf.mxu1  ;;  %v2712_v62 = vpop.f32.mrf.mxu0 }
 0xaae   : > { %v2636_v30 = vadd.f32 %v2635_v29, %v2548_v12  ;;  %v2713_v0 = vadd.f32 %v2712_v62, %v2556_v13  ;;  %2851 = vmatprep.mubr.f32.mxu1 %v2716_v57  ;;  %2926 = vmatprep.mubr.f32.mxu0 %v2718_v27  ;;  %v2719_v5 = vmax.f32 %v2634_v28, 0.0  ;;  %v2721_v32 = vmax.f32 %v2711_v58, 0.0 }
 0xaaf   : > { %2852 = vmatmul.mubr.f32.vlgmr.msra.gmra.mxu1 %v2715_v61  ;;  %2927 = vmatmul.mubr.f32.vlgmr.msra.gmra.mxu0 %v2717_v4 }
 0xab0   : > { %v2720_v2 = vmax.f32 %v2636_v30, 0.0  ;;  %v2722_v31 = vmax.f32 %v2713_v0, 0.0 }
 0xab2   : > { %2856 = vmatprep.mubr.f32.mxu1 %v2720_v2  ;;  %2931 = vmatprep.mubr.f32.mxu0 %v2722_v31 }
 0xab3   : > { %2857 = vmatmul.mubr.f32.gmra.mxu1 %v2719_v5  ;;  %2932 = vmatmul.mubr.f32.gmra.mxu0 %v2721_v32 }
 0xb6f   : > { %v3405_v33 = vpop.f32.mrf.mxu1  ;;  %v3443_v36 = vpop.f32.mrf.mxu0 }
 0xb71   : > { %v3406_v37 = vpop.f32.mrf.mxu1  ;;  %v3444_v40 = vpop.f32.mrf.mxu0 }
 0xb72   : > { %v3407_v45 = vadd.f32 %v3406_v37, %v3405_v33  ;;  %v3445_v46 = vadd.f32 %v3444_v40, %v3443_v36 }
 0xb73   : > { %v3408_v34 = vpop.f32.mrf.mxu1  ;;  %v3446_v35 = vpop.f32.mrf.mxu0 }
 0xb74   : > { %v2929_v47 = vadd.f32 %v3445_v46, %v3407_v45 }
 0xb75   : > { %v3409_v49 = vpop.f32.mrf.mxu1  ;;  %v3447_v50 = vpop.f32.mrf.mxu0 }
 0xb76   : > { %v2937_v52 = vadd.f32 %v2929_v47, %v2521_v63  ;;  %v3410_v42 = vadd.f32 %v3409_v49, %v3408_v34  ;;  %v3448_v7 = vadd.f32 %v3447_v50, %v3446_v35 }
 0xb78   : > { %v2943_v3 = vadd.f32 %v3104_v48, %v2937_v52  ;;  %v2934_v51 = vadd.f32 %v3448_v7, %v3410_v42 }
 0xb7a   : > { %v2945_v11 = vadd.f32 %v2943_v3, %v3996_v18  ;;  %v2938_v53 = vadd.f32 %v2934_v51, %v2522_v17 }
 0xb7c   : > { %2947 = vst.msk [vmem:[%s428_s22] sm:$0xff] %vm435_vm0, %v2945_v11  ;;  %v2944_v54 = vadd.f32 %v3104_v48, %v2938_v53 }
 0xb7e   : > { %v2946_v55 = vadd.f32 %v2944_v54, %v4001_v22 }
 0xb80   : > { %2948 = vst.msk [vmem:[%s428_s22 + $0x8] sm:$0xff] %vm435_vm0, %v2946_v55 }
 0xb81   : > { %3605 = shalt.err (!%p3602_p5)
}
 0xb82   : > { %s3606_s19 = scalar_lea.hbm %s5108_s28, 256  ;;  %s3610_s25 = scalar_lea.hbm %s5164_s9, 512 }
 0xb83   : > { %p3607_p7 = scmp.ne.s32.totalorder %s5108_s28, %s3606_s19  ;;  %p3611_p12 = scmp.lt.s32.totalorder %s5108_s28, %s5164_s9 }
 0xb84   : > { %p3612_p13 = scmp.lt.s32.totalorder %s3610_s25, %s3606_s19 }
 0xb85   : > { %p3608_p10 = pnand %p3607_p7, %p3754_p6 }
 0xb86   : > { %p3613_p0 = por %p3612_p13, %p3611_p12 }
 0xb87   : > { %p3609_p11 = pneg %p3608_p10 }
 0xb89   : > { %p3614_p1 = pnand %p3613_p0, %p3609_p11 }
 0xb8b   : > { %3617 = shalt.err (!%p3614_p1)
}
 0xb8c   : > { %s3659_s29 = smov 128   ;;  %s3660_s14 = smov 256  }
 0xb8d   : > { %s3661_s16 = smov 8  }
 0xb8e   : > { %3514 = dma.vmem_to_hbm [thread:$0]  (%p3754_p6), %s5102_s23, 256, %s5108_s28, %s5114_s24, %s3659_s29, %s3660_s14, %s3661_s16  }
 0xb8f PF: > { %s2977_s17 = sand.u32 1, %s3640_s30   ;;  %p3517_p2 = pnand %p3050_p9, %p3758_p8 }
 0xb90   : > { %s2978_s19 = scalar_lea.sflag [#allocation6], %s2977_s17 }
 0xb91   : > { %p3518_p3 = pneg %p3517_p2 }
 0xb93   : > { %3635 = dma.done.wait (%p3518_p3), %s2978_s19, 256  }
 0xb94   : > { %3637 = vsyncadd (%p3518_p3), %s2978_s19, 4294967040  ;;  %p19_p4 = scmp.ge.s32.totalorder %s3735_s15, 4   ;;  %s5178_s30 = smov %s3644_s10 }
 0xb95   : > { %s5179_s10 = smov %s3648_s11  ;;  %s5180_s11 = smov %s3748_s18 }
 0xb96   : > { %s5181_s12 = smov %s3735_s15  ;;  %21 = sbr.rel (!%p19_p4) target bundleno = 3 (0x3), region = 180 }
 0xb9b   :  { %2983 = vsyncpa [#allocation6], 1 }
 0xb9c   :  { %2985 = vsyncpa [#allocation6 + $0x1], 1 }

// kernel: tpu_custom_call.1
= control target key start
LH: loop header
LB: loop body
LE: loop exit
PB: predicated region body
PF: predicated region fallthrough
CT: control target
= control target key end

     0   :  { %14 = vsyncpa [#allocation6], 0  ;;  %s5155_s0 = inlined_call_operand.vmem [shape: f32[2,16,32], index: 0, kind: input, shape index: {}]   ;;  %s5156_s1 = inlined_call_operand.vmem [shape: f32[2,16,32], index: 1, kind: input, shape index: {}]   ;;  %s5157_s2 = inlined_call_operand.vmem [shape: f32[9,32], index: 2, kind: input, shape index: {}]   ;;  %s5158_s3 = inlined_call_operand.vmem [shape: f32[1,2048], index: 3, kind: input, shape index: {}]   ;;  %s5159_s4 = inlined_call_operand.vmem [shape: f32[32,32], index: 4, kind: input, shape index: {}]   ;;  %s5160_s5 = inlined_call_operand.vmem [shape: f32[32,64], index: 5, kind: input, shape index: {}]   ;;  %s5161_s6 = inlined_call_operand.vmem [shape: f32[32,32], index: 6, kind: input, shape index: {}]   ;;  %s5162_s7 = inlined_call_operand.vmem [shape: f32[32,2048], index: 7, kind: input, shape index: {}]   ;;  %s5163_s8 = inlined_call_operand.vmem [shape: f32[2048,32], index: 8, kind: input, shape index: {}]   ;;  %s5164_s9 = inlined_call_operand.hbm [shape: f32[2,16,32], index: 9, kind: output, shape index: {}]  }
   0x1   :  { %16 = vsyncpa [#allocation6 + $0x1], 0  ;;  %s3712_s30 = smov 0   ;;  %s3714_s10 = smov 0  }
   0x2   :  { %s3716_s11 = smov 0   ;;  %s3718_s12 = smov 0  }
   0x3 LB: > { %s5165_s13 = sadd.s32 4294967295, %s3652_s12   ;;  %s3048_s14 = sadd.s32 4294967294, %s3652_s12   ;;  %s3652_s12 = sphi %s3718_s12, %s5181_s12   ;;  %s3648_s11 = sphi %s3716_s11, %s5180_s11   ;;  %s3644_s10 = sphi %s3714_s10, %s5179_s10   ;;  %s3640_s30 = sphi %s3712_s30, %s5178_s30  }
   0x4   : > { %s3735_s15 = sadd.s32 1, %s3652_s12   ;;  %s29_s16 = sadd.s32 1, %s3648_s11 }
   0x5   : > { %s26_s17 = ssub.s32 %s3652_s12, %s3735_s15  ;;  %p36_p0 = scmp.ne.s32.totalorder %s3648_s11, %s3644_s10 }
   0x6   : > { %p27_p1 = scmp.eq.s32.totalorder %s26_s17, 0  ;;  %p37_p2 = scmp.eq.s32.totalorder %s3652_s12, 0 }
   0x7   : > { %p239_p3 = scmp.eq.s32.totalorder %s5165_s13, 1  ;;  %p244_p4 = scmp.ne.s32.totalorder %s3644_s10, %s3640_s30 }
   0x8   : > { %s3748_s18 = scalar_select %p27_p1, %s3648_s11, %s29_s16  }
   0x9   : > { %p3750_p5 = por %p37_p2, %p36_p0  ;;  %p3754_p6 = por %p239_p3, %p36_p0 }
   0xa   : > { %p245_p7 = scmp.eq.s32.totalorder %s3048_s14, 1  ;;  %p3050_p9 = scmp.ge.s32.totalorder %s3652_s12, 2 }
   0xc   : > { %p3758_p8 = por %p245_p7, %p244_p4  ;;  %282 = sbr.rel (%p3050_p9) target bundleno = 27 (0x1b), region = 44 }
  0x11   : > { %285 = sbr.rel (!%p3750_p5) target bundleno = 22 (0x16), region = 48  ;;  %s287_s22 = sand.u32 (%p3750_p5), 1, %s3648_s11  }
  0x12   : > { %s3052_s23 = sshll.u32 (%p3750_p5), %s3652_s12, 3  ;;  %s3051_s24 = sshll.u32 (%p3750_p5), %s287_s22, 4 }
  0x13   : > { %s291_s27 = scalar_lea.vmem (%p3750_p5), %s5155_s0, %s3052_s23  ;;  %s289_s28 = scalar_lea.vmem (%p3750_p5), [#allocation3], %s3051_s24 }
  0x14   : > { %v322_v0 = vld [vmem:[%s291_s27] sm:$0xff] (%p3750_p5)  ;;  %v324_v1 = vld [vmem:[%s291_s27 + $0x10] sm:$0xff] (%p3750_p5) }
  0x15   : > { %323 = vst [vmem:[%s289_s28] sm:$0xff] (%p3750_p5), %v322_v0  ;;  %325 = vst [vmem:[%s289_s28 + $0x8] sm:$0xff] (%p3750_p5), %v324_v1 }
  0x16 PF: > { %331 = sbr.rel (!%p3750_p5) target bundleno = 27 (0x1b), region = 86  ;;  %s333_s29 = sand.u32 (%p3750_p5), 1, %s3648_s11  }
  0x17   : > { %s3054_s14 = sshll.u32 (%p3750_p5), %s3652_s12, 3  ;;  %s3053_s16 = sshll.u32 (%p3750_p5), %s333_s29, 4 }
  0x18   : > { %s337_s13 = scalar_lea.vmem (%p3750_p5), %s5156_s1, %s3054_s14  ;;  %s335_s23 = scalar_lea.vmem (%p3750_p5), [#allocation4], %s3053_s16 }
  0x19   : > { %v368_v2 = vld [vmem:[%s337_s13] sm:$0xff] (%p3750_p5)  ;;  %v370_v3 = vld [vmem:[%s337_s13 + $0x10] sm:$0xff] (%p3750_p5) }
  0x1a   : > { %369 = vst [vmem:[%s335_s23] sm:$0xff] (%p3750_p5), %v368_v2  ;;  %371 = vst [vmem:[%s335_s23 + $0x8] sm:$0xff] (%p3750_p5), %v370_v3 }
  0x1b PF: > { %p3055_p10 = scmp.ge.s32.totalorder %s3652_s12, 1  ;;  %p376_p11 = scmp.lt.s32.totalorder %s3652_s12, 3 }
  0x1d   : > { %p377_p12 = pnand %p3055_p10, %p376_p11 }
  0x1e   : > { %s383_s19 = sand.u32 (!%p377_p12), 1, %s3644_s10   ;;  %s3654_s22 = smov (!%p377_p12), 32  }
  0x1f   : > { %380 = sbr.rel (%p377_p12) target bundleno = 2959 (0xb8f), region = 124  ;;  %s3784_s24 = sshll.u32 (!%p377_p12), %s383_s19, 4 }
  0x20   : > { %s385_s13 = scalar_lea.vmem (!%p377_p12), [#allocation3], %s3784_s24  ;;  %s392_s25 = scalar_lea.vmem (!%p377_p12), [#allocation4], %s3784_s24 }
  0x21   : > { %s3656_s23 = smov (!%p377_p12), 96   ;;  %s3658_s14 = smov (!%p377_p12), [#allocation5]  }
  0x22   : > { %s3596_s16 = sshll.u32 (!%p377_p12), %s3658_s14, 4  ;;  %s3597_s16 = int_to_ptr.vmem [resolvable:$false] %s3596_s16 }
  0x23   : > { %s3598_s17 = scalar_lea.vmem (!%p377_p12), %s3597_s16, 512 }
  0x24   : > { %vm435_vm0 = vcmask 261120   ;;  %v3787_v4 = vld [vmem:[%s385_s13] sm:$0xff]  ;;  %v3789_v5 = vld [vmem:[%s385_s13 + $0x8] sm:$0xff]  ;;  %v463_v38 = vlaneseq  ;;  %vm840_vm15 = vcmask 1043456   ;;  %s5177_s13 = sadd.s32 4294967295, %s3652_s12  }
  0x25   : > { %v436_v6 = vsel %vm435_vm0, %v3787_v4, 0.0  ;;  %v439_v7 = vsel %vm435_vm0, %v3789_v5, 0.0  ;;  %v431_v8 = vld [vmem:[%s392_s25] sm:$0xff]  ;;  %v432_v9 = vld [vmem:[%s392_s25 + $0x8] sm:$0xff]  ;;  %s3106_s25 = sshll.u32 %s5177_s13, 7 }
  0x26   : > { %437 = vadd.xlane.f32.xlu0 %v436_v6  ;;  %440 = vadd.xlane.f32.xlu1 %v439_v7  ;;  %v475_v10 = vsel %vm435_vm0, %v431_v8, 0.0  ;;  %v478_v11 = vsel %vm435_vm0, %v432_v9, 0.0  ;;  %v508_v32 = vld [vmem:[%s5159_s4 + $0x18] sm:$0xff]  ;;  %v507_v33 = vld [vmem:[%s5159_s4 + $0x10] sm:$0xff]  ;;  %v506_v34 = vld [vmem:[%s5159_s4 + $0x8] sm:$0xff]  ;;  %v3844_v41 = vshrl.u32 %v463_v38, 7  ;;  %s5108_s28 = scalar_lea.hbm %s5164_s9, %s3106_s25 }
  0x27   : > { %3449 = vmatprep.subr.mxu0 %v508_v32  ;;  %v597_v35 = vld [vmem:[%s5160_s5 + $0x18] sm:$0xff]  ;;  %v505_v36 = vld [vmem:[%s5159_s4] sm:$0xff]  ;;  %v596_v37 = vld [vmem:[%s5160_s5 + $0x10] sm:$0xff] }
  0x28   : > { %3450 = vmatpush3.msra.mxu0 %v508_v32  ;;  %3460 = vmatprep.subr.mxu1 %v597_v35  ;;  %v595_v39 = vld [vmem:[%s5160_s5 + $0x8] sm:$0xff]  ;;  %v594_v40 = vld [vmem:[%s5160_s5] sm:$0xff]  ;;  %v687_v42 = vsub.s32 6, %v3844_v41  ;;  %v3854_v57 = vsub.s32 0, %v3844_v41  ;;  %v3857_v58 = vsub.s32 1, %v3844_v41 }
  0x29   : > { %3451 = vmatprep.subr.mxu0 %v507_v33  ;;  %3461 = vmatpush3.msra.mxu1 %v597_v35  ;;  %v3850_v43 = vld [vmem:[%s5157_s2] sm:$0xff] }
  0x2a   : > { %476 = vadd.xlane.f32.xlu0 %v475_v10  ;;  %479 = vadd.xlane.f32.xlu1 %v478_v11  ;;  %v688_v44 = vrot.slane %v3850_v43, %v687_v42  ;;  %v466_v59 = vrot.slane %v3850_v43, %v3854_v57  ;;  %v472_v62 = vrot.slane %v3850_v43, %v3857_v58 }
  0x2b   : > { %3452 = vmatpush3.msra.mxu0 %v507_v33  ;;  %3462 = vmatprep.subr.mxu1 %v596_v37 }
  0x2c   : > { %3453 = vmatprep.subr.mxu0 %v506_v34  ;;  %3463 = vmatpush3.msra.mxu1 %v596_v37 }
  0x2d   : > { %3454 = vmatpush3.msra.mxu0 %v506_v34  ;;  %3464 = vmatprep.subr.mxu1 %v595_v39 }
  0x2e   : > { %3455 = vmatprep.subr.mxu0 %v505_v36  ;;  %3465 = vmatpush3.msra.mxu1 %v595_v39 }
  0x2f   : > { %3456 = vmatpush3.msra.mxu0 %v505_v36  ;;  %3466 = vmatprep.subr.mxu1 %v594_v40 }
  0x30   : > { %3467 = vmatpush3.msra.mxu1 %v594_v40 }
  0xaf   : > { %v438_v12 = vpop.xlane.xlu0 %437  ;;  %v441_v13 = vpop.xlane.xlu1 %440 }
  0xb0   : > { %v443_v14 = vmul.f32 0.03125, %v438_v12  ;;  %v444_v15 = vmul.f32 0.03125, %v441_v13 }
  0xb2   : > { %v3799_v16 = vsub.f32 %v3787_v4, %v443_v14  ;;  %v3802_v17 = vsub.f32 %v3789_v5, %v444_v15  ;;  %v701_v15 = vand.u32 127, %v463_v38 }
  0xb3   : > { %v477_v18 = vpop.xlane.xlu0 %476  ;;  %v480_v19 = vpop.xlane.xlu1 %479 }
  0xb4   : > { %v481_v20 = vmul.f32 0.03125, %v477_v18  ;;  %v482_v21 = vmul.f32 0.03125, %v480_v19  ;;  %v447_v22 = vmul.f32 %v3799_v16, %v3799_v16  ;;  %v448_v23 = vmul.f32 %v3802_v17, %v3802_v17 }
  0xb5   : > { %v702_v18 = vmul.u32 8, %v701_v15 }
  0xb6   : > { %v3808_v24 = vsub.f32 %v431_v8, %v481_v20  ;;  %v3810_v25 = vsub.f32 %v432_v9, %v482_v21  ;;  %v449_v26 = vsel %vm435_vm0, %v447_v22, 0.0  ;;  %v452_v27 = vsel %vm435_vm0, %v448_v23, 0.0 }
  0xb7   : > { %450 = vadd.xlane.f32.xlu0 %v449_v26  ;;  %v698_v20 = vadd.s32 16, %v3844_v41  ;;  %v3655_v22 = vmov 1.0   ;;  %v697_v23 = vadd.s32 8, %v3844_v41  ;;  %vm703_vm10 = vcmp.ge.s32.totalorder %v3844_v41, %v702_v18 }
  0xb8   : > { %v485_v28 = vmul.f32 %v3808_v24, %v3808_v24  ;;  %v486_v29 = vmul.f32 %v3810_v25, %v3810_v25 }
  0xb9   : > { %vm705_vm4 = vcmp.ge.s32.totalorder %v698_v20, %v702_v18  ;;  %vm704_vm7 = vcmp.ge.s32.totalorder %v697_v23, %v702_v18 }
  0xba   : > { %v487_v30 = vsel %vm435_vm0, %v485_v28, 0.0  ;;  %v490_v31 = vsel %vm435_vm0, %v486_v29, 0.0  ;;  %v681_v28 = vsub.s32 5, %v3844_v41 }
  0xbb   : > { %453 = vadd.xlane.f32.xlu0 %v452_v27  ;;  %488 = vadd.xlane.f32.xlu1 %v487_v30  ;;  %v511_v27 = vsub.s32 4, %v3844_v41 }
  0xbd   : > { %v512_v29 = vrot.slane %v3850_v43, %v511_v27 }
  0xbf   : > { %491 = vadd.xlane.f32.xlu1 %v490_v31  ;;  %v682_v31 = vrot.slane %v3850_v43, %v681_v28 }
  0xd1   : > { %690 = vrot.lane.b32.xlu0 %v688_v44, %s3654_s22  ;;  %s428_s22 = scalar_lea.vmem [#allocation5], %s3784_s24  ;;  %s5114_s24 = scalar_lea.sflag [#allocation6], %s383_s19 }
 0x140   : > { %v451_v45 = vpop.xlane.xlu0 %450 }
 0x141   : > { %v455_v46 = vmul.f32 0.03125, %v451_v45 }
 0x143   : > { %v457_v47 = vadd.f32 1e-05, %v455_v46 }
 0x144   : > { %v489_v48 = vpop.xlane.xlu1 %488  ;;  %v454_v49 = vpop.xlane.xlu0 %453 }
 0x145   : > { %3560 = vrsqrt.f32 %v457_v47  ;;  %v493_v50 = vmul.f32 0.03125, %v489_v48  ;;  %v456_v51 = vmul.f32 0.03125, %v454_v49  ;;  %v725_v48 = vmul.u32 8, %v3844_v41 }
 0x146   : > { %v727_v49 = vadd.s32 1, %v3844_v41 }
 0x147   : > { %v495_v52 = vadd.f32 1e-05, %v493_v50  ;;  %v458_v53 = vadd.f32 1e-05, %v456_v51  ;;  %vm726_vm13 = vcmp.ge.s32.totalorder %v701_v15, %v725_v48  ;;  %v3657_v51 = vmov 0.0  }
 0x148   : > { %v492_v54 = vpop.xlane.xlu1 %491  ;;  %v691_v36 = vpop.permute.xlu0 %690  ;;  %v728_v50 = vmul.u32 8, %v727_v49 }
 0x149   : > { %3562 = vrsqrt.f32 %v495_v52  ;;  %v494_v55 = vmul.f32 0.03125, %v492_v54 }
 0x14a   : > { %3564 = vrsqrt.f32 %v458_v53  ;;  %vm729_vm14 = vcmp.lt.s32.totalorder %v701_v15, %v728_v50 }
 0x14b   : > { %v496_v56 = vadd.f32 1e-05, %v494_v55 }
 0x14d   : > { %3566 = vrsqrt.f32 %v496_v56 }
 0x152   : > { %v3561_v60 = vpop.eup %3560 }
 0x153   : > { %v461_v61 = vmul.f32 %v3561_v60, %v3799_v16  ;;  %v707_v16 = vadd.s32 1, %v701_v15 }
 0x155   : > { %v467_v63 = vmul.f32 %v466_v59, %v461_v61  ;;  %v708_v19 = vmul.u32 8, %v707_v16 }
 0x156   : > { %v3563_v0 = vpop.eup %3562 }
 0x157   : > { %v3565_v1 = vpop.eup %3564  ;;  %v473_v2 = vadd.f32 %v472_v62, %v467_v63  ;;  %v499_v3 = vmul.f32 %v3563_v0, %v3808_v24  ;;  %vm711_vm5 = vcmp.lt.s32.totalorder %v698_v20, %v708_v19  ;;  %vm710_vm8 = vcmp.lt.s32.totalorder %v697_v23, %v708_v19 }
 0x158   : > { %v462_v6 = vmul.f32 %v3565_v1, %v3802_v17  ;;  %v699_v17 = vadd.s32 24, %v3844_v41  ;;  %vm3884_vm6 = vmand %vm705_vm4, %vm711_vm5  ;;  %vm709_vm11 = vcmp.lt.s32.totalorder %v3844_v41, %v708_v19 }
 0x159   : > { %3457 = vmatprep.mubr.msk.f32.mxu0 %vm435_vm0, %v473_v2  ;;  %v501_v7 = vmul.f32 %v499_v3, %v466_v59  ;;  %vm3894_vm9 = vmand %vm704_vm7, %vm710_vm8 }
 0x15a   : > { %v3567_v8 = vpop.eup %3566  ;;  %v468_v9 = vmul.f32 %v466_v59, %v462_v6  ;;  %vm706_vm1 = vcmp.ge.s32.totalorder %v699_v17, %v702_v18  ;;  %vm712_vm2 = vcmp.lt.s32.totalorder %v699_v17, %v708_v19  ;;  %vm3906_vm12 = vmand %vm703_vm10, %vm709_vm11 }
 0x15b   : > { %v503_v10 = vadd.f32 %v501_v7, %v472_v62  ;;  %v500_v11 = vmul.f32 %v3567_v8, %v3810_v25  ;;  %vm3873_vm3 = vmand %vm706_vm1, %vm712_vm2  ;;  %vm818_vm2 = vcmask 31744  }
 0x15c   : > { %v474_v12 = vadd.f32 %v472_v62, %v468_v9  ;;  %3471 = vmatprep.subr.msk.mxu0 %vm3873_vm3, %v3655_v22  ;;  %vm730_vm1 = vmand %vm726_vm13, %vm729_vm14 }
 0x15d   : > { %3468 = vmatprep.mubr.msk.f32.mxu1 %vm435_vm0, %v503_v10  ;;  %v502_v13 = vmul.f32 %v500_v11, %v466_v59  ;;  %v3067_v52 = vsel %vm730_vm1, 1.0, %v3657_v51 }
 0x15e   : > { %3458 = vmatmul.mubr.msk.f32.vlgmr.msra.gmra.mxu0 %vm435_vm0, %v474_v12  ;;  %3482 = vmatprep.subr.msk.mxu1 %vm840_vm15, %v3067_v52 }
 0x15f   : > { %v504_v14 = vadd.f32 %v502_v13, %v472_v62  ;;  %3472 = vmatpush3.msk.msra.mxu0 %vm3873_vm3, %v3655_v22 }
 0x160   : > { %3473 = vmatprep.subr.msk.mxu0 %vm3884_vm6, %v3655_v22 }
 0x161   : > { %3469 = vmatmul.mubr.msk.f32.vlgmr.msra.gmra.mxu1 %vm435_vm0, %v504_v14  ;;  %3474 = vmatpush3.msk.msra.mxu0 %vm3884_vm6, %v3655_v22 }
 0x162   : > { %3475 = vmatprep.subr.msk.mxu0 %vm3894_vm9, %v3655_v22  ;;  %3483 = vmatpush3.msk.msra.mxu1 %vm840_vm15, %v3067_v52 }
 0x163   : > { %3476 = vmatpush3.msk.msra.mxu0 %vm3894_vm9, %v3655_v22  ;;  %3487 = vmatprep.subr.msk.mxu1 %vm3873_vm3, %v3655_v22 }
 0x164   : > { %3477 = vmatprep.subr.msk.mxu0 %vm3906_vm12, %v3655_v22 }
 0x165   : > { %3478 = vmatpush3.msk.msra.mxu0 %vm3906_vm12, %v3655_v22 }
 0x21e   : > { %v3459_v30 = vpop.f32.mrf.mxu0 }
 0x21f   : > { %v591_v32 = vadd.f32 %v3459_v30, %v512_v29 }
 0x220   : > { %v585_v33 = vpop.f32.mrf.mxu0 }
 0x221   : > { %v3470_v34 = vpop.f32.mrf.mxu1  ;;  %v586_v38 = vadd.f32 %v585_v33, %v512_v29 }
 0x222   : > { %v684_v35 = vadd.f32 %v3470_v34, %v682_v31  ;;  %v694_v47 = vadd.f32 %v3470_v34, %v691_v36 }
 0x223   : > { %v670_v37 = vpop.f32.mrf.mxu1 }
 0x224   : > { %v934_v39 = vmul.f32 %v684_v35, %v591_v32  ;;  %v683_v40 = vadd.f32 %v682_v31, %v670_v37  ;;  %v693_v42 = vadd.f32 %v691_v36, %v670_v37  ;;  %v734_v46 = vmul.f32 %v684_v35, %v586_v38 }
 0x226   : > { %v733_v44 = vmul.f32 %v683_v40, %v586_v38  ;;  %v933_v45 = vmul.f32 %v683_v40, %v591_v32  ;;  %921 = vrot.lane.b32.xlu1 %v693_v42, %s3656_s23  ;;  %v1125_v42 = vld [vmem:[%s5161_s6 + $0x18] sm:$0xff] }
 0x227   : > { %3503 = vmatprep.subr.mxu0 %v1125_v42 }
 0x228   : > { %3479 = vmatprep.mubr.msk.f32.mxu0 %vm435_vm0, %v733_v44  ;;  %v1124_v44 = vld [vmem:[%s5161_s6 + $0x10] sm:$0xff] }
 0x229   : > { %3480 = vmatmul.mubr.msk.f32.vlgmr.msra.gmra.mxu0 %vm435_vm0, %v734_v46  ;;  %v1122_v46 = vld [vmem:[%s5161_s6] sm:$0xff] }
 0x22a   : > { %923 = vrot.lane.b32.xlu1 %v694_v47, %s3656_s23  ;;  %3504 = vmatpush3.msra.mxu0 %v1125_v42  ;;  %v1280_v42 = vld [vmem:[%s5162_s7 + $0x98] sm:$0xff]  ;;  %s2962_s23 = sshll.u32 %s428_s22, 4  ;;  %s5102_s23 = int_to_ptr.vmem [resolvable:$true] %s2962_s23 }
 0x22b   : > { %3505 = vmatprep.subr.mxu0 %v1124_v44  ;;  %s3592_s29 = scalar_lea.vmem %s5102_s23, 256  ;;  %p3599_p2 = scmp.lt.s32.totalorder %s5102_s23, %s3597_s16 }
 0x22c   : > { %3506 = vmatpush3.msra.mxu0 %v1124_v44  ;;  %v1277_v44 = vld [vmem:[%s5162_s7 + $0x80] sm:$0xff]  ;;  %p3593_p13 = scmp.ne.s32.totalorder %s5102_s23, %s3592_s29  ;;  %p3600_p3 = scmp.lt.s32.totalorder %s3598_s17, %s3592_s29 }
 0x22e   : > { %p3594_p0 = pnand %p3593_p13, %p3754_p6  ;;  %p3601_p4 = por %p3600_p3, %p3599_p2 }
 0x230   : > { %p3595_p1 = pneg %p3594_p0 }
 0x232   : > { %p3602_p5 = pnand %p3601_p4, %p3595_p1 }
 0x298   : > { %v922_v12 = vpop.permute.xlu1 %921 }
 0x29c   : > { %v924_v13 = vpop.permute.xlu1 %923 }
 0x2e9   : > { %v3481_v53 = vpop.f32.mrf.mxu0 }
 0x2ea   : > { %v817_v54 = vmul.f32 0.35355338, %v3481_v53 }
 0x2eb   : > { %v807_v55 = vpop.f32.mrf.mxu0 }
 0x2ec   : > { %v816_v56 = vmul.f32 0.35355338, %v807_v55  ;;  %v820_v59 = vsel %vm818_vm2, %v817_v54, -inf }
 0x2ee   : > { %v819_v60 = vsel %vm818_vm2, %v816_v56, -inf }
 0x2ef   : > { %v821_v61 = vmax.f32 %v819_v60, %v820_v59 }
 0x2f1   : > { %v822_v62 = vsub.f32 %v816_v56, %v821_v61  ;;  %v823_v63 = vsub.f32 %v817_v54, %v821_v61  ;;  %v1128_v56 = vsub.s32 7, %v3844_v41 }
 0x2f3   : > { %v824_v0 = vmul.f32 1.442695, %v822_v62  ;;  %v826_v1 = vmul.f32 1.442695, %v823_v63  ;;  %v1129_v59 = vrot.slane %v3850_v43, %v1128_v56 }
 0x2f5   : > { %3568 = vpow2.f32 %v824_v0 }
 0x2f6   : > { %3570 = vpow2.f32 %v826_v1 }
 0x302   : > { %v3569_v2 = vpop.eup %3568 }
 0x303   : > { %v3571_v3 = vpop.eup %3570  ;;  %v828_v6 = vsel %vm818_vm2, %v3569_v2, 0.0 }
 0x304   : > { %v829_v7 = vsel %vm818_vm2, %v3571_v3, 0.0 }
 0x305   : > { %v830_v8 = vadd.f32 %v829_v7, %v828_v6 }
 0x307   : > { %3572 = vrcp.f32 %v830_v8 }
 0x314   : > { %v3573_v9 = vpop.eup %3572 }
 0x315   : > { %v832_v10 = vmul.f32 %v3573_v9, %v3569_v2  ;;  %v833_v11 = vmul.f32 %v3573_v9, %v3571_v3 }
 0x317   : > { %3484 = vmatprep.mubr.msk.f32.mxu1 %vm818_vm2, %v832_v10 }
 0x318   : > { %3485 = vmatmul.mubr.msk.f32.vlgmr.msra.gmra.mxu1 %vm818_vm2, %v833_v11 }
 0x319   : > { %3488 = vmatpush3.msk.msra.mxu1 %vm3873_vm3, %v3655_v22  ;;  %3495 = vmatprep.mubr.msk.f32.mxu1 %vm435_vm0, %v933_v45  ;;  %v1123_v45 = vld [vmem:[%s5161_s6 + $0x8] sm:$0xff] }
 0x31a   : > { %3489 = vmatprep.subr.msk.mxu1 %vm3884_vm6, %v3655_v22  ;;  %3507 = vmatprep.subr.mxu0 %v1123_v45 }
 0x31b   : > { %3490 = vmatpush3.msk.msra.mxu1 %vm3884_vm6, %v3655_v22  ;;  %3508 = vmatpush3.msra.mxu0 %v1123_v45  ;;  %v1279_v45 = vld [vmem:[%s5162_s7 + $0x90] sm:$0xff] }
 0x31c   : > { %3491 = vmatprep.subr.msk.mxu1 %vm3894_vm9, %v3655_v22  ;;  %3509 = vmatprep.subr.mxu0 %v1122_v46 }
 0x31d   : > { %3492 = vmatpush3.msk.msra.mxu1 %vm3894_vm9, %v3655_v22  ;;  %3510 = vmatpush3.msra.mxu0 %v1122_v46  ;;  %v1274_v46 = vld [vmem:[%s5162_s7 + $0x8] sm:$0xff] }
 0x31e   : > { %3493 = vmatprep.subr.msk.mxu1 %vm3906_vm12, %v3655_v22 }
 0x31f   : > { %3494 = vmatpush3.msk.msra.mxu1 %vm3906_vm12, %v3655_v22 }
 0x320   : > { %3496 = vmatmul.mubr.msk.f32.vlgmr.msra.gmra.mxu1 %vm435_vm0, %v934_v39  ;;  %3498 = vmatprep.subr.msk.mxu1 %vm840_vm15, %v3067_v52 }
 0x321   : > { %3499 = vmatpush3.msk.msra.mxu1 %vm840_vm15, %v3067_v52 }
 0x3d8   : > { %v3486_v14 = vpop.f32.mrf.mxu1 }
 0x3d9   : > { %v928_v15 = vmul.f32 %v3486_v14, %v924_v13 }
 0x3da   : > { %v910_v16 = vpop.f32.mrf.mxu1 }
 0x3db   : > { %v927_v17 = vmul.f32 %v922_v12, %v910_v16  ;;  %v930_v18 = vsel %vm435_vm0, %v928_v15, 0.0 }
 0x3dd   : > { %v929_v19 = vsel %vm435_vm0, %v927_v17, 0.0 }
 0x3de   : > { %v931_v20 = vadd.f32 %v930_v18, %v929_v19 }
 0x3e0   : > { %932 = vst.msk [vmem:[#allocation2] sm:$0xff] %vm435_vm0, %v931_v20  ;;  %v3497_v21 = vpop.f32.mrf.mxu1 }
 0x3e1   : > { %v1017_v22 = vmul.f32 0.35355338, %v3497_v21 }
 0x3e2   : > { %v1007_v23 = vpop.f32.mrf.mxu1 }
 0x3e3   : > { %v1016_v24 = vmul.f32 0.35355338, %v1007_v23  ;;  %v1019_v25 = vsel %vm818_vm2, %v1017_v22, -inf }
 0x3e5   : > { %v1018_v26 = vsel %vm818_vm2, %v1016_v24, -inf }
 0x3e6   : > { %v1020_v27 = vmax.f32 %v1018_v26, %v1019_v25 }
 0x3e7   : > { %v1120_v28 = vld [vmem:[#allocation2] sm:$0xff] }
 0x3e8   : > { %v1021_v29 = vsub.f32 %v1016_v24, %v1020_v27  ;;  %v1022_v30 = vsub.f32 %v1017_v22, %v1020_v27  ;;  %3511 = vmatprep.mubr.msk.f32.mxu0 %vm435_vm0, %v1120_v28 }
 0x3ea   : > { %v1023_v31 = vmul.f32 1.442695, %v1021_v29  ;;  %v1025_v32 = vmul.f32 1.442695, %v1022_v30 }
 0x3ec   : > { %3574 = vpow2.f32 %v1023_v31 }
 0x3ed   : > { %3576 = vpow2.f32 %v1025_v32  ;;  %v1286_v32 = vld [vmem:[%s5162_s7 + $0x188] sm:$0xff] }
 0x3ee   : > { %1341 = vmatprep.subr.mxu1 %v1286_v32  ;;  %v1804_v32 = vld [vmem:[%s5163_s8 + $0x3e8] sm:$0xff] }
 0x3f9   : > { %v3575_v33 = vpop.eup %3574 }
 0x3fa   : > { %v3577_v34 = vpop.eup %3576  ;;  %v1027_v35 = vsel %vm818_vm2, %v3575_v33, 0.0 }
 0x3fb   : > { %v1028_v36 = vsel %vm818_vm2, %v3577_v34, 0.0 }
 0x3fc   : > { %v1029_v37 = vadd.f32 %v1028_v36, %v1027_v35  ;;  %v1287_v35 = vld [vmem:[%s5162_s7 + $0x190] sm:$0xff]  ;;  %v1282_v36 = vld [vmem:[%s5162_s7 + $0x108] sm:$0xff] }
 0x3fe   : > { %3578 = vrcp.f32 %v1029_v37  ;;  %v1284_v37 = vld [vmem:[%s5162_s7 + $0x118] sm:$0xff] }
 0x40b   : > { %v3579_v38 = vpop.eup %3578 }
 0x40c   : > { %v1031_v39 = vmul.f32 %v3579_v38, %v3575_v33  ;;  %v1032_v40 = vmul.f32 %v3579_v38, %v3577_v34  ;;  %v1288_v33 = vld [vmem:[%s5162_s7 + $0x198] sm:$0xff]  ;;  %v1285_v34 = vld [vmem:[%s5162_s7 + $0x180] sm:$0xff] }
 0x40d   : > { %1418 = vmatprep.subr.mxu0 %v1288_v33  ;;  %v1281_v38 = vld [vmem:[%s5162_s7 + $0x100] sm:$0xff]  ;;  %v1756_v33 = vld [vmem:[%s5163_s8 + $0x268] sm:$0xff] }
 0x40e   : > { %3500 = vmatprep.mubr.msk.f32.mxu1 %vm818_vm2, %v1031_v39  ;;  %v1283_v39 = vld [vmem:[%s5162_s7 + $0x110] sm:$0xff] }
 0x40f   : > { %3501 = vmatmul.mubr.msk.f32.vlgmr.msra.gmra.mxu1 %vm818_vm2, %v1032_v40  ;;  %v1278_v40 = vld [vmem:[%s5162_s7 + $0x88] sm:$0xff] }
 0x410   : > { %1381 = vmatprep.mubr.f32.mxu1 %v3657_v51  ;;  %1342 = vmatpush1.msra.mxu1 %v1285_v34  ;;  %v1788_v34 = vld [vmem:[%s5163_s8 + $0x368] sm:$0xff] }
 0x411   : > { %1343 = vmatprep.subr.mxu1 %v1282_v36  ;;  %v1803_v36 = vld [vmem:[%s5163_s8 + $0x3e0] sm:$0xff] }
 0x412   : > { %1344 = vmatpush1.msra.mxu1 %v1281_v38  ;;  %v1787_v38 = vld [vmem:[%s5163_s8 + $0x360] sm:$0xff] }
 0x413   : > { %1345 = vmatprep.subr.mxu1 %v1278_v40  ;;  %v1802_v40 = vld [vmem:[%s5163_s8 + $0x3d8] sm:$0xff] }
 0x414   : > { %1346 = vmatpush1.msra.mxu1 %v1277_v44  ;;  %v1786_v44 = vld [vmem:[%s5163_s8 + $0x358] sm:$0xff] }
 0x415   : > { %1347 = vmatprep.subr.mxu1 %v1274_v46  ;;  %v1801_v46 = vld [vmem:[%s5163_s8 + $0x3d0] sm:$0xff] }
 0x4cf   : > { %v3502_v47 = vpop.f32.mrf.mxu1 }
 0x4d0   : > { %v1115_v48 = vmul.f32 %v3502_v47, %v924_v13  ;;  %v1276_v47 = vld [vmem:[%s5162_s7 + $0x18] sm:$0xff] }
 0x4d1   : > { %v1105_v49 = vpop.f32.mrf.mxu1 }
 0x4d2   : > { %v1114_v50 = vmul.f32 %v1105_v49, %v922_v12  ;;  %v1117_v52 = vsel %vm435_vm0, %v1115_v48, 0.0  ;;  %v1273_v48 = vld [vmem:[%s5162_s7] sm:$0xff]  ;;  %v1275_v49 = vld [vmem:[%s5162_s7 + $0x10] sm:$0xff] }
 0x4d3   : > { %1348 = vmatpush1.msra.mxu1 %v1273_v48  ;;  %v1785_v48 = vld [vmem:[%s5163_s8 + $0x350] sm:$0xff] }
 0x4d4   : > { %v1116_v53 = vsel %vm435_vm0, %v1114_v50, 0.0  ;;  %v1556_v50 = vld [vmem:[%s5162_s7 + $0x1a8] sm:$0xff] }
 0x4d5   : > { %v1118_v54 = vadd.f32 %v1117_v52, %v1116_v53  ;;  %v1558_v52 = vld [vmem:[%s5162_s7 + $0x1b8] sm:$0xff]  ;;  %1605 = vmatprep.subr.mxu1 %v1556_v50  ;;  %v1800_v50 = vld [vmem:[%s5163_s8 + $0x3c8] sm:$0xff] }
 0x4d7   : > { %1119 = vst.msk [vmem:[#allocation2 + $0x8] sm:$0xff] %vm435_vm0, %v1118_v54 }
 0x4de   : > { %v1121_v55 = vld [vmem:[#allocation2 + $0x8] sm:$0xff] }
 0x4df   : > { %3512 = vmatmul.mubr.msk.f32.vlgmr.msra.gmra.mxu0 %vm435_vm0, %v1121_v55 }
 0x4e0   : > { %1458 = vmatprep.mubr.f32.mxu0 %v3657_v51  ;;  %1419 = vmatpush1.msra.mxu0 %v1287_v35  ;;  %v1771_v35 = vld [vmem:[%s5163_s8 + $0x2e0] sm:$0xff] }
 0x4e1   : > { %1420 = vmatprep.subr.mxu0 %v1284_v37  ;;  %v1755_v37 = vld [vmem:[%s5163_s8 + $0x260] sm:$0xff] }
 0x4e2   : > { %1421 = vmatpush1.msra.mxu0 %v1283_v39  ;;  %v1770_v39 = vld [vmem:[%s5163_s8 + $0x2d8] sm:$0xff] }
 0x4e3   : > { %1422 = vmatprep.subr.mxu0 %v1280_v42  ;;  %v1754_v42 = vld [vmem:[%s5163_s8 + $0x258] sm:$0xff] }
 0x4e4   : > { %1423 = vmatpush1.msra.mxu0 %v1279_v45  ;;  %v1769_v45 = vld [vmem:[%s5163_s8 + $0x2d0] sm:$0xff] }
 0x4e5   : > { %1424 = vmatprep.subr.mxu0 %v1276_v47  ;;  %v1753_v47 = vld [vmem:[%s5163_s8 + $0x250] sm:$0xff] }
 0x4e6   : > { %1425 = vmatpush1.msra.mxu0 %v1275_v49  ;;  %v1768_v49 = vld [vmem:[%s5163_s8 + $0x2c8] sm:$0xff] }
 0x4e7   : > { %1682 = vmatprep.subr.mxu0 %v1558_v52  ;;  %v1752_v52 = vld [vmem:[%s5163_s8 + $0x248] sm:$0xff] }
 0x59f   : > { %v3513_v60 = vpop.f32.mrf.mxu0 }
 0x5a0   : > { %v1208_v61 = vadd.f32 %v3513_v60, %v1129_v59 }
 0x5a1   : > { %v1202_v62 = vpop.f32.mrf.mxu0 }
 0x5a2   : > { %v1203_v63 = vadd.f32 %v1202_v62, %v1129_v59  ;;  %v1214_v0 = vsel %vm435_vm0, %v1208_v61, -inf  ;;  %v4067_v62 = vsub.s32 3, %v3844_v41 }
 0x5a3   : > { %1215 = vmax.xlane.f32.xlu0 %v1214_v0 }
 0x5a4   : > { %v1211_v1 = vsel %vm435_vm0, %v1203_v63, -inf }
 0x5a5   : > { %1212 = vmax.xlane.f32.xlu1 %v1211_v1  ;;  %v1270_v1 = vrot.slane %v3850_v43, %v4067_v62 }
 0x62c   : > { %v1216_v2 = vpop.xlane.xlu0 %1215 }
 0x62d   : > { %v1218_v3 = vsub.f32 %v1208_v61, %v1216_v2  ;;  %v4064_v61 = vsub.s32 2, %v3844_v41  ;;  %v1557_v41 = vld [vmem:[%s5162_s7 + $0x1b0] sm:$0xff] }
 0x62e   : > { %v1213_v6 = vpop.xlane.xlu1 %1212 }
 0x62f   : > { %v1217_v7 = vsub.f32 %v1203_v63, %v1213_v6  ;;  %v1221_v8 = vmul.f32 1.442695, %v1218_v3  ;;  %v1264_v63 = vrot.slane %v3850_v43, %v4064_v61  ;;  %v1554_v43 = vld [vmem:[%s5162_s7 + $0x138] sm:$0xff] }
 0x631   : > { %v1219_v9 = vmul.f32 1.442695, %v1217_v7 }
 0x633   : > { %3580 = vpow2.f32 %v1219_v9  ;;  %v1555_v9 = vld [vmem:[%s5162_s7 + $0x1a0] sm:$0xff] }
 0x634   : > { %3582 = vpow2.f32 %v1221_v8 }
 0x640   : > { %v3581_v10 = vpop.eup %3580 }
 0x641   : > { %v1223_v11 = vsel %vm435_vm0, %v3581_v10, 0.0  ;;  %v3583_v12 = vpop.eup %3582 }
 0x642   : > { %1224 = vadd.xlane.f32.xlu0 %v1223_v11  ;;  %v1226_v13 = vsel %vm435_vm0, %v3583_v12, 0.0 }
 0x646   : > { %1227 = vadd.xlane.f32.xlu0 %v1226_v13  ;;  %v1553_v13 = vld [vmem:[%s5162_s7 + $0x130] sm:$0xff] }
 0x6cb   : > { %v1225_v14 = vpop.xlane.xlu0 %1224 }
 0x6cc   : > { %3584 = vrcp.f32 %v1225_v14 }
 0x6cf   : > { %v1228_v15 = vpop.xlane.xlu0 %1227 }
 0x6d0   : > { %3586 = vrcp.f32 %v1228_v15  ;;  %v1548_v15 = vld [vmem:[%s5162_s7 + $0xa8] sm:$0xff] }
 0x6d9   : > { %v3585_v16 = vpop.eup %3584 }
 0x6da   : > { %v1231_v17 = vmul.f32 %v3585_v16, %v3581_v10  ;;  %v1552_v10 = vld [vmem:[%s5162_s7 + $0x128] sm:$0xff]  ;;  %v1550_v16 = vld [vmem:[%s5162_s7 + $0xb8] sm:$0xff] }
 0x6dc   : > { %v3996_v18 = vadd.f32 %v1231_v17, %v3787_v4  ;;  %v1547_v17 = vld [vmem:[%s5162_s7 + $0xa0] sm:$0xff] }
 0x6dd   : > { %v3587_v19 = vpop.eup %3586 }
 0x6de   : > { %v1235_v20 = vsel %vm435_vm0, %v3996_v18, 0.0  ;;  %v1232_v21 = vmul.f32 %v3587_v19, %v3583_v12  ;;  %v1551_v12 = vld [vmem:[%s5162_s7 + $0x120] sm:$0xff]  ;;  %v1549_v19 = vld [vmem:[%s5162_s7 + $0xb0] sm:$0xff] }
 0x6df   : > { %1236 = vadd.xlane.f32.xlu1 %v1235_v20  ;;  %v1544_v20 = vld [vmem:[%s5162_s7 + $0x28] sm:$0xff] }
 0x6e0   : > { %v4001_v22 = vadd.f32 %v1232_v21, %v3789_v5  ;;  %v1546_v21 = vld [vmem:[%s5162_s7 + $0x38] sm:$0xff] }
 0x6e2   : > { %v1238_v23 = vsel %vm435_vm0, %v4001_v22, 0.0 }
 0x6e3   : > { %1239 = vadd.xlane.f32.xlu0 %v1238_v23  ;;  %v1543_v23 = vld [vmem:[%s5162_s7 + $0x20] sm:$0xff] }
 0x768   : > { %v1237_v24 = vpop.xlane.xlu1 %1236 }
 0x769   : > { %v1241_v25 = vmul.f32 0.03125, %v1237_v24  ;;  %v1545_v24 = vld [vmem:[%s5162_s7 + $0x30] sm:$0xff] }
 0x76b   : > { %v1243_v26 = vsub.f32 %v3996_v18, %v1241_v25  ;;  %v1774_v25 = vld [vmem:[%s5163_s8 + $0x2f8] sm:$0xff] }
 0x76c   : > { %v1240_v27 = vpop.xlane.xlu0 %1239 }
 0x76d   : > { %v1242_v4 = vmul.f32 0.03125, %v1240_v27  ;;  %v1245_v28 = vmul.f32 %v1243_v26, %v1243_v26  ;;  %v1758_v27 = vld [vmem:[%s5163_s8 + $0x278] sm:$0xff] }
 0x76f   : > { %v1244_v29 = vsub.f32 %v4001_v22, %v1242_v4  ;;  %v1247_v30 = vsel %vm435_vm0, %v1245_v28, 0.0  ;;  %v1790_v4 = vld [vmem:[%s5163_s8 + $0x378] sm:$0xff]  ;;  %v1773_v28 = vld [vmem:[%s5163_s8 + $0x2f0] sm:$0xff] }
 0x770   : > { %1248 = vadd.xlane.f32.xlu1 %v1247_v30  ;;  %v1757_v30 = vld [vmem:[%s5163_s8 + $0x270] sm:$0xff] }
 0x771   : > { %v1246_v31 = vmul.f32 %v1244_v29, %v1244_v29 }
 0x773   : > { %v1250_v5 = vsel %vm435_vm0, %v1246_v31, 0.0  ;;  %v1789_v31 = vld [vmem:[%s5163_s8 + $0x370] sm:$0xff] }
 0x774   : > { %1251 = vadd.xlane.f32.xlu0 %v1250_v5  ;;  %v1772_v5 = vld [vmem:[%s5163_s8 + $0x2e8] sm:$0xff] }
 0x7f9   : > { %v1249_v53 = vpop.xlane.xlu1 %1248 }
 0x7fa   : > { %v1253_v54 = vmul.f32 0.03125, %v1249_v53  ;;  %v1784_v53 = vld [vmem:[%s5163_s8 + $0x348] sm:$0xff] }
 0x7fc   : > { %v1255_v55 = vadd.f32 1e-05, %v1253_v54  ;;  %v1767_v54 = vld [vmem:[%s5163_s8 + $0x2c0] sm:$0xff] }
 0x7fd   : > { %v1252_v56 = vpop.xlane.xlu0 %1251 }
 0x7fe   : > { %3588 = vrsqrt.f32 %v1255_v55  ;;  %v1254_v59 = vmul.f32 0.03125, %v1252_v56  ;;  %v1799_v55 = vld [vmem:[%s5163_s8 + $0x3c0] sm:$0xff] }
 0x7ff   : > { %v1751_v56 = vld [vmem:[%s5163_s8 + $0x240] sm:$0xff] }
 0x800   : > { %v1256_v60 = vadd.f32 1e-05, %v1254_v59  ;;  %v1783_v59 = vld [vmem:[%s5163_s8 + $0x340] sm:$0xff] }
 0x802   : > { %3590 = vrsqrt.f32 %v1256_v60  ;;  %v1766_v60 = vld [vmem:[%s5163_s8 + $0x2b8] sm:$0xff] }
 0x80b   : > { %v3589_v0 = vpop.eup %3588 }
 0x80c   : > { %v1259_v2 = vmul.f32 %v3589_v0, %v1243_v26  ;;  %v1806_v26 = vld [vmem:[%s5163_s8 + $0x3f8] sm:$0xff] }
 0x80d   : > { %v1750_v0 = vld [vmem:[%s5163_s8 + $0x238] sm:$0xff] }
 0x80e   : > { %v1265_v3 = vmul.f32 %v1264_v63, %v1259_v2  ;;  %v1765_v2 = vld [vmem:[%s5163_s8 + $0x2b0] sm:$0xff] }
 0x80f   : > { %v3591_v6 = vpop.eup %3590 }
 0x810   : > { %v4073_v7 = vadd.f32 %v1270_v1, %v1265_v3  ;;  %v1260_v8 = vmul.f32 %v3591_v6, %v1244_v29  ;;  %v1805_v29 = vld [vmem:[%s5163_s8 + $0x3f0] sm:$0xff] }
 0x811   : > { %v1797_v3 = vld [vmem:[%s5163_s8 + $0x3b0] sm:$0xff] }
 0x812   : > { %v1266_v11 = vmul.f32 %v1264_v63, %v1260_v8  ;;  %3088 = vmatmul.mubr.msk.f32.vlgmr.msra.gmra.mxu1 %vm435_vm0, %v4073_v7  ;;  %3090 = vmatmul.mubr.msk.f32.vlgmr.msra.gmra.mxu0 %vm435_vm0, %v4073_v7  ;;  %v1798_v63 = vld [vmem:[%s5163_s8 + $0x3b8] sm:$0xff]  ;;  %v1749_v6 = vld [vmem:[%s5163_s8 + $0x230] sm:$0xff] }
 0x813   : > { %1606 = vmatpush1.msra.mxu1 %v1555_v9  ;;  %1683 = vmatpush1.msra.mxu0 %v1557_v41  ;;  %v1781_v8 = vld [vmem:[%s5163_s8 + $0x330] sm:$0xff]  ;;  %v1764_v9 = vld [vmem:[%s5163_s8 + $0x2a8] sm:$0xff] }
 0x814   : > { %v4097_v14 = vadd.f32 %v1270_v1, %v1266_v11  ;;  %1607 = vmatprep.subr.mxu1 %v1552_v10  ;;  %1684 = vmatprep.subr.mxu0 %v1554_v43  ;;  %v1782_v1 = vld [vmem:[%s5163_s8 + $0x338] sm:$0xff]  ;;  %v1796_v41 = vld [vmem:[%s5163_s8 + $0x3a8] sm:$0xff]  ;;  %v1763_v11 = vld [vmem:[%s5163_s8 + $0x2a0] sm:$0xff] }
 0x815   : > { %1387 = vmatprep.mubr.f32.mxu1 %v3657_v51  ;;  %1464 = vmatprep.mubr.f32.mxu0 %v3657_v51  ;;  %v1748_v10 = vld [vmem:[%s5163_s8 + $0x228] sm:$0xff] }
 0x816   : > { %1608 = vmatpush1.msra.mxu1 %v1551_v12  ;;  %1685 = vmatpush1.msra.mxu0 %v1553_v13  ;;  %v1780_v43 = vld [vmem:[%s5163_s8 + $0x328] sm:$0xff]  ;;  %v1795_v12 = vld [vmem:[%s5163_s8 + $0x3a0] sm:$0xff] }
 0x817   : > { %3089 = vmatmul.mubr.msk.f32.gmra.mxu1 %vm435_vm0, %v4097_v14  ;;  %3091 = vmatmul.mubr.msk.f32.gmra.mxu0 %vm435_vm0, %v4097_v14  ;;  %v1747_v13 = vld [vmem:[%s5163_s8 + $0x220] sm:$0xff] }
 0x818   : > { %1609 = vmatprep.subr.mxu1 %v1548_v15  ;;  %1686 = vmatprep.subr.mxu0 %v1550_v16  ;;  %v1779_v15 = vld [vmem:[%s5163_s8 + $0x320] sm:$0xff]  ;;  %v1762_v16 = vld [vmem:[%s5163_s8 + $0x298] sm:$0xff] }
 0x819   : > { %1610 = vmatpush1.msra.mxu1 %v1547_v17  ;;  %1687 = vmatpush1.msra.mxu0 %v1549_v19  ;;  %v1794_v17 = vld [vmem:[%s5163_s8 + $0x398] sm:$0xff] }
 0x81a   : > { %1611 = vmatprep.subr.mxu1 %v1544_v20  ;;  %1688 = vmatprep.subr.mxu0 %v1546_v21  ;;  %v1746_v19 = vld [vmem:[%s5163_s8 + $0x218] sm:$0xff]  ;;  %v1761_v21 = vld [vmem:[%s5163_s8 + $0x290] sm:$0xff] }
 0x81b   : > { %1612 = vmatpush1.msra.mxu1 %v1543_v23  ;;  %1645 = vmatprep.mubr.f32.mxu1 %v3657_v51  ;;  %v1778_v20 = vld [vmem:[%s5163_s8 + $0x318] sm:$0xff]  ;;  %v1793_v23 = vld [vmem:[%s5163_s8 + $0x390] sm:$0xff] }
 0x81c   : > { %1689 = vmatpush1.msra.mxu0 %v1545_v24  ;;  %1722 = vmatprep.mubr.f32.mxu0 %v3657_v51  ;;  %v1745_v24 = vld [vmem:[%s5163_s8 + $0x210] sm:$0xff] }
 0x81d   : > { %3092 = vmatmul.mubr.msk.f32.vlgmr.msra.gmra.mxu1 %vm435_vm0, %v4073_v7  ;;  %3094 = vmatmul.mubr.msk.f32.vlgmr.msra.gmra.mxu0 %vm435_vm0, %v4073_v7 }
 0x81e   : > { %1651 = vmatprep.mubr.f32.mxu1 %v3657_v51  ;;  %1728 = vmatprep.mubr.f32.mxu0 %v3657_v51 }
 0x81f   : > { %3145 = vmatprep.subr.mxu1 %v1774_v25  ;;  %3183 = vmatprep.subr.mxu0 %v1806_v26  ;;  %v1777_v25 = vld [vmem:[%s5163_s8 + $0x310] sm:$0xff]  ;;  %v1760_v26 = vld [vmem:[%s5163_s8 + $0x288] sm:$0xff] }
 0x820   : > { %3146 = vmatpush3.msra.mxu1 %v1758_v27  ;;  %3184 = vmatpush3.msra.mxu0 %v1790_v4  ;;  %v1792_v27 = vld [vmem:[%s5163_s8 + $0x388] sm:$0xff] }
 0x821   : > { %3093 = vmatmul.mubr.msk.f32.gmra.mxu1 %vm435_vm0, %v4097_v14  ;;  %3095 = vmatmul.mubr.msk.f32.gmra.mxu0 %vm435_vm0, %v4097_v14  ;;  %v1744_v4 = vld [vmem:[%s5163_s8 + $0x208] sm:$0xff] }
 0x822   : > { %3147 = vmatprep.subr.mxu1 %v1773_v28  ;;  %3185 = vmatprep.subr.mxu0 %v1805_v29  ;;  %v1776_v28 = vld [vmem:[%s5163_s8 + $0x308] sm:$0xff]  ;;  %v1759_v29 = vld [vmem:[%s5163_s8 + $0x280] sm:$0xff] }
 0x823   : > { %3148 = vmatpush3.msra.mxu1 %v1757_v30  ;;  %3186 = vmatpush3.msra.mxu0 %v1789_v31  ;;  %v1791_v30 = vld [vmem:[%s5163_s8 + $0x380] sm:$0xff] }
 0x824   : > { %3149 = vmatprep.subr.mxu1 %v1772_v5  ;;  %3187 = vmatprep.subr.mxu0 %v1804_v32  ;;  %v1743_v31 = vld [vmem:[%s5163_s8 + $0x200] sm:$0xff]  ;;  %v1510_v32 = vld [vmem:[%s5163_s8 + $0xf8] sm:$0xff] }
 0x825   : > { %3150 = vmatpush3.msra.mxu1 %v1756_v33  ;;  %3188 = vmatpush3.msra.mxu0 %v1788_v34  ;;  %v1775_v5 = vld [vmem:[%s5163_s8 + $0x300] sm:$0xff]  ;;  %v1542_v33 = vld [vmem:[%s5163_s8 + $0x1f8] sm:$0xff] }
 0x826   : > { %3151 = vmatprep.subr.mxu1 %v1771_v35  ;;  %3189 = vmatprep.subr.mxu0 %v1803_v36 }
 0x827   : > { %3152 = vmatpush3.msra.mxu1 %v1755_v37  ;;  %3190 = vmatpush3.msra.mxu0 %v1787_v38 }
 0x828   : > { %3153 = vmatprep.subr.mxu1 %v1770_v39  ;;  %3191 = vmatprep.subr.mxu0 %v1802_v40  ;;  %v1559_v40 = vld [vmem:[%s5158_s3 + $0x4] sm:$0xf] }
 0x829   : > { %3154 = vmatpush3.msra.mxu1 %v1754_v42  ;;  %3192 = vmatpush3.msra.mxu0 %v1786_v44 }
 0x82a   : > { %3155 = vmatprep.subr.mxu1 %v1769_v45  ;;  %3193 = vmatprep.subr.mxu0 %v1801_v46  ;;  %v1564_v45 = vrot.slane %v1559_v40, %v3854_v57  ;;  %v1572_v46 = vrot.slane %v1559_v40, %v4064_v61 }
 0x82b   : > { %3156 = vmatpush3.msra.mxu1 %v1753_v47  ;;  %3194 = vmatpush3.msra.mxu0 %v1785_v48  ;;  %v1568_v47 = vrot.slane %v1559_v40, %v3857_v58  ;;  %v1576_v48 = vrot.slane %v1559_v40, %v4067_v62  ;;  %v1523_v40 = vld [vmem:[%s5163_s8 + $0x160] sm:$0xff] }
 0x82c   : > { %3157 = vmatprep.subr.mxu1 %v1768_v49  ;;  %3195 = vmatprep.subr.mxu0 %v1800_v50 }
 0x82d   : > { %3158 = vmatpush3.msra.mxu1 %v1752_v52  ;;  %3196 = vmatpush3.msra.mxu0 %v1784_v53 }
 0x82e   : > { %3159 = vmatprep.subr.mxu1 %v1767_v54  ;;  %3197 = vmatprep.subr.mxu0 %v1799_v55 }
 0x82f   : > { %3160 = vmatpush3.msra.mxu1 %v1751_v56  ;;  %3198 = vmatpush3.msra.mxu0 %v1783_v59 }
 0x830   : > { %3161 = vmatprep.subr.mxu1 %v1766_v60  ;;  %3199 = vmatprep.subr.mxu0 %v1798_v63 }
 0x831   : > { %3162 = vmatpush3.msra.mxu1 %v1750_v0  ;;  %3200 = vmatpush3.msra.mxu0 %v1782_v1  ;;  %v4361_v0 = vld [vmem:[%s5158_s3] sm:$0xf] }
 0x832   : > { %3163 = vmatprep.subr.mxu1 %v1765_v2  ;;  %3201 = vmatprep.subr.mxu0 %v1797_v3  ;;  %v4365_v3 = vrot.slane %v4361_v0, %v3857_v58 }
 0x833   : > { %3164 = vmatpush3.msra.mxu1 %v1749_v6  ;;  %3202 = vmatpush3.msra.mxu0 %v1781_v8 }
 0x834   : > { %3165 = vmatprep.subr.mxu1 %v1764_v9  ;;  %3203 = vmatprep.subr.mxu0 %v1796_v41 }
 0x835   : > { %3166 = vmatpush3.msra.mxu1 %v1748_v10  ;;  %3204 = vmatpush3.msra.mxu0 %v1780_v43  ;;  %v1494_v10 = vld [vmem:[%s5163_s8 + $0x78] sm:$0xff] }
 0x836   : > { %3167 = vmatprep.subr.mxu1 %v1763_v11  ;;  %3205 = vmatprep.subr.mxu0 %v1795_v12  ;;  %v1526_v43 = vld [vmem:[%s5163_s8 + $0x178] sm:$0xff]  ;;  %v4375_v11 = vrot.slane %v4361_v0, %v4067_v62 }
 0x837   : > { %3168 = vmatpush3.msra.mxu1 %v1747_v13  ;;  %3206 = vmatpush3.msra.mxu0 %v1779_v15  ;;  %v1509_v15 = vld [vmem:[%s5163_s8 + $0xf0] sm:$0xff] }
 0x838   : > { %3169 = vmatprep.subr.mxu1 %v1762_v16  ;;  %3207 = vmatprep.subr.mxu0 %v1794_v17  ;;  %v1541_v16 = vld [vmem:[%s5163_s8 + $0x1f0] sm:$0xff] }
 0x839   : > { %3170 = vmatpush3.msra.mxu1 %v1746_v19  ;;  %3208 = vmatpush3.msra.mxu0 %v1778_v20  ;;  %v1493_v20 = vld [vmem:[%s5163_s8 + $0x70] sm:$0xff] }
 0x83a   : > { %3171 = vmatprep.subr.mxu1 %v1761_v21  ;;  %3209 = vmatprep.subr.mxu0 %v1793_v23  ;;  %v1525_v21 = vld [vmem:[%s5163_s8 + $0x170] sm:$0xff] }
 0x83b   : > { %3172 = vmatpush3.msra.mxu1 %v1745_v24  ;;  %3210 = vmatpush3.msra.mxu0 %v1777_v25 }
 0x83c   : > { %3173 = vmatprep.subr.mxu1 %v1760_v26  ;;  %3211 = vmatprep.subr.mxu0 %v1792_v27  ;;  %v1508_v26 = vld [vmem:[%s5163_s8 + $0xe8] sm:$0xff] }
 0x83d   : > { %3174 = vmatpush3.msra.mxu1 %v1744_v4  ;;  %3212 = vmatpush3.msra.mxu0 %v1776_v28  ;;  %v1540_v27 = vld [vmem:[%s5163_s8 + $0x1e8] sm:$0xff] }
 0x83e   : > { %3175 = vmatprep.subr.mxu1 %v1759_v29  ;;  %3213 = vmatprep.subr.mxu0 %v1791_v30  ;;  %v1492_v30 = vld [vmem:[%s5163_s8 + $0x68] sm:$0xff] }
 0x83f   : > { %3176 = vmatpush3.msra.mxu1 %v1743_v31  ;;  %3214 = vmatpush3.msra.mxu0 %v1775_v5  ;;  %v1524_v31 = vld [vmem:[%s5163_s8 + $0x168] sm:$0xff]  ;;  %v1507_v5 = vld [vmem:[%s5163_s8 + $0xe0] sm:$0xff] }
 0x840   : > { %3221 = vmatprep.subr.mxu1 %v1510_v32  ;;  %3259 = vmatprep.subr.mxu0 %v1542_v33  ;;  %v1539_v33 = vld [vmem:[%s5163_s8 + $0x1e0] sm:$0xff] }
 0x8d2   : > { %v4339_v34 = vpop.f32.mrf.mxu1  ;;  %v4341_v35 = vpop.f32.mrf.mxu0 }
 0x8d4   : > { %v1385_v36 = vpop.f32.mrf.mxu1  ;;  %v1462_v37 = vpop.f32.mrf.mxu0 }
 0x8d5   : > { %v1386_v25 = vadd.f32 %v1385_v36, %v4365_v3  ;;  %v1463_v4 = vadd.f32 %v1462_v37, %v4375_v11  ;;  %v1491_v37 = vld [vmem:[%s5163_s8 + $0x60] sm:$0xff] }
 0x8d7   : > { %v4343_v38 = vpop.f32.mrf.mxu1  ;;  %v4345_v39 = vpop.f32.mrf.mxu0  ;;  %v1472_v32 = vmax.f32 %v1386_v25, 0.0  ;;  %v1474_v36 = vmax.f32 %v1463_v4, 0.0  ;;  %v1498_v25 = vld [vmem:[%s5163_s8 + $0x98] sm:$0xff]  ;;  %v1302_v4 = vrot.slane %v4361_v0, %v4064_v61 }
 0x8d9   : > { %v4350_v42 = vpop.f32.mrf.mxu1  ;;  %v4352_v44 = vpop.f32.mrf.mxu0 }
 0x8dd   : > { %v1647_v49 = vpop.f32.mrf.mxu1  ;;  %v1724_v50 = vpop.f32.mrf.mxu0 }
 0x8de   : > { %v1648_v52 = vadd.f32 %v1647_v49, %v1564_v45  ;;  %v1725_v53 = vadd.f32 %v1724_v50, %v1572_v46  ;;  %v1505_v49 = vld [vmem:[%s5163_s8 + $0xd0] sm:$0xff] }
 0x8df   : > { %v1649_v54 = vpop.f32.mrf.mxu1  ;;  %v1726_v55 = vpop.f32.mrf.mxu0  ;;  %v1537_v50 = vld [vmem:[%s5163_s8 + $0x1d0] sm:$0xff] }
 0x8e0   : > { %v1650_v56 = vadd.f32 %v1649_v54, %v1568_v47  ;;  %v1727_v59 = vadd.f32 %v1726_v55, %v1576_v48  ;;  %v1735_v6 = vmax.f32 %v1648_v52, 0.0  ;;  %v1737_v8 = vmax.f32 %v1725_v53, 0.0  ;;  %v1489_v52 = vld [vmem:[%s5163_s8 + $0x50] sm:$0xff]  ;;  %v1504_v54 = vld [vmem:[%s5163_s8 + $0xc8] sm:$0xff] }
 0x8e1   : > { %v1653_v60 = vpop.f32.mrf.mxu1  ;;  %v1730_v63 = vpop.f32.mrf.mxu0  ;;  %v1521_v53 = vld [vmem:[%s5163_s8 + $0x150] sm:$0xff]  ;;  %v1536_v55 = vld [vmem:[%s5163_s8 + $0x1c8] sm:$0xff] }
 0x8e2   : > { %v1736_v1 = vmax.f32 %v1650_v56, 0.0  ;;  %v1738_v2 = vmax.f32 %v1727_v59, 0.0  ;;  %v1654_v17 = vadd.f32 %v1653_v60, %v1564_v45  ;;  %v1731_v19 = vadd.f32 %v1730_v63, %v1572_v46  ;;  %v1506_v45 = vld [vmem:[%s5163_s8 + $0xd8] sm:$0xff]  ;;  %v1488_v56 = vld [vmem:[%s5163_s8 + $0x48] sm:$0xff]  ;;  %v1503_v60 = vld [vmem:[%s5163_s8 + $0xc0] sm:$0xff] }
 0x8e3   : > { %v1655_v9 = vpop.f32.mrf.mxu1  ;;  %v1732_v41 = vpop.f32.mrf.mxu0  ;;  %v1538_v46 = vld [vmem:[%s5163_s8 + $0x1d8] sm:$0xff]  ;;  %v1520_v59 = vld [vmem:[%s5163_s8 + $0x148] sm:$0xff]  ;;  %v1535_v63 = vld [vmem:[%s5163_s8 + $0x1c0] sm:$0xff] }
 0x8e4   : > { %v1656_v12 = vadd.f32 %v1655_v9, %v1568_v47  ;;  %v1733_v13 = vadd.f32 %v1732_v41, %v1576_v48  ;;  %1871 = vmatprep.mubr.f32.mxu1 %v1736_v1  ;;  %1946 = vmatprep.mubr.f32.mxu0 %v1738_v2  ;;  %v1739_v28 = vmax.f32 %v1654_v17, 0.0  ;;  %v1741_v29 = vmax.f32 %v1731_v19, 0.0  ;;  %v1490_v47 = vld [vmem:[%s5163_s8 + $0x58] sm:$0xff]  ;;  %v1487_v1 = vld [vmem:[%s5163_s8 + $0x40] sm:$0xff]  ;;  %v1484_v17 = vld [vmem:[%s5163_s8 + $0x28] sm:$0xff] }
 0x8e5   : > { %1872 = vmatmul.mubr.f32.vlgmr.msra.gmra.mxu1 %v1735_v6  ;;  %1947 = vmatmul.mubr.f32.vlgmr.msra.gmra.mxu0 %v1737_v8  ;;  %v1522_v48 = vld [vmem:[%s5163_s8 + $0x158] sm:$0xff]  ;;  %v1519_v2 = vld [vmem:[%s5163_s8 + $0x140] sm:$0xff]  ;;  %v1516_v19 = vld [vmem:[%s5163_s8 + $0x128] sm:$0xff] }
 0x8e6   : > { %v1740_v23 = vmax.f32 %v1656_v12, 0.0  ;;  %v1742_v24 = vmax.f32 %v1733_v13, 0.0  ;;  %3222 = vmatpush3.msra.mxu1 %v1494_v10  ;;  %3260 = vmatpush3.msra.mxu0 %v1526_v43  ;;  %v1502_v6 = vld [vmem:[%s5163_s8 + $0xb8] sm:$0xff]  ;;  %v1501_v10 = vld [vmem:[%s5163_s8 + $0xb0] sm:$0xff] }
 0x8e7   : > { %3223 = vmatprep.subr.mxu1 %v1509_v15  ;;  %3261 = vmatprep.subr.mxu0 %v1541_v16  ;;  %v1534_v8 = vld [vmem:[%s5163_s8 + $0x1b8] sm:$0xff]  ;;  %v1533_v43 = vld [vmem:[%s5163_s8 + $0x1b0] sm:$0xff]  ;;  %v1500_v15 = vld [vmem:[%s5163_s8 + $0xa8] sm:$0xff] }
 0x8e8   : > { %3224 = vmatpush3.msra.mxu1 %v1493_v20  ;;  %3262 = vmatpush3.msra.mxu0 %v1525_v21  ;;  %v1486_v9 = vld [vmem:[%s5163_s8 + $0x38] sm:$0xff]  ;;  %v1485_v12 = vld [vmem:[%s5163_s8 + $0x30] sm:$0xff]  ;;  %v1532_v16 = vld [vmem:[%s5163_s8 + $0x1a8] sm:$0xff] }
 0x8e9   : > { %1876 = vmatprep.mubr.f32.mxu1 %v1740_v23  ;;  %1951 = vmatprep.mubr.f32.mxu0 %v1742_v24  ;;  %v1518_v41 = vld [vmem:[%s5163_s8 + $0x138] sm:$0xff]  ;;  %v1517_v13 = vld [vmem:[%s5163_s8 + $0x130] sm:$0xff]  ;;  %v1499_v20 = vld [vmem:[%s5163_s8 + $0xa0] sm:$0xff] }
 0x8ea   : > { %3225 = vmatprep.subr.mxu1 %v1508_v26  ;;  %3263 = vmatprep.subr.mxu0 %v1540_v27  ;;  %v1531_v21 = vld [vmem:[%s5163_s8 + $0x1a0] sm:$0xff]  ;;  %v1530_v26 = vld [vmem:[%s5163_s8 + $0x198] sm:$0xff]  ;;  %v1294_v27 = vrot.slane %v4361_v0, %v3854_v57  ;;  %v1529_v0 = vld [vmem:[%s5163_s8 + $0x190] sm:$0xff] }
 0x8eb   : > { %1877 = vmatmul.mubr.f32.gmra.mxu1 %v1739_v28  ;;  %1952 = vmatmul.mubr.f32.gmra.mxu0 %v1741_v29  ;;  %v1483_v23 = vld [vmem:[%s5163_s8 + $0x20] sm:$0xff]  ;;  %v1482_v28 = vld [vmem:[%s5163_s8 + $0x18] sm:$0xff] }
 0x8ec   : > { %3226 = vmatpush3.msra.mxu1 %v1492_v30  ;;  %3264 = vmatpush3.msra.mxu0 %v1524_v31  ;;  %v1515_v24 = vld [vmem:[%s5163_s8 + $0x120] sm:$0xff]  ;;  %v1514_v29 = vld [vmem:[%s5163_s8 + $0x118] sm:$0xff]  ;;  %v1497_v30 = vld [vmem:[%s5163_s8 + $0x90] sm:$0xff] }
 0x8ed   : > { %3227 = vmatprep.subr.mxu1 %v1507_v5  ;;  %2021 = vmatprep.mubr.f32.mxu1 %v1472_v32  ;;  %v1481_v31 = vld [vmem:[%s5163_s8 + $0x10] sm:$0xff]  ;;  %v1496_v32 = vld [vmem:[%s5163_s8 + $0x88] sm:$0xff] }
 0x8ee   : > { %3265 = vmatprep.subr.mxu0 %v1539_v33  ;;  %2096 = vmatprep.mubr.f32.mxu0 %v1474_v36  ;;  %v1513_v5 = vld [vmem:[%s5163_s8 + $0x110] sm:$0xff]  ;;  %v1528_v33 = vld [vmem:[%s5163_s8 + $0x188] sm:$0xff]  ;;  %v1384_v36 = vadd.f32 %v4339_v34, %v1294_v27  ;;  %v1527_v34 = vld [vmem:[%s5163_s8 + $0x180] sm:$0xff] }
 0x8ef   : > { %3228 = vmatpush3.msra.mxu1 %v1491_v37  ;;  %3266 = vmatpush3.msra.mxu0 %v1523_v40  ;;  %v1461_v37 = vadd.f32 %v4341_v35, %v1302_v4  ;;  %v1480_v40 = vld [vmem:[%s5163_s8 + $0x8] sm:$0xff]  ;;  %v1392_v35 = vadd.f32 %v4350_v42, %v4365_v3  ;;  %v1390_v3 = vadd.f32 %v4343_v38, %v1294_v27 }
 0x8f0   : > { %3229 = vmatprep.subr.mxu1 %v1506_v45  ;;  %3267 = vmatprep.subr.mxu0 %v1538_v46  ;;  %v1512_v45 = vld [vmem:[%s5163_s8 + $0x108] sm:$0xff]  ;;  %v1495_v46 = vld [vmem:[%s5163_s8 + $0x80] sm:$0xff] }
 0x8f1   : > { %3230 = vmatpush3.msra.mxu1 %v1490_v47  ;;  %3268 = vmatpush3.msra.mxu0 %v1522_v48  ;;  %v1469_v47 = vadd.f32 %v4352_v44, %v4375_v11  ;;  %v1479_v48 = vld [vmem:[%s5163_s8] sm:$0xff]  ;;  %v2120_v42 = vld [vmem:[%s5162_s7 + $0x1c8] sm:$0xff]  ;;  %v2122_v44 = vld [vmem:[%s5162_s7 + $0x1d8] sm:$0xff]  ;;  %v1467_v11 = vadd.f32 %v4345_v39, %v1302_v4 }
 0x8f2   : > { %3231 = vmatprep.subr.mxu1 %v1505_v49  ;;  %3269 = vmatprep.subr.mxu0 %v1537_v50  ;;  %v1511_v49 = vld [vmem:[%s5163_s8 + $0x100] sm:$0xff]  ;;  %v1471_v50 = vmax.f32 %v1384_v36, 0.0  ;;  %v2116_v38 = vld [vmem:[%s5162_s7 + $0x148] sm:$0xff]  ;;  %v2118_v39 = vld [vmem:[%s5162_s7 + $0x158] sm:$0xff] }
 0x8f3   : > { %3232 = vmatpush3.msra.mxu1 %v1489_v52  ;;  %3270 = vmatpush3.msra.mxu0 %v1521_v53  ;;  %v1473_v52 = vmax.f32 %v1461_v37, 0.0  ;;  %v1476_v53 = vmax.f32 %v1392_v35, 0.0  ;;  %v2352_v27 = vld [vmem:[%s5163_s8 + $0x568] sm:$0xff]  ;;  %v2335_v4 = vld [vmem:[%s5163_s8 + $0x4e0] sm:$0xff]  ;;  %v2365_v36 = vld [vmem:[%s5163_s8 + $0x5d0] sm:$0xff] }
 0x8f4   : > { %3233 = vmatprep.subr.mxu1 %v1504_v54  ;;  %3271 = vmatprep.subr.mxu0 %v1536_v55  ;;  %v1478_v54 = vmax.f32 %v1469_v47, 0.0  ;;  %v2119_v55 = vld [vmem:[%s5162_s7 + $0x1c0] sm:$0xff]  ;;  %v2317_v37 = vld [vmem:[%s5163_s8 + $0x450] sm:$0xff]  ;;  %v2348_v35 = vld [vmem:[%s5163_s8 + $0x548] sm:$0xff] }
 0x8f5   : > { %3234 = vmatpush3.msra.mxu1 %v1488_v56  ;;  %3272 = vmatpush3.msra.mxu0 %v1520_v59  ;;  %v2121_v56 = vld [vmem:[%s5162_s7 + $0x1d0] sm:$0xff]  ;;  %v2115_v59 = vld [vmem:[%s5162_s7 + $0x140] sm:$0xff] }
 0x8f6   : > { %3235 = vmatprep.subr.mxu1 %v1503_v60  ;;  %3273 = vmatprep.subr.mxu0 %v1535_v63  ;;  %v2117_v60 = vld [vmem:[%s5162_s7 + $0x150] sm:$0xff]  ;;  %v1475_v63 = vmax.f32 %v1390_v3, 0.0  ;;  %v2331_v47 = vld [vmem:[%s5163_s8 + $0x4c0] sm:$0xff]  ;;  %v2346_v3 = vld [vmem:[%s5163_s8 + $0x538] sm:$0xff] }
 0x8f7   : > { %3236 = vmatpush3.msra.mxu1 %v1487_v1  ;;  %3274 = vmatpush3.msra.mxu0 %v1519_v2  ;;  %v1477_v1 = vmax.f32 %v1467_v11, 0.0  ;;  %v2112_v2 = vld [vmem:[%s5162_s7 + $0xc8] sm:$0xff]  ;;  %v2329_v11 = vld [vmem:[%s5163_s8 + $0x4b0] sm:$0xff] }
 0x8f8   : > { %3237 = vmatprep.subr.mxu1 %v1502_v6  ;;  %3275 = vmatprep.subr.mxu0 %v1534_v8  ;;  %v2114_v6 = vld [vmem:[%s5162_s7 + $0xd8] sm:$0xff]  ;;  %v2111_v8 = vld [vmem:[%s5162_s7 + $0xc0] sm:$0xff] }
 0x8f9   : > { %3238 = vmatpush3.msra.mxu1 %v1486_v9  ;;  %3276 = vmatpush3.msra.mxu0 %v1518_v41  ;;  %v2113_v9 = vld [vmem:[%s5162_s7 + $0xd0] sm:$0xff]  ;;  %v2108_v41 = vld [vmem:[%s5162_s7 + $0x48] sm:$0xff] }
 0x8fa   : > { %3239 = vmatprep.subr.mxu1 %v1501_v10  ;;  %3277 = vmatprep.subr.mxu0 %v1533_v43  ;;  %v2110_v10 = vld [vmem:[%s5162_s7 + $0x58] sm:$0xff]  ;;  %v2107_v43 = vld [vmem:[%s5162_s7 + $0x40] sm:$0xff] }
 0x8fb   : > { %3240 = vmatpush3.msra.mxu1 %v1485_v12  ;;  %3278 = vmatpush3.msra.mxu0 %v1517_v13  ;;  %v2109_v12 = vld [vmem:[%s5162_s7 + $0x50] sm:$0xff]  ;;  %v2338_v13 = vld [vmem:[%s5163_s8 + $0x4f8] sm:$0xff] }
 0x8fc   : > { %3241 = vmatprep.subr.mxu1 %v1500_v15  ;;  %3279 = vmatprep.subr.mxu0 %v1532_v16  ;;  %v2370_v15 = vld [vmem:[%s5163_s8 + $0x5f8] sm:$0xff] }
 0x8fd   : > { %3242 = vmatpush3.msra.mxu1 %v1484_v17  ;;  %3280 = vmatpush3.msra.mxu0 %v1516_v19  ;;  %v2322_v16 = vld [vmem:[%s5163_s8 + $0x478] sm:$0xff]  ;;  %v2337_v19 = vld [vmem:[%s5163_s8 + $0x4f0] sm:$0xff] }
 0x8fe   : > { %3243 = vmatprep.subr.mxu1 %v1499_v20  ;;  %3281 = vmatprep.subr.mxu0 %v1531_v21  ;;  %v2354_v17 = vld [vmem:[%s5163_s8 + $0x578] sm:$0xff]  ;;  %v2369_v20 = vld [vmem:[%s5163_s8 + $0x5f0] sm:$0xff] }
 0x8ff   : > { %3244 = vmatpush3.msra.mxu1 %v1483_v23  ;;  %3282 = vmatpush3.msra.mxu0 %v1515_v24  ;;  %v2321_v21 = vld [vmem:[%s5163_s8 + $0x470] sm:$0xff]  ;;  %v2336_v24 = vld [vmem:[%s5163_s8 + $0x4e8] sm:$0xff] }
 0x900   : > { %3245 = vmatprep.subr.mxu1 %v1498_v25  ;;  %3283 = vmatprep.subr.mxu0 %v1530_v26  ;;  %v2353_v23 = vld [vmem:[%s5163_s8 + $0x570] sm:$0xff]  ;;  %v2368_v25 = vld [vmem:[%s5163_s8 + $0x5e8] sm:$0xff] }
 0x901   : > { %3246 = vmatpush3.msra.mxu1 %v1482_v28  ;;  %3284 = vmatpush3.msra.mxu0 %v1514_v29  ;;  %v2320_v26 = vld [vmem:[%s5163_s8 + $0x468] sm:$0xff]  ;;  %v2367_v28 = vld [vmem:[%s5163_s8 + $0x5e0] sm:$0xff] }
 0x902   : > { %3247 = vmatprep.subr.mxu1 %v1497_v30  ;;  %3285 = vmatprep.subr.mxu0 %v1529_v0  ;;  %v2319_v29 = vld [vmem:[%s5163_s8 + $0x460] sm:$0xff]  ;;  %v2334_v0 = vld [vmem:[%s5163_s8 + $0x4d8] sm:$0xff] }
 0x903   : > { %3248 = vmatpush3.msra.mxu1 %v1481_v31  ;;  %3286 = vmatpush3.msra.mxu0 %v1513_v5  ;;  %v2351_v30 = vld [vmem:[%s5163_s8 + $0x560] sm:$0xff]  ;;  %v2366_v31 = vld [vmem:[%s5163_s8 + $0x5d8] sm:$0xff] }
 0x904   : > { %3249 = vmatprep.subr.mxu1 %v1496_v32  ;;  %3287 = vmatprep.subr.mxu0 %v1528_v33  ;;  %v2318_v5 = vld [vmem:[%s5163_s8 + $0x458] sm:$0xff]  ;;  %v2333_v33 = vld [vmem:[%s5163_s8 + $0x4d0] sm:$0xff] }
 0x905   : > { %3250 = vmatpush3.msra.mxu1 %v1480_v40  ;;  %3288 = vmatpush3.msra.mxu0 %v1512_v45  ;;  %v2350_v32 = vld [vmem:[%s5163_s8 + $0x558] sm:$0xff]  ;;  %v2349_v40 = vld [vmem:[%s5163_s8 + $0x550] sm:$0xff]  ;;  %v2332_v45 = vld [vmem:[%s5163_s8 + $0x4c8] sm:$0xff] }
 0x906   : > { %3251 = vmatprep.subr.mxu1 %v1495_v46  ;;  %3289 = vmatprep.subr.mxu0 %v1527_v34  ;;  %v2364_v46 = vld [vmem:[%s5163_s8 + $0x5c8] sm:$0xff] }
 0x907   : > { %3252 = vmatpush3.msra.mxu1 %v1479_v48  ;;  %3290 = vmatpush3.msra.mxu0 %v1511_v49  ;;  %v2316_v34 = vld [vmem:[%s5163_s8 + $0x448] sm:$0xff]  ;;  %v2363_v48 = vld [vmem:[%s5163_s8 + $0x5c0] sm:$0xff] }
 0x908   : > { %2022 = vmatmul.mubr.f32.vlgmr.msra.gmra.mxu1 %v1471_v50  ;;  %2097 = vmatmul.mubr.f32.vlgmr.msra.gmra.mxu0 %v1473_v52  ;;  %v2315_v49 = vld [vmem:[%s5163_s8 + $0x440] sm:$0xff]  ;;  %v2330_v52 = vld [vmem:[%s5163_s8 + $0x4b8] sm:$0xff] }
 0x909   : > { %2169 = vmatprep.subr.mxu1 %v2120_v42  ;;  %2246 = vmatprep.subr.mxu0 %v2122_v44  ;;  %v2347_v50 = vld [vmem:[%s5163_s8 + $0x540] sm:$0xff]  ;;  %v2362_v42 = vld [vmem:[%s5163_s8 + $0x5b8] sm:$0xff] }
 0x90a   : > { %2026 = vmatprep.mubr.f32.mxu1 %v1476_v53  ;;  %2101 = vmatprep.mubr.f32.mxu0 %v1478_v54  ;;  %v2314_v44 = vld [vmem:[%s5163_s8 + $0x438] sm:$0xff]  ;;  %v2361_v53 = vld [vmem:[%s5163_s8 + $0x5b0] sm:$0xff] }
 0x90b   : > { %2170 = vmatpush1.msra.mxu1 %v2119_v55  ;;  %2247 = vmatpush1.msra.mxu0 %v2121_v56  ;;  %v2313_v54 = vld [vmem:[%s5163_s8 + $0x430] sm:$0xff]  ;;  %v2328_v56 = vld [vmem:[%s5163_s8 + $0x4a8] sm:$0xff] }
 0x90c   : > { %2171 = vmatprep.subr.mxu1 %v2116_v38  ;;  %2248 = vmatprep.subr.mxu0 %v2118_v39  ;;  %v2345_v55 = vld [vmem:[%s5163_s8 + $0x530] sm:$0xff]  ;;  %v2360_v38 = vld [vmem:[%s5163_s8 + $0x5a8] sm:$0xff] }
 0x90d   : > { %2172 = vmatpush1.msra.mxu1 %v2115_v59  ;;  %2249 = vmatpush1.msra.mxu0 %v2117_v60  ;;  %v2312_v39 = vld [vmem:[%s5163_s8 + $0x428] sm:$0xff]  ;;  %v2327_v60 = vld [vmem:[%s5163_s8 + $0x4a0] sm:$0xff] }
 0x90e   : > { %2027 = vmatmul.mubr.f32.gmra.mxu1 %v1475_v63  ;;  %2102 = vmatmul.mubr.f32.gmra.mxu0 %v1477_v1  ;;  %v2344_v59 = vld [vmem:[%s5163_s8 + $0x528] sm:$0xff]  ;;  %v2359_v63 = vld [vmem:[%s5163_s8 + $0x5a0] sm:$0xff] }
 0x90f   : > { %2173 = vmatprep.subr.mxu1 %v2112_v2  ;;  %2250 = vmatprep.subr.mxu0 %v2114_v6  ;;  %v2311_v1 = vld [vmem:[%s5163_s8 + $0x420] sm:$0xff]  ;;  %v2326_v6 = vld [vmem:[%s5163_s8 + $0x498] sm:$0xff] }
 0x910   : > { %2174 = vmatpush1.msra.mxu1 %v2111_v8  ;;  %2251 = vmatpush1.msra.mxu0 %v2113_v9  ;;  %v2343_v2 = vld [vmem:[%s5163_s8 + $0x520] sm:$0xff]  ;;  %v2358_v8 = vld [vmem:[%s5163_s8 + $0x598] sm:$0xff] }
 0x911   : > { %2175 = vmatprep.subr.mxu1 %v2108_v41  ;;  %2252 = vmatprep.subr.mxu0 %v2110_v10  ;;  %v2310_v9 = vld [vmem:[%s5163_s8 + $0x418] sm:$0xff]  ;;  %v2325_v10 = vld [vmem:[%s5163_s8 + $0x490] sm:$0xff] }
 0x912   : > { %2176 = vmatpush1.msra.mxu1 %v2107_v43  ;;  %2209 = vmatprep.mubr.f32.mxu1 %v3657_v51  ;;  %v2342_v41 = vld [vmem:[%s5163_s8 + $0x518] sm:$0xff]  ;;  %v2357_v43 = vld [vmem:[%s5163_s8 + $0x590] sm:$0xff] }
 0x913   : > { %2253 = vmatpush1.msra.mxu0 %v2109_v12  ;;  %2286 = vmatprep.mubr.f32.mxu0 %v3657_v51  ;;  %v2309_v12 = vld [vmem:[%s5163_s8 + $0x410] sm:$0xff] }
 0x914   : > { %3096 = vmatmul.mubr.msk.f32.vlgmr.msra.gmra.mxu1 %vm435_vm0, %v4073_v7  ;;  %3098 = vmatmul.mubr.msk.f32.vlgmr.msra.gmra.mxu0 %vm435_vm0, %v4073_v7 }
 0x915   : > { %2215 = vmatprep.mubr.f32.mxu1 %v3657_v51  ;;  %2292 = vmatprep.mubr.f32.mxu0 %v3657_v51 }
 0x916   : > { %3297 = vmatprep.subr.mxu1 %v2338_v13  ;;  %3335 = vmatprep.subr.mxu0 %v2370_v15  ;;  %v2341_v13 = vld [vmem:[%s5163_s8 + $0x510] sm:$0xff]  ;;  %v2324_v15 = vld [vmem:[%s5163_s8 + $0x488] sm:$0xff] }
 0x917   : > { %3298 = vmatpush3.msra.mxu1 %v2322_v16  ;;  %3336 = vmatpush3.msra.mxu0 %v2354_v17  ;;  %v2356_v16 = vld [vmem:[%s5163_s8 + $0x588] sm:$0xff] }
 0x918   : > { %3097 = vmatmul.mubr.msk.f32.gmra.mxu1 %vm435_vm0, %v4097_v14  ;;  %3099 = vmatmul.mubr.msk.f32.gmra.mxu0 %vm435_vm0, %v4097_v14  ;;  %v2308_v17 = vld [vmem:[%s5163_s8 + $0x408] sm:$0xff] }
 0x919   : > { %3299 = vmatprep.subr.mxu1 %v2337_v19  ;;  %3337 = vmatprep.subr.mxu0 %v2369_v20  ;;  %v2340_v19 = vld [vmem:[%s5163_s8 + $0x508] sm:$0xff]  ;;  %v2323_v20 = vld [vmem:[%s5163_s8 + $0x480] sm:$0xff] }
 0x91a   : > { %3300 = vmatpush3.msra.mxu1 %v2321_v21  ;;  %3338 = vmatpush3.msra.mxu0 %v2353_v23  ;;  %v2355_v21 = vld [vmem:[%s5163_s8 + $0x580] sm:$0xff] }
 0x91b   : > { %3301 = vmatprep.subr.mxu1 %v2336_v24  ;;  %3339 = vmatprep.subr.mxu0 %v2368_v25  ;;  %v2307_v23 = vld [vmem:[%s5163_s8 + $0x400] sm:$0xff]  ;;  %v2536_v25 = vld [vmem:[%s5162_s7 + $0x1e8] sm:$0xff] }
 0x91c   : > { %3302 = vmatpush3.msra.mxu1 %v2320_v26  ;;  %3340 = vmatpush3.msra.mxu0 %v2352_v27  ;;  %v2339_v24 = vld [vmem:[%s5163_s8 + $0x500] sm:$0xff]  ;;  %v2538_v26 = vld [vmem:[%s5162_s7 + $0x1f8] sm:$0xff] }
 0x91d   : > { %3303 = vmatprep.subr.mxu1 %v2335_v4  ;;  %3341 = vmatprep.subr.mxu0 %v2367_v28 }
 0x91e   : > { %3304 = vmatpush3.msra.mxu1 %v2319_v29  ;;  %3342 = vmatpush3.msra.mxu0 %v2351_v30 }
 0x91f   : > { %3305 = vmatprep.subr.mxu1 %v2334_v0  ;;  %3343 = vmatprep.subr.mxu0 %v2366_v31 }
 0x920   : > { %3306 = vmatpush3.msra.mxu1 %v2318_v5  ;;  %3344 = vmatpush3.msra.mxu0 %v2350_v32 }
 0x921   : > { %3307 = vmatprep.subr.mxu1 %v2333_v33  ;;  %3345 = vmatprep.subr.mxu0 %v2365_v36 }
 0x922   : > { %3308 = vmatpush3.msra.mxu1 %v2317_v37  ;;  %3346 = vmatpush3.msra.mxu0 %v2349_v40 }
 0x923   : > { %3309 = vmatprep.subr.mxu1 %v2332_v45  ;;  %3347 = vmatprep.subr.mxu0 %v2364_v46 }
 0x924   : > { %3310 = vmatpush3.msra.mxu1 %v2316_v34  ;;  %3348 = vmatpush3.msra.mxu0 %v2348_v35 }
 0x925   : > { %3311 = vmatprep.subr.mxu1 %v2331_v47  ;;  %3349 = vmatprep.subr.mxu0 %v2363_v48 }
 0x926   : > { %3312 = vmatpush3.msra.mxu1 %v2315_v49  ;;  %3350 = vmatpush3.msra.mxu0 %v2347_v50 }
 0x927   : > { %3313 = vmatprep.subr.mxu1 %v2330_v52  ;;  %3351 = vmatprep.subr.mxu0 %v2362_v42 }
 0x928   : > { %3314 = vmatpush3.msra.mxu1 %v2314_v44  ;;  %3352 = vmatpush3.msra.mxu0 %v2346_v3  ;;  %v2123_v3 = vld [vmem:[%s5158_s3 + $0x8] sm:$0xf] }
 0x929   : > { %3315 = vmatprep.subr.mxu1 %v2329_v11  ;;  %3353 = vmatprep.subr.mxu0 %v2361_v53 }
 0x92a   : > { %3316 = vmatpush3.msra.mxu1 %v2313_v54  ;;  %3354 = vmatpush3.msra.mxu0 %v2345_v55 }
 0x92b   : > { %3317 = vmatprep.subr.mxu1 %v2328_v56  ;;  %3355 = vmatprep.subr.mxu0 %v2360_v38  ;;  %v2128_v56 = vrot.slane %v2123_v3, %v3854_v57  ;;  %v2136_v38 = vrot.slane %v2123_v3, %v4064_v61 }
 0x92c   : > { %3318 = vmatpush3.msra.mxu1 %v2312_v39  ;;  %3356 = vmatpush3.msra.mxu0 %v2344_v59  ;;  %v2132_v59 = vrot.slane %v2123_v3, %v3857_v58 }
 0x92d   : > { %3319 = vmatprep.subr.mxu1 %v2327_v60  ;;  %3357 = vmatprep.subr.mxu0 %v2359_v63  ;;  %v2140_v60 = vrot.slane %v2123_v3, %v4067_v62  ;;  %v2737_v3 = vld [vmem:[%s5163_s8 + $0x670] sm:$0xff] }
 0x92e   : > { %3320 = vmatpush3.msra.mxu1 %v2311_v1  ;;  %3358 = vmatpush3.msra.mxu0 %v2343_v2 }
 0x92f   : > { %3321 = vmatprep.subr.mxu1 %v2326_v6  ;;  %3359 = vmatprep.subr.mxu0 %v2358_v8 }
 0x930   : > { %3322 = vmatpush3.msra.mxu1 %v2310_v9  ;;  %3360 = vmatpush3.msra.mxu0 %v2342_v41 }
 0x931   : > { %3323 = vmatprep.subr.mxu1 %v2325_v10  ;;  %3361 = vmatprep.subr.mxu0 %v2357_v43 }
 0x932   : > { %3324 = vmatpush3.msra.mxu1 %v2309_v12  ;;  %3362 = vmatpush3.msra.mxu0 %v2341_v13 }
 0x933   : > { %3325 = vmatprep.subr.mxu1 %v2324_v15  ;;  %3363 = vmatprep.subr.mxu0 %v2356_v16 }
 0x934   : > { %3326 = vmatpush3.msra.mxu1 %v2308_v17  ;;  %3364 = vmatpush3.msra.mxu0 %v2340_v19 }
 0x935   : > { %3327 = vmatprep.subr.mxu1 %v2323_v20  ;;  %3365 = vmatprep.subr.mxu0 %v2355_v21 }
 0x936   : > { %3328 = vmatpush3.msra.mxu1 %v2307_v23  ;;  %3366 = vmatpush3.msra.mxu0 %v2339_v24  ;;  %v2535_v24 = vld [vmem:[%s5162_s7 + $0x1e0] sm:$0xff] }
 0x937   : > { %2585 = vmatprep.subr.mxu1 %v2536_v25  ;;  %2662 = vmatprep.subr.mxu0 %v2538_v26  ;;  %v2537_v25 = vld [vmem:[%s5162_s7 + $0x1f0] sm:$0xff] }
 0x9a5   : > { %v3177_v27 = vpop.f32.mrf.mxu1  ;;  %v3215_v4 = vpop.f32.mrf.mxu0 }
 0x9a7   : > { %v3178_v28 = vpop.f32.mrf.mxu1  ;;  %v3216_v29 = vpop.f32.mrf.mxu0 }
 0x9a8   : > { %v3179_v30 = vadd.f32 %v3178_v28, %v3177_v27  ;;  %v3217_v0 = vadd.f32 %v3216_v29, %v3215_v4  ;;  %v2532_v28 = vld [vmem:[%s5162_s7 + $0x168] sm:$0xff]  ;;  %v2534_v29 = vld [vmem:[%s5162_s7 + $0x178] sm:$0xff] }
 0x9aa   : > { %v1949_v31 = vadd.f32 %v3217_v0, %v3179_v30 }
 0x9ab   : > { %v3180_v5 = vpop.f32.mrf.mxu1  ;;  %v3218_v32 = vpop.f32.mrf.mxu0 }
 0x9ad   : > { %v3181_v33 = vpop.f32.mrf.mxu1  ;;  %v3219_v36 = vpop.f32.mrf.mxu0 }
 0x9ae   : > { %v3182_v37 = vadd.f32 %v3181_v33, %v3180_v5  ;;  %v3220_v40 = vadd.f32 %v3219_v36, %v3218_v32  ;;  %v2533_v5 = vld [vmem:[%s5162_s7 + $0x170] sm:$0xff]  ;;  %v2528_v36 = vld [vmem:[%s5162_s7 + $0xe8] sm:$0xff] }
 0x9b0   : > { %v1954_v45 = vadd.f32 %v3220_v40, %v3182_v37  ;;  %v2530_v37 = vld [vmem:[%s5162_s7 + $0xf8] sm:$0xff]  ;;  %v2527_v40 = vld [vmem:[%s5162_s7 + $0xe0] sm:$0xff] }
 0x9c8   : > { %v3253_v46 = vpop.f32.mrf.mxu1  ;;  %v3291_v34 = vpop.f32.mrf.mxu0 }
 0x9ca   : > { %v3254_v35 = vpop.f32.mrf.mxu1  ;;  %v3292_v47 = vpop.f32.mrf.mxu0 }
 0x9cb   : > { %v3255_v48 = vadd.f32 %v3254_v35, %v3253_v46  ;;  %v3293_v49 = vadd.f32 %v3292_v47, %v3291_v34  ;;  %v2524_v46 = vld [vmem:[%s5162_s7 + $0x68] sm:$0xff]  ;;  %v2526_v34 = vld [vmem:[%s5162_s7 + $0x78] sm:$0xff]  ;;  %v2523_v35 = vld [vmem:[%s5162_s7 + $0x60] sm:$0xff] }
 0x9cc   : > { %v2525_v47 = vld [vmem:[%s5162_s7 + $0x70] sm:$0xff] }
 0x9cd   : > { %v2024_v50 = vadd.f32 %v3255_v48, %v1949_v31  ;;  %v2531_v31 = vld [vmem:[%s5162_s7 + $0x160] sm:$0xff]  ;;  %v2754_v48 = vld [vmem:[%s5163_s8 + $0x6f8] sm:$0xff] }
 0x9ce   : > { %v3256_v52 = vpop.f32.mrf.mxu1  ;;  %v3294_v42 = vpop.f32.mrf.mxu0 }
 0x9cf   : > { %v4829_v44 = vadd.f32 %v3293_v49, %v2024_v50  ;;  %v2786_v49 = vld [vmem:[%s5163_s8 + $0x7f8] sm:$0xff] }
 0x9d0   : > { %v3257_v11 = vpop.f32.mrf.mxu1  ;;  %v3295_v53 = vpop.f32.mrf.mxu0  ;;  %v2738_v50 = vld [vmem:[%s5163_s8 + $0x678] sm:$0xff] }
 0x9d1   : > { %v3258_v54 = vadd.f32 %v3257_v11, %v3256_v52  ;;  %v3296_v55 = vadd.f32 %v3295_v53, %v3294_v42  ;;  %v2770_v52 = vld [vmem:[%s5163_s8 + $0x778] sm:$0xff]  ;;  %v2753_v42 = vld [vmem:[%s5163_s8 + $0x6f0] sm:$0xff]  ;;  %v2752_v11 = vld [vmem:[%s5163_s8 + $0x6e8] sm:$0xff] }
 0x9d2   : > { %v2784_v53 = vld [vmem:[%s5163_s8 + $0x7e8] sm:$0xff] }
 0x9d3   : > { %v2029_v39 = vadd.f32 %v3258_v54, %v1954_v45  ;;  %v2529_v45 = vld [vmem:[%s5162_s7 + $0xf0] sm:$0xff]  ;;  %v2736_v54 = vld [vmem:[%s5163_s8 + $0x668] sm:$0xff] }
 0x9d4   : > { %v2211_v63 = vpop.f32.mrf.mxu1  ;;  %v2288_v1 = vpop.f32.mrf.mxu0 }
 0x9d5   : > { %v4838_v2 = vadd.f32 %v3296_v55, %v2029_v39  ;;  %v2212_v6 = vadd.f32 %v2211_v63, %v2128_v56  ;;  %v2289_v8 = vadd.f32 %v2288_v1, %v2136_v38  ;;  %v2768_v55 = vld [vmem:[%s5163_s8 + $0x768] sm:$0xff]  ;;  %v2767_v39 = vld [vmem:[%s5163_s8 + $0x760] sm:$0xff]  ;;  %v2734_v63 = vld [vmem:[%s5163_s8 + $0x658] sm:$0xff] }
 0x9d6   : > { %v2213_v9 = vpop.f32.mrf.mxu1  ;;  %v2290_v41 = vpop.f32.mrf.mxu0  ;;  %v2766_v1 = vld [vmem:[%s5163_s8 + $0x758] sm:$0xff] }
 0x9d7   : > { %v2214_v10 = vadd.f32 %v2213_v9, %v2132_v59  ;;  %v2291_v43 = vadd.f32 %v2290_v41, %v2140_v60  ;;  %v2299_v17 = vmax.f32 %v2212_v6, 0.0  ;;  %v2301_v19 = vmax.f32 %v2289_v8, 0.0  ;;  %v2749_v6 = vld [vmem:[%s5163_s8 + $0x6d0] sm:$0xff] }
 0x9d8   : > { %v2217_v12 = vpop.f32.mrf.mxu1  ;;  %v2294_v13 = vpop.f32.mrf.mxu0  ;;  %v2781_v8 = vld [vmem:[%s5163_s8 + $0x7d0] sm:$0xff] }
 0x9d9   : > { %v2300_v15 = vmax.f32 %v2214_v10, 0.0  ;;  %v2302_v16 = vmax.f32 %v2291_v43, 0.0  ;;  %v2218_v20 = vadd.f32 %v2217_v12, %v2128_v56  ;;  %v2295_v26 = vadd.f32 %v2294_v13, %v2136_v38  ;;  %v2783_v56 = vld [vmem:[%s5163_s8 + $0x7e0] sm:$0xff]  ;;  %v2733_v9 = vld [vmem:[%s5163_s8 + $0x650] sm:$0xff]  ;;  %v2748_v10 = vld [vmem:[%s5163_s8 + $0x6c8] sm:$0xff] }
 0x9da   : > { %v2219_v21 = vpop.f32.mrf.mxu1  ;;  %v2296_v23 = vpop.f32.mrf.mxu0  ;;  %v2735_v38 = vld [vmem:[%s5163_s8 + $0x660] sm:$0xff]  ;;  %v2765_v41 = vld [vmem:[%s5163_s8 + $0x750] sm:$0xff]  ;;  %v2780_v43 = vld [vmem:[%s5163_s8 + $0x7c8] sm:$0xff] }
 0x9db   : > { %v2220_v27 = vadd.f32 %v2219_v21, %v2132_v59  ;;  %v2297_v4 = vadd.f32 %v2296_v23, %v2140_v60  ;;  %2435 = vmatprep.mubr.f32.mxu1 %v2300_v15  ;;  %2510 = vmatprep.mubr.f32.mxu0 %v2302_v16  ;;  %v2303_v32 = vmax.f32 %v2218_v20, 0.0  ;;  %v2305_v33 = vmax.f32 %v2295_v26, 0.0  ;;  %v2750_v59 = vld [vmem:[%s5163_s8 + $0x6d8] sm:$0xff]  ;;  %v2732_v12 = vld [vmem:[%s5163_s8 + $0x648] sm:$0xff]  ;;  %v2747_v15 = vld [vmem:[%s5163_s8 + $0x6c0] sm:$0xff] }
 0x9dc   : > { %2436 = vmatmul.mubr.f32.vlgmr.msra.gmra.mxu1 %v2299_v17  ;;  %2511 = vmatmul.mubr.f32.vlgmr.msra.gmra.mxu0 %v2301_v19  ;;  %v2782_v60 = vld [vmem:[%s5163_s8 + $0x7d8] sm:$0xff]  ;;  %v2764_v13 = vld [vmem:[%s5163_s8 + $0x748] sm:$0xff]  ;;  %v2779_v16 = vld [vmem:[%s5163_s8 + $0x7c0] sm:$0xff] }
 0x9dd   : > { %v2304_v30 = vmax.f32 %v2220_v27, 0.0  ;;  %v2306_v0 = vmax.f32 %v2297_v4, 0.0  ;;  %2586 = vmatpush1.msra.mxu1 %v2535_v24  ;;  %2663 = vmatpush1.msra.mxu0 %v2537_v25  ;;  %v2731_v17 = vld [vmem:[%s5163_s8 + $0x640] sm:$0xff]  ;;  %v2746_v20 = vld [vmem:[%s5163_s8 + $0x6b8] sm:$0xff]  ;;  %v2745_v25 = vld [vmem:[%s5163_s8 + $0x6b0] sm:$0xff] }
 0x9de   : > { %2587 = vmatprep.subr.mxu1 %v2532_v28  ;;  %2664 = vmatprep.subr.mxu0 %v2534_v29  ;;  %v2763_v19 = vld [vmem:[%s5163_s8 + $0x740] sm:$0xff]  ;;  %v2778_v21 = vld [vmem:[%s5163_s8 + $0x7b8] sm:$0xff]  ;;  %v2777_v26 = vld [vmem:[%s5163_s8 + $0x7b0] sm:$0xff] }
 0x9df   : > { %2440 = vmatprep.mubr.f32.mxu1 %v2304_v30  ;;  %2515 = vmatprep.mubr.f32.mxu0 %v2306_v0  ;;  %v2730_v23 = vld [vmem:[%s5163_s8 + $0x638] sm:$0xff]  ;;  %v2729_v27 = vld [vmem:[%s5163_s8 + $0x630] sm:$0xff]  ;;  %v2744_v28 = vld [vmem:[%s5163_s8 + $0x6a8] sm:$0xff] }
 0x9e0   : > { %2588 = vmatpush1.msra.mxu1 %v2531_v31  ;;  %2665 = vmatpush1.msra.mxu0 %v2533_v5  ;;  %v2762_v24 = vld [vmem:[%s5163_s8 + $0x738] sm:$0xff]  ;;  %v2761_v4 = vld [vmem:[%s5163_s8 + $0x730] sm:$0xff]  ;;  %v2776_v29 = vld [vmem:[%s5163_s8 + $0x7a8] sm:$0xff] }
 0x9e1   : > { %2441 = vmatmul.mubr.f32.gmra.mxu1 %v2303_v32  ;;  %2516 = vmatmul.mubr.f32.gmra.mxu0 %v2305_v33  ;;  %v2728_v30 = vld [vmem:[%s5163_s8 + $0x628] sm:$0xff]  ;;  %v2743_v31 = vld [vmem:[%s5163_s8 + $0x6a0] sm:$0xff] }
 0x9e2   : > { %2589 = vmatprep.subr.mxu1 %v2528_v36  ;;  %2666 = vmatprep.subr.mxu0 %v2530_v37  ;;  %v2760_v0 = vld [vmem:[%s5163_s8 + $0x728] sm:$0xff]  ;;  %v2775_v5 = vld [vmem:[%s5163_s8 + $0x7a0] sm:$0xff]  ;;  %v2742_v36 = vld [vmem:[%s5163_s8 + $0x698] sm:$0xff] }
 0x9e3   : > { %2590 = vmatpush1.msra.mxu1 %v2527_v40  ;;  %2667 = vmatpush1.msra.mxu0 %v2529_v45  ;;  %v2727_v32 = vld [vmem:[%s5163_s8 + $0x620] sm:$0xff]  ;;  %v2774_v37 = vld [vmem:[%s5163_s8 + $0x798] sm:$0xff] }
 0x9e4   : > { %2591 = vmatprep.subr.mxu1 %v2524_v46  ;;  %2668 = vmatprep.subr.mxu0 %v2526_v34  ;;  %v2759_v33 = vld [vmem:[%s5163_s8 + $0x720] sm:$0xff]  ;;  %v2726_v40 = vld [vmem:[%s5163_s8 + $0x618] sm:$0xff]  ;;  %v2741_v46 = vld [vmem:[%s5163_s8 + $0x690] sm:$0xff] }
 0x9e5   : > { %2592 = vmatpush1.msra.mxu1 %v2523_v35  ;;  %2625 = vmatprep.mubr.f32.mxu1 %v3657_v51  ;;  %v2758_v45 = vld [vmem:[%s5163_s8 + $0x718] sm:$0xff]  ;;  %v2773_v34 = vld [vmem:[%s5163_s8 + $0x790] sm:$0xff] }
 0x9e6   : > { %2669 = vmatpush1.msra.mxu0 %v2525_v47  ;;  %2702 = vmatprep.mubr.f32.mxu0 %v3657_v51  ;;  %v2725_v35 = vld [vmem:[%s5163_s8 + $0x610] sm:$0xff] }
 0x9e7   : > { %3100 = vmatmul.mubr.msk.f32.vlgmr.msra.gmra.mxu1 %vm435_vm0, %v4073_v7  ;;  %3102 = vmatmul.mubr.msk.f32.vlgmr.msra.gmra.mxu0 %vm435_vm0, %v4073_v7  ;;  %v2785_v7 = vld [vmem:[%s5163_s8 + $0x7f0] sm:$0xff] }
 0x9e8   : > { %2631 = vmatprep.mubr.f32.mxu1 %v3657_v51  ;;  %2708 = vmatprep.mubr.f32.mxu0 %v3657_v51  ;;  %v2769_v51 = vld [vmem:[%s5163_s8 + $0x770] sm:$0xff] }
 0x9e9   : > { %3373 = vmatprep.subr.mxu1 %v2754_v48  ;;  %3411 = vmatprep.subr.mxu0 %v2786_v49  ;;  %v2757_v47 = vld [vmem:[%s5163_s8 + $0x710] sm:$0xff]  ;;  %v2740_v48 = vld [vmem:[%s5163_s8 + $0x688] sm:$0xff] }
 0x9ea   : > { %3374 = vmatpush3.msra.mxu1 %v2738_v50  ;;  %3412 = vmatpush3.msra.mxu0 %v2770_v52  ;;  %v2772_v49 = vld [vmem:[%s5163_s8 + $0x788] sm:$0xff] }
 0x9eb   : > { %3101 = vmatmul.mubr.msk.f32.gmra.mxu1 %vm435_vm0, %v4097_v14  ;;  %3103 = vmatmul.mubr.msk.f32.gmra.mxu0 %vm435_vm0, %v4097_v14  ;;  %v2751_v14 = vld [vmem:[%s5163_s8 + $0x6e0] sm:$0xff]  ;;  %v2724_v50 = vld [vmem:[%s5163_s8 + $0x608] sm:$0xff] }
 0x9ec   : > { %3375 = vmatprep.subr.mxu1 %v2753_v42  ;;  %3413 = vmatprep.subr.mxu0 %v2785_v7  ;;  %v2756_v52 = vld [vmem:[%s5163_s8 + $0x708] sm:$0xff]  ;;  %v2739_v42 = vld [vmem:[%s5163_s8 + $0x680] sm:$0xff] }
 0x9ed   : > { %3376 = vmatpush3.msra.mxu1 %v2737_v3  ;;  %3414 = vmatpush3.msra.mxu0 %v2769_v51  ;;  %v2771_v7 = vld [vmem:[%s5163_s8 + $0x780] sm:$0xff] }
 0x9ee   : > { %3377 = vmatprep.subr.mxu1 %v2752_v11  ;;  %3415 = vmatprep.subr.mxu0 %v2784_v53  ;;  %v2723_v3 = vld [vmem:[%s5163_s8 + $0x600] sm:$0xff] }
 0x9ef   : > { %3378 = vmatpush3.msra.mxu1 %v2736_v54  ;;  %3416 = vmatpush3.msra.mxu0 %v2768_v55  ;;  %v2755_v51 = vld [vmem:[%s5163_s8 + $0x700] sm:$0xff] }
 0x9f0   : > { %3379 = vmatprep.subr.mxu1 %v2751_v14  ;;  %3417 = vmatprep.subr.mxu0 %v2783_v56 }
 0x9f1   : > { %3380 = vmatpush3.msra.mxu1 %v2735_v38  ;;  %3418 = vmatpush3.msra.mxu0 %v2767_v39 }
 0x9f2   : > { %3381 = vmatprep.subr.mxu1 %v2750_v59  ;;  %3419 = vmatprep.subr.mxu0 %v2782_v60  ;;  %v2539_v60 = vld [vmem:[%s5158_s3 + $0xc] sm:$0xf] }
 0x9f3   : > { %3382 = vmatpush3.msra.mxu1 %v2734_v63  ;;  %3420 = vmatpush3.msra.mxu0 %v2766_v1 }
 0x9f4   : > { %3383 = vmatprep.subr.mxu1 %v2749_v6  ;;  %3421 = vmatprep.subr.mxu0 %v2781_v8 }
 0x9f5   : > { %3384 = vmatpush3.msra.mxu1 %v2733_v9  ;;  %3422 = vmatpush3.msra.mxu0 %v2765_v41  ;;  %v2544_v41 = vrot.slane %v2539_v60, %v3854_v57 }
 0x9f6   : > { %3385 = vmatprep.subr.mxu1 %v2748_v10  ;;  %3423 = vmatprep.subr.mxu0 %v2780_v43  ;;  %v2552_v10 = vrot.slane %v2539_v60, %v4064_v61 }
 0x9f7   : > { %3386 = vmatpush3.msra.mxu1 %v2732_v12  ;;  %3424 = vmatpush3.msra.mxu0 %v2764_v13  ;;  %v2548_v12 = vrot.slane %v2539_v60, %v3857_v58  ;;  %v2556_v13 = vrot.slane %v2539_v60, %v4067_v62 }
 0x9f8   : > { %3387 = vmatprep.subr.mxu1 %v2747_v15  ;;  %3425 = vmatprep.subr.mxu0 %v2779_v16 }
 0x9f9   : > { %3388 = vmatpush3.msra.mxu1 %v2731_v17  ;;  %3426 = vmatpush3.msra.mxu0 %v2763_v19 }
 0x9fa   : > { %3389 = vmatprep.subr.mxu1 %v2746_v20  ;;  %3427 = vmatprep.subr.mxu0 %v2778_v21 }
 0x9fb   : > { %3390 = vmatpush3.msra.mxu1 %v2730_v23  ;;  %3428 = vmatpush3.msra.mxu0 %v2762_v24 }
 0x9fc   : > { %3391 = vmatprep.subr.mxu1 %v2745_v25  ;;  %3429 = vmatprep.subr.mxu0 %v2777_v26 }
 0x9fd   : > { %3392 = vmatpush3.msra.mxu1 %v2729_v27  ;;  %3430 = vmatpush3.msra.mxu0 %v2761_v4 }
 0x9fe   : > { %3393 = vmatprep.subr.mxu1 %v2744_v28  ;;  %3431 = vmatprep.subr.mxu0 %v2776_v29 }
 0x9ff   : > { %3394 = vmatpush3.msra.mxu1 %v2728_v30  ;;  %3432 = vmatpush3.msra.mxu0 %v2760_v0 }
 0xa00   : > { %3395 = vmatprep.subr.mxu1 %v2743_v31  ;;  %3433 = vmatprep.subr.mxu0 %v2775_v5 }
 0xa01   : > { %3396 = vmatpush3.msra.mxu1 %v2727_v32  ;;  %3434 = vmatpush3.msra.mxu0 %v2759_v33 }
 0xa02   : > { %3397 = vmatprep.subr.mxu1 %v2742_v36  ;;  %3435 = vmatprep.subr.mxu0 %v2774_v37 }
 0xa03   : > { %3398 = vmatpush3.msra.mxu1 %v2726_v40  ;;  %3436 = vmatpush3.msra.mxu0 %v2758_v45 }
 0xa04   : > { %3399 = vmatprep.subr.mxu1 %v2741_v46  ;;  %3437 = vmatprep.subr.mxu0 %v2773_v34 }
 0xa05   : > { %3400 = vmatpush3.msra.mxu1 %v2725_v35  ;;  %3438 = vmatpush3.msra.mxu0 %v2757_v47 }
 0xa06   : > { %3401 = vmatprep.subr.mxu1 %v2740_v48  ;;  %3439 = vmatprep.subr.mxu0 %v2772_v49  ;;  %v3104_v48 = vld [vmem:[%s5157_s2 + $0x8] ss:$0 sm:$0xff] }
 0xa07   : > { %3402 = vmatpush3.msra.mxu1 %v2724_v50  ;;  %3440 = vmatpush3.msra.mxu0 %v2756_v52 }
 0xa08   : > { %3403 = vmatprep.subr.mxu1 %v2739_v42  ;;  %3441 = vmatprep.subr.mxu0 %v2771_v7 }
 0xa09   : > { %3404 = vmatpush3.msra.mxu1 %v2723_v3  ;;  %3442 = vmatpush3.msra.mxu0 %v2755_v51 }
 0xa9c   : > { %v3329_v11 = vpop.f32.mrf.mxu1  ;;  %v3367_v53 = vpop.f32.mrf.mxu0 }
 0xa9e   : > { %v3330_v54 = vpop.f32.mrf.mxu1  ;;  %v3368_v55 = vpop.f32.mrf.mxu0 }
 0xa9f   : > { %v3331_v14 = vadd.f32 %v3330_v54, %v3329_v11  ;;  %v3369_v56 = vadd.f32 %v3368_v55, %v3367_v53 }
 0xaa1   : > { %v2513_v38 = vadd.f32 %v3369_v56, %v3331_v14  ;;  %v3332_v39 = vpop.f32.mrf.mxu1  ;;  %v3370_v59 = vpop.f32.mrf.mxu0 }
 0xaa3   : > { %v2521_v63 = vadd.f32 %v2513_v38, %v4829_v44  ;;  %v3333_v1 = vpop.f32.mrf.mxu1  ;;  %v3371_v6 = vpop.f32.mrf.mxu0 }
 0xaa4   : > { %v3334_v8 = vadd.f32 %v3333_v1, %v3332_v39  ;;  %v3372_v9 = vadd.f32 %v3371_v6, %v3370_v59 }
 0xaa6   : > { %v2518_v43 = vadd.f32 %v3372_v9, %v3334_v8 }
 0xaa7   : > { %v2627_v15 = vpop.f32.mrf.mxu1  ;;  %v2704_v16 = vpop.f32.mrf.mxu0 }
 0xaa8   : > { %v2522_v17 = vadd.f32 %v2518_v43, %v4838_v2  ;;  %v2628_v19 = vadd.f32 %v2627_v15, %v2544_v41  ;;  %v2705_v20 = vadd.f32 %v2704_v16, %v2552_v10 }
 0xaa9   : > { %v2629_v44 = vpop.f32.mrf.mxu1  ;;  %v2706_v21 = vpop.f32.mrf.mxu0 }
 0xaaa   : > { %v2630_v23 = vadd.f32 %v2629_v44, %v2548_v12  ;;  %v2707_v24 = vadd.f32 %v2706_v21, %v2556_v13  ;;  %v2715_v61 = vmax.f32 %v2628_v19, 0.0  ;;  %v2717_v4 = vmax.f32 %v2705_v20, 0.0 }
 0xaab   : > { %v2633_v25 = vpop.f32.mrf.mxu1  ;;  %v2710_v26 = vpop.f32.mrf.mxu0 }
 0xaac   : > { %v2716_v57 = vmax.f32 %v2630_v23, 0.0  ;;  %v2718_v27 = vmax.f32 %v2707_v24, 0.0  ;;  %v2634_v28 = vadd.f32 %v2633_v25, %v2544_v41  ;;  %v2711_v58 = vadd.f32 %v2710_v26, %v2552_v10 }
 0xaad   : > { %v2635_v29 = vpop.f32.mrf.mxu1  ;;  %v2712_v62 = vpop.f32.mrf.mxu0 }
 0xaae   : > { %v2636_v30 = vadd.f32 %v2635_v29, %v2548_v12  ;;  %v2713_v0 = vadd.f32 %v2712_v62, %v2556_v13  ;;  %2851 = vmatprep.mubr.f32.mxu1 %v2716_v57  ;;  %2926 = vmatprep.mubr.f32.mxu0 %v2718_v27  ;;  %v2719_v5 = vmax.f32 %v2634_v28, 0.0  ;;  %v2721_v32 = vmax.f32 %v2711_v58, 0.0 }
 0xaaf   : > { %2852 = vmatmul.mubr.f32.vlgmr.msra.gmra.mxu1 %v2715_v61  ;;  %2927 = vmatmul.mubr.f32.vlgmr.msra.gmra.mxu0 %v2717_v4 }
 0xab0   : > { %v2720_v2 = vmax.f32 %v2636_v30, 0.0  ;;  %v2722_v31 = vmax.f32 %v2713_v0, 0.0 }
 0xab2   : > { %2856 = vmatprep.mubr.f32.mxu1 %v2720_v2  ;;  %2931 = vmatprep.mubr.f32.mxu0 %v2722_v31 }
 0xab3   : > { %2857 = vmatmul.mubr.f32.gmra.mxu1 %v2719_v5  ;;  %2932 = vmatmul.mubr.f32.gmra.mxu0 %v2721_v32 }
 0xb6f   : > { %v3405_v33 = vpop.f32.mrf.mxu1  ;;  %v3443_v36 = vpop.f32.mrf.mxu0 }
 0xb71   : > { %v3406_v37 = vpop.f32.mrf.mxu1  ;;  %v3444_v40 = vpop.f32.mrf.mxu0 }
 0xb72   : > { %v3407_v45 = vadd.f32 %v3406_v37, %v3405_v33  ;;  %v3445_v46 = vadd.f32 %v3444_v40, %v3443_v36 }
 0xb73   : > { %v3408_v34 = vpop.f32.mrf.mxu1  ;;  %v3446_v35 = vpop.f32.mrf.mxu0 }
 0xb74   : > { %v2929_v47 = vadd.f32 %v3445_v46, %v3407_v45 }
 0xb75   : > { %v3409_v49 = vpop.f32.mrf.mxu1  ;;  %v3447_v50 = vpop.f32.mrf.mxu0 }
 0xb76   : > { %v2937_v52 = vadd.f32 %v2929_v47, %v2521_v63  ;;  %v3410_v42 = vadd.f32 %v3409_v49, %v3408_v34  ;;  %v3448_v7 = vadd.f32 %v3447_v50, %v3446_v35 }
 0xb78   : > { %v2943_v3 = vadd.f32 %v3104_v48, %v2937_v52  ;;  %v2934_v51 = vadd.f32 %v3448_v7, %v3410_v42 }
 0xb7a   : > { %v2945_v11 = vadd.f32 %v2943_v3, %v3996_v18  ;;  %v2938_v53 = vadd.f32 %v2934_v51, %v2522_v17 }
 0xb7c   : > { %2947 = vst.msk [vmem:[%s428_s22] sm:$0xff] %vm435_vm0, %v2945_v11  ;;  %v2944_v54 = vadd.f32 %v3104_v48, %v2938_v53 }
 0xb7e   : > { %v2946_v55 = vadd.f32 %v2944_v54, %v4001_v22 }
 0xb80   : > { %2948 = vst.msk [vmem:[%s428_s22 + $0x8] sm:$0xff] %vm435_vm0, %v2946_v55 }
 0xb81   : > { %3605 = shalt.err (!%p3602_p5)
}
 0xb82   : > { %s3606_s19 = scalar_lea.hbm %s5108_s28, 256  ;;  %s3610_s25 = scalar_lea.hbm %s5164_s9, 512 }
 0xb83   : > { %p3607_p7 = scmp.ne.s32.totalorder %s5108_s28, %s3606_s19  ;;  %p3611_p12 = scmp.lt.s32.totalorder %s5108_s28, %s5164_s9 }
 0xb84   : > { %p3612_p13 = scmp.lt.s32.totalorder %s3610_s25, %s3606_s19 }
 0xb85   : > { %p3608_p10 = pnand %p3607_p7, %p3754_p6 }
 0xb86   : > { %p3613_p0 = por %p3612_p13, %p3611_p12 }
 0xb87   : > { %p3609_p11 = pneg %p3608_p10 }
 0xb89   : > { %p3614_p1 = pnand %p3613_p0, %p3609_p11 }
 0xb8b   : > { %3617 = shalt.err (!%p3614_p1)
}
 0xb8c   : > { %s3659_s29 = smov 128   ;;  %s3660_s14 = smov 256  }
 0xb8d   : > { %s3661_s16 = smov 8  }
 0xb8e   : > { %3514 = dma.vmem_to_hbm [thread:$0]  (%p3754_p6), %s5102_s23, 256, %s5108_s28, %s5114_s24, %s3659_s29, %s3660_s14, %s3661_s16  }
 0xb8f PF: > { %s2977_s17 = sand.u32 1, %s3640_s30   ;;  %p3517_p2 = pnand %p3050_p9, %p3758_p8 }
 0xb90   : > { %s2978_s19 = scalar_lea.sflag [#allocation6], %s2977_s17 }
 0xb91   : > { %p3518_p3 = pneg %p3517_p2 }
 0xb93   : > { %3635 = dma.done.wait (%p3518_p3), %s2978_s19, 256  }
 0xb94   : > { %3637 = vsyncadd (%p3518_p3), %s2978_s19, 4294967040  ;;  %p19_p4 = scmp.ge.s32.totalorder %s3735_s15, 4   ;;  %s5178_s30 = smov %s3644_s10 }
 0xb95   : > { %s5179_s10 = smov %s3648_s11  ;;  %s5180_s11 = smov %s3748_s18 }
 0xb96   : > { %s5181_s12 = smov %s3735_s15  ;;  %21 = sbr.rel (!%p19_p4) target bundleno = 3 (0x3), region = 180 }
 0xb9b   :  { %2983 = vsyncpa [#allocation6], 1 }
 0xb9c   :  { %2985 = vsyncpa [#allocation6 + $0x1], 1 }

</bundles_post_ra>
